<compile_context>
chip_gen: v7x
topology: tpu7x:2x2x1
jax: 0.10.0
libtpu: 0.0.40
codegen_flags: <defaults>
</compile_context>

<pallas_src>
import math

import jax
import jax.numpy as jnp
from jax import lax
from jax.experimental import pallas as pl
from jax.experimental.pallas import tpu as pltpu

_MXU_DTYPE = jnp.bfloat16  # MXU input dtype; accumulation is always f32.


def _mxu_dot(a, b):
    return jnp.dot(a.astype(_MXU_DTYPE), b.astype(_MXU_DTYPE),
                   preferred_element_type=jnp.float32)


def _sigmoid(x):
    return 1.0 / (1.0 + jnp.exp(-x))


# ----------------------------------------------------------------------------
# Gridded linear:  y = x @ w + b   (M,K)x(K,N) -> (M,N)
# ----------------------------------------------------------------------------
def _linear_kernel(x_ref, w_ref, b_ref, o_ref, acc_ref):
    k = pl.program_id(2)

    @pl.when(k == 0)
    def _():
        acc_ref[...] = jnp.zeros_like(acc_ref)

    acc_ref[...] += _mxu_dot(x_ref[...], w_ref[...])

    @pl.when(k == pl.num_programs(2) - 1)
    def _():
        o_ref[...] = acc_ref[...] + b_ref[...]


def _pick_tile(dim, cap, align):
    """Largest tile <= cap that divides dim and respects lane/sublane alignment;
    falls back to the full dim (always a legal BlockSpec)."""
    if dim <= cap:
        return dim
    t = (cap // align) * align
    while t >= align:
        if dim % t == 0:
            return t
        t -= align
    return dim


def linear(x, w, b, *, tm_cap=256, tn_cap=256, tk_cap=1024):
    M, K = x.shape
    _, N = w.shape
    tm = _pick_tile(M, tm_cap, 8)
    tn = _pick_tile(N, tn_cap, 128)
    tk = _pick_tile(K, tk_cap, 128)
    grid = (M // tm, N // tn, K // tk)
    return pl.pallas_call(
        _linear_kernel,
        out_shape=jax.ShapeDtypeStruct((M, N), jnp.float32),
        grid=grid,
        in_specs=[
            pl.BlockSpec((tm, tk), lambda i, j, k: (i, k)),
            pl.BlockSpec((tk, tn), lambda i, j, k: (k, j)),
            pl.BlockSpec((1, tn), lambda i, j, k: (0, j)),
        ],
        out_specs=pl.BlockSpec((tm, tn), lambda i, j, k: (i, j)),
        scratch_shapes=[pltpu.VMEM((tm, tn), jnp.float32)],
        compiler_params=pltpu.CompilerParams(
            dimension_semantics=("parallel", "parallel", "arbitrary"),
            vmem_limit_bytes=64 * 1024 * 1024),
    )(x, w, b.reshape(1, N))


# ----------------------------------------------------------------------------
# Fused 2-layer LSTM recurrence: one pallas_call, grid over time.
# Layer-1 input gates gx1[t] = x[t] @ Wih1 + b1 are precomputed (hoisted matmul);
# the kernel adds h1 @ Whh1, applies gate nonlinearities, then immediately feeds
# layer 2 (h1 @ Wih2 + h2 @ Whh2 + b2).  Both layers' h/c stay resident in VMEM
# scratch for all T steps; the bf16 weights use constant index_maps so they are
# DMA'd once and stay resident.
# ----------------------------------------------------------------------------
def _lstm2_recurrent_kernel(gx1_ref, whh1_ref, wih2_ref, whh2_ref, b2_ref,
                            h_out_ref, h1_scr, c1_scr, h2_scr, c2_scr):
    t = pl.program_id(0)
    H = whh1_ref.shape[0]

    @pl.when(t == 0)
    def _():
        h1_scr[...] = jnp.zeros_like(h1_scr)
        c1_scr[...] = jnp.zeros_like(c1_scr)
        h2_scr[...] = jnp.zeros_like(h2_scr)
        c2_scr[...] = jnp.zeros_like(c2_scr)

    def cell(gates, c_prev):
        # PyTorch gate order: input, forget, cell(g), output.  With H a multiple
        # of 128 each slice is lane-aligned (no cross-lane shuffles).
        i = _sigmoid(gates[:, 0:H])
        f = _sigmoid(gates[:, H:2 * H])
        g = jnp.tanh(gates[:, 2 * H:3 * H])
        o = _sigmoid(gates[:, 3 * H:4 * H])
        c_new = f * c_prev + i * g
        return o * jnp.tanh(c_new), c_new

    # Layer 1 (input gates precomputed).
    g1 = gx1_ref[0] + _mxu_dot(h1_scr[...], whh1_ref[...])
    h1, c1 = cell(g1, c1_scr[...])
    h1_scr[...] = h1
    c1_scr[...] = c1

    # Layer 2 (input projection done in-loop on the already-serial path).
    g2 = (_mxu_dot(h1, wih2_ref[...]) + b2_ref[...]
          + _mxu_dot(h2_scr[...], whh2_ref[...]))
    h2, c2 = cell(g2, c2_scr[...])
    h2_scr[...] = h2
    c2_scr[...] = c2

    h_out_ref[...] = h2[None, :, :]


def main_lstm_2layer(x_tm, layer1, layer2):
    """batch_first-equivalent 2-layer LSTM with zero initial state.
    x_tm: (T, B, D_in) time-major.  Returns top-layer hidden sequence (T, B, H)."""
    (wih1, whh1, b1), (wih2, whh2, b2) = layer1, layer2
    T, B, D = x_tm.shape
    H = whh1.shape[0]
    G = 4 * H

    # Hoisted layer-1 input projection over all timesteps (one big matmul).
    gx1 = linear(x_tm.reshape(T * B, D), wih1, b1).reshape(T, B, G)

    return pl.pallas_call(
        _lstm2_recurrent_kernel,
        out_shape=jax.ShapeDtypeStruct((T, B, H), jnp.float32),
        grid=(T,),
        in_specs=[
            pl.BlockSpec((1, B, G), lambda t: (t, 0, 0)),
            pl.BlockSpec((H, G), lambda t: (0, 0)),   # Whh1 resident (bf16)
            pl.BlockSpec((H, G), lambda t: (0, 0)),   # Wih2 resident (bf16)
            pl.BlockSpec((H, G), lambda t: (0, 0)),   # Whh2 resident (bf16)
            pl.BlockSpec((1, G), lambda t: (0, 0)),   # b2 resident (f32)
        ],
        out_specs=pl.BlockSpec((1, B, H), lambda t: (t, 0, 0)),
        scratch_shapes=[pltpu.VMEM((B, H), jnp.float32)] * 4,  # h1, c1, h2, c2
        compiler_params=pltpu.CompilerParams(
            dimension_semantics=("arbitrary",),
            vmem_limit_bytes=64 * 1024 * 1024),
    )(gx1,
      whh1.astype(_MXU_DTYPE),
      wih2.astype(_MXU_DTYPE),
      whh2.astype(_MXU_DTYPE),
      b2.reshape(1, G))


# ----------------------------------------------------------------------------
# Fully fused 2-layer IMU LSTM (hidden=6): one kernel, the whole working set
# (<10 KB) lives in VMEM; loops over the sub-sequence and both layers internally
# and returns only the last-step hidden state of layer 2.
# ----------------------------------------------------------------------------
def _imu_lstm_kernel(x_ref, wih1_ref, whh1_ref, b1_ref, wih2_ref, whh2_ref,
                     b2_ref, out_ref):
    S, N, _ = x_ref.shape
    H = whh1_ref.shape[0]

    def cell(gates, c_prev):
        i = _sigmoid(gates[:, 0:H])
        f = _sigmoid(gates[:, H:2 * H])
        g = jnp.tanh(gates[:, 2 * H:3 * H])
        o = _sigmoid(gates[:, 3 * H:4 * H])
        c_new = f * c_prev + i * g
        return o * jnp.tanh(c_new), c_new

    h1 = jnp.zeros((N, H), jnp.float32)
    c1 = jnp.zeros((N, H), jnp.float32)
    h2 = jnp.zeros((N, H), jnp.float32)
    c2 = jnp.zeros((N, H), jnp.float32)
    for s in range(S):  # static unroll, S is small
        g1 = (_mxu_dot(x_ref[s], wih1_ref[...]) + b1_ref[...]
              + _mxu_dot(h1, whh1_ref[...]))
        h1, c1 = cell(g1, c1)
        g2 = (_mxu_dot(h1, wih2_ref[...]) + b2_ref[...]
              + _mxu_dot(h2, whh2_ref[...]))
        h2, c2 = cell(g2, c2)
    out_ref[...] = h2


def imu_lstm(x_sm, layer1, layer2):
    """x_sm: (S, N, 6) time-major IMU sub-sequences; returns (N, H) final hidden."""
    (wih1, whh1, b1), (wih2, whh2, b2) = layer1, layer2
    S, N, Din = x_sm.shape
    H = whh1.shape[0]
    G = 4 * H
    return pl.pallas_call(
        _imu_lstm_kernel,
        out_shape=jax.ShapeDtypeStruct((N, H), jnp.float32),
        grid=(1,),
        in_specs=[
            pl.BlockSpec((S, N, Din), lambda i: (0, 0, 0)),
            pl.BlockSpec((Din, G), lambda i: (0, 0)),
            pl.BlockSpec((H, G), lambda i: (0, 0)),
            pl.BlockSpec((1, G), lambda i: (0, 0)),
            pl.BlockSpec((H, G), lambda i: (0, 0)),
            pl.BlockSpec((H, G), lambda i: (0, 0)),
            pl.BlockSpec((1, G), lambda i: (0, 0)),
        ],
        out_specs=pl.BlockSpec((N, H), lambda i: (0, 0)),
        compiler_params=pltpu.CompilerParams(dimension_semantics=("arbitrary",)),
    )(x_sm, wih1, whh1, b1.reshape(1, G), wih2, whh2, b2.reshape(1, G))


# ----------------------------------------------------------------------------
# Fused output heads: se3 = (x @ w1 + b1) @ w2 + b2 in one kernel
# (the (BT, 128) intermediate never leaves VMEM; the 6-wide result is stored once).
# ----------------------------------------------------------------------------
def _head_kernel(x_ref, w1_ref, b1_ref, w2_ref, b2_ref, o_ref):
    h = _mxu_dot(x_ref[...], w1_ref[...]) + b1_ref[...]
    o_ref[...] = _mxu_dot(h, w2_ref[...]) + b2_ref[...]


def fused_heads(x, w1, b1, w2, b2):
    M, K = x.shape
    L = w1.shape[1]
    N = w2.shape[1]
    return pl.pallas_call(
        _head_kernel,
        out_shape=jax.ShapeDtypeStruct((M, N), jnp.float32),
        grid=(1,),
        in_specs=[
            pl.BlockSpec((M, K), lambda i: (0, 0)),
            pl.BlockSpec((K, L), lambda i: (0, 0)),
            pl.BlockSpec((1, L), lambda i: (0, 0)),
            pl.BlockSpec((L, N), lambda i: (0, 0)),
            pl.BlockSpec((1, N), lambda i: (0, 0)),
        ],
        out_specs=pl.BlockSpec((M, N), lambda i: (0, 0)),
        compiler_params=pltpu.CompilerParams(dimension_semantics=("arbitrary",)),
    )(x, w1, b1.reshape(1, L), w2, b2.reshape(1, N))


# ----------------------------------------------------------------------------
# SE3Comp (tiny 4x4 scalar work — plain JAX, vmap over batch, scan over time)
# ----------------------------------------------------------------------------
def _so3_RV(omega):
    ox, oy, oz = omega[0], omega[1], omega[2]
    zero = jnp.zeros((), jnp.float32)
    skew = jnp.stack([
        jnp.stack([zero, -oz, oy]),
        jnp.stack([oz, zero, -ox]),
        jnp.stack([-oy, ox, zero]),
    ])
    skew_sqr = skew @ skew
    theta_sqr = ox * ox + oy * oy + oz * oz
    theta = jnp.sqrt(theta_sqr)
    theta_cube = theta_sqr * theta

    safe_theta = jnp.where(theta_sqr > 0, theta, 1.0)
    sin_div_theta = jnp.where(theta_sqr > 0, jnp.sin(theta) / safe_theta, 0.0)

    safe_tsq = jnp.where(theta_sqr > 0, theta_sqr, 1.0)
    omc_div = (1.0 - jnp.cos(theta)) / safe_tsq
    taylor_c = (0.5 + theta ** 4 / 720.0 + theta ** 8 / 3628800.0
                - theta ** 2 / 24.0 - theta ** 6 / 40320.0)
    A = jnp.where(theta_sqr > 0.1, omc_div,
                  jnp.where(theta_sqr < 1e-6, 0.0, taylor_c))

    safe_tcube = jnp.where(theta_cube > 0, theta_cube, 1.0)
    tms_div = (theta - jnp.sin(theta)) / safe_tcube
    taylor_s = (1.0 / 6.0 + theta ** 4 / 5040.0 + theta ** 8 / 39916800.0
                - theta ** 2 / 120.0 - theta ** 6 / 362880.0)
    Bc = jnp.where(theta_cube > 0.1, tms_div,
                   jnp.where(theta_sqr < 1e-6, 0.0, taylor_s))

    I = jnp.eye(3, dtype=jnp.float32)
    R = I + sin_div_theta * skew + A * skew_sqr
    V = I + A * skew + Bc * skew_sqr
    return R, V


def _q_to_matrix(q):
    qw, qx, qy, qz = q[0], q[1], q[2], q[3]
    return jnp.stack([
        jnp.stack([1 - 2 * qy * qy - 2 * qz * qz, 2 * qx * qy - 2 * qz * qw,
                   2 * qx * qz + 2 * qy * qw]),
        jnp.stack([2 * qx * qy + 2 * qz * qw, 1 - 2 * qx * qx - 2 * qz * qz,
                   2 * qy * qz - 2 * qx * qw]),
        jnp.stack([2 * qx * qz - 2 * qy * qw, 2 * qy * qz + 2 * qx * qw,
                   1 - 2 * qx * qx - 2 * qy * qy]),
    ])


def _m_to_r7(M):
    m00, m11, m22 = M[0, 0], M[1, 1], M[2, 2]
    tA = 1 + m00 - m11 - m22
    qA = jnp.stack([M[2, 1] - M[1, 2], tA, M[0, 1] + M[1, 0], M[2, 0] + M[0, 2]])
    tB = 1 - m00 + m11 - m22
    qB = jnp.stack([M[0, 2] - M[2, 0], M[0, 1] + M[1, 0], tB, M[1, 2] + M[2, 1]])
    tC = 1 - m00 - m11 + m22
    qC = jnp.stack([M[1, 0] - M[0, 1], M[2, 0] + M[0, 2], M[1, 2] + M[2, 1], tC])
    tD = 1 + m00 + m11 + m22
    qD = jnp.stack([tD, M[2, 1] - M[1, 2], M[0, 2] - M[2, 0], M[1, 0] - M[0, 1]])

    cond1 = m22 < 0
    cond2 = m00 > m11
    cond3 = m00 < -m11
    t = jnp.where(cond1, jnp.where(cond2, tA, tB), jnp.where(cond3, tC, tD))
    q = jnp.where(cond1, jnp.where(cond2, qA, qB), jnp.where(cond3, qC, qD))
    q = q * (0.5 / jnp.sqrt(t))
    q = jnp.where(q[0] < 0, -q, q)
    return jnp.concatenate([jnp.stack([M[0, 3], M[1, 3], M[2, 3]]), q])  # (7,)


def se3_comp(Tg, xi):
    """Tg: (7,) = (x,y,z,qw,qx,qy,qz); xi: (6,) = (rho, omega) -> composed (7,)."""
    rho = xi[0:3]
    omega = xi[3:6]
    R, V = _so3_RV(omega)
    Txi = jnp.zeros((4, 4), jnp.float32)
    Txi = Txi.at[0:3, 0:3].set(R).at[3, 3].set(1.0).at[0:3, 3].set(V @ rho)
    Tg_m = jnp.zeros((4, 4), jnp.float32)
    Tg_m = (Tg_m.at[0:3, 0:3].set(_q_to_matrix(Tg[3:7]))
            .at[3, 3].set(1.0).at[0:3, 3].set(Tg[0:3]))
    return _m_to_r7(Txi @ Tg_m)


# ----------------------------------------------------------------------------
# Vinet forward
# ----------------------------------------------------------------------------
def vinet_forward(params, image, imu, init_SE3):
    B, T, P, C, H, W = image.shape

    # FlowNetC feature extraction per timestep.
    # TODO(synk): FlowNetC (external class + .pth checkpoint) is unavailable;
    # it is replaced by a deterministic Pallas linear projection to FLOW_FEAT.
    feat_in = image.reshape(B * T, P * C * H * W)
    flow_feat = linear(feat_in, params["w_flow"], params["b_flow"])      # (BT, F)

    # IMU LSTM: each (b, t) runs the shared 2-layer LSTM over its (S, 6) block
    # (batch_first) ==> equivalent to a single batch of B*T sub-sequences.
    _, _, S, Dimu = imu.shape
    imu_tm = imu.reshape(B * T, S, Dimu).transpose(1, 0, 2)              # (S, BT, 6)
    imu_out = imu_lstm(imu_tm, *params["rnn_imu"])                       # (BT, 6)

    # Main fused 2-layer LSTM over concatenated features (time-major recurrence).
    cat = jnp.concatenate([flow_feat, imu_out], axis=1)                  # (BT, F+6)
    D = cat.shape[1]
    cat_tm = cat.reshape(B, T, D).transpose(1, 0, 2)                     # (T, B, D)
    r_out_tm = main_lstm_2layer(cat_tm, *params["rnn"])                  # (T, B, HID)
    HID = r_out_tm.shape[-1]
    r_out = r_out_tm.transpose(1, 0, 2).reshape(B * T, HID)              # (BT, HID)

    # Fused linear1 -> linear2 heads.
    se3_flat = fused_heads(r_out, params["w1"], params["b1"],
                           params["w2"], params["b2"])                   # (BT, 6)
    se3 = se3_flat.reshape(B, T, 6, 1)

    # Chained SE(3) composition across timesteps (re-initialized per batch elt).
    def compose_one(init7, xis):                    # init7: (7,), xis: (T, 6)
        def step(carry, xi):
            return se3_comp(carry, xi), None
        out, _ = lax.scan(step, init7, xis)
        return out

    last = jax.vmap(compose_one)(init_SE3[:, :, 0], se3[:, :, :, 0])     # (B, 7)
    return se3, last.reshape(B, 7, 1)


# ----------------------------------------------------------------------------
# Deterministic parameter init (PyTorch-style uniform(-1/sqrt(H), 1/sqrt(H)))
# NOTE: PyTorch LSTM has b_ih and b_hh; loading a real checkpoint requires
# b = b_ih + b_hh.  Self-initialized single bias here.
# ----------------------------------------------------------------------------
def init_lstm_params(key, input_size, hidden_size, num_layers):
    layers = []
    bound = 1.0 / math.sqrt(hidden_size)
    for l in range(num_layers):
        in_sz = input_size if l == 0 else hidden_size
        key, k1, k2, k3 = jax.random.split(key, 4)
        wih = jax.random.uniform(k1, (in_sz, 4 * hidden_size), jnp.float32,
                                 -bound, bound)
        whh = jax.random.uniform(k2, (hidden_size, 4 * hidden_size), jnp.float32,
                                 -bound, bound)
        b = jax.random.uniform(k3, (4 * hidden_size,), jnp.float32, -bound, bound)
        layers.append((wih, whh, b))
    return layers


if __name__ == "__main__":
    key = jax.random.PRNGKey(0)
    B, T = 2, 4                       # batch, timesteps
    P, C, Himg, Wimg = 2, 3, 8, 8     # image pair, channels, spatial (scaled down)
    S_imu = 5                         # imu sub-sequence length per frame
    FLOW_FEAT = 128                   # FlowNet feature dim (scaled-down 49152, lane-aligned)
    HIDDEN = 128                      # main LSTM hidden (scaled-down 1024, lane-aligned)
    LIN1 = 128                        # linear1 out (matches original 128)

    keys = jax.random.split(key, 12)
    img_feat_dim = P * C * Himg * Wimg

    params = {
        "w_flow": 0.05 * jax.random.normal(keys[0], (img_feat_dim, FLOW_FEAT),
                                           jnp.float32),
        "b_flow": 0.05 * jax.random.normal(keys[1], (FLOW_FEAT,), jnp.float32),
        "rnn_imu": init_lstm_params(keys[2], 6, 6, 2),
        "rnn": init_lstm_params(keys[3], FLOW_FEAT + 6, HIDDEN, 2),
    }
    b1 = 1.0 / math.sqrt(HIDDEN)
    params["w1"] = jax.random.uniform(keys[4], (HIDDEN, LIN1), jnp.float32, -b1, b1)
    params["b1"] = jax.random.uniform(keys[5], (LIN1,), jnp.float32, -b1, b1)
    b2 = 1.0 / math.sqrt(LIN1)
    params["w2"] = jax.random.uniform(keys[6], (LIN1, 6), jnp.float32, -b2, b2)
    params["b2"] = jax.random.uniform(keys[7], (6,), jnp.float32, -b2, b2)

    image = jax.random.normal(keys[8], (B, T, P, C, Himg, Wimg), jnp.float32)
    imu = 0.1 * jax.random.normal(keys[9], (B, T, S_imu, 6), jnp.float32)
    trans = 0.1 * jax.random.normal(keys[10], (B, 3), jnp.float32)
    quat = jax.random.normal(keys[11], (B, 4), jnp.float32)
    quat = quat / jnp.linalg.norm(quat, axis=1, keepdims=True)
    init_SE3 = jnp.concatenate([trans, quat], axis=1).reshape(B, 7, 1)

    fwd = jax.jit(vinet_forward)
    se3, last_composed = fwd(params, image, imu, init_SE3)
    jax.block_until_ready((se3, last_composed))
    assert se3.shape == (B, T, 6, 1)
    assert last_composed.shape == (B, 7, 1)
    assert bool(jnp.all(jnp.isfinite(se3))) and bool(jnp.all(jnp.isfinite(last_composed)))
    print("KERNEL_OK")
</pallas_src>

<mosaic_0001>
module attributes {stable_mosaic.version = 11 : i64} {
  func.func @_linear_kernel(%arg0: i32, %arg1: i32, %arg2: i32, %arg3: memref<8x384xf32, #tpu.memory_space<vmem>>, %arg4: memref<384x128xf32, #tpu.memory_space<vmem>>, %arg5: memref<1x128xf32, #tpu.memory_space<vmem>>, %arg6: memref<8x128xf32, #tpu.memory_space<vmem>>, %arg7: memref<8x128xf32, #tpu.memory_space<vmem>>) attributes {dimension_semantics = [#tpu.dimension_semantics<parallel>, #tpu.dimension_semantics<parallel>, #tpu.dimension_semantics<arbitrary>], iteration_bounds = array<i64: 1, 1, 1>, scalar_prefetch = 0 : i64, scratch_operands = 1 : i64, tpu.core_type = #tpu.core_type<tc>, window_params = [{transform_indices = @transform_0, window_bounds = array<i64: 8, 384>}, {transform_indices = @transform_1, window_bounds = array<i64: 384, 128>}, {transform_indices = @transform_2, window_bounds = array<i64: 1, 128>}, {transform_indices = @transform_3, window_bounds = array<i64: 8, 128>}]} {
    %c0_i32 = arith.constant 0 : i32
    %0 = arith.cmpi eq, %arg2, %c0_i32 : i32
    %1 = arith.extui %0 : i1 to i32
    %c0_i32_0 = arith.constant 0 : i32
    %2 = arith.cmpi ne, %1, %c0_i32_0 : i32
    scf.if %2 {
      %cst_10 = arith.constant 0.000000e+00 : f32
      %14 = vector.broadcast %cst_10 : f32 to vector<8x128xf32>
      %c0_11 = arith.constant 0 : index
      %c0_12 = arith.constant 0 : index
      %15 = vector.load %arg7[%c0_11, %c0_12] : memref<8x128xf32, #tpu.memory_space<vmem>>, vector<8x128xf32>
      tpu.vector_store %arg7[%c0_11, %c0_12], %14 {strides = array<i32>} : memref<8x128xf32, #tpu.memory_space<vmem>>, vector<8x128xf32>,
    } else {
    }
    %c0 = arith.constant 0 : index
    %c0_1 = arith.constant 0 : index
    %3 = vector.load %arg7[%c0, %c0_1] : memref<8x128xf32, #tpu.memory_space<vmem>>, vector<8x128xf32>
    %c0_2 = arith.constant 0 : index
    %c0_3 = arith.constant 0 : index
    %4 = vector.load %arg3[%c0_2, %c0_3] : memref<8x384xf32, #tpu.memory_space<vmem>>, vector<8x384xf32>
    %c0_4 = arith.constant 0 : index
    %c0_5 = arith.constant 0 : index
    %5 = vector.load %arg4[%c0_4, %c0_5] : memref<384x128xf32, #tpu.memory_space<vmem>>, vector<384x128xf32>
    %6 = arith.truncf %4 : vector<8x384xf32> to vector<8x384xbf16>
    %7 = arith.truncf %5 : vector<384x128xf32> to vector<384x128xbf16>
    %cst = arith.constant dense<0.000000e+00> : vector<8x128xf32>
    %8 = tpu.matmul %6, %7, %cst {dimension_numbers = #tpu.dot_dimension_numbers<[1], [0], [0], [1], [0, 0, 1, 1], [], []>} : vector<8x384xbf16>, vector<384x128xbf16>, vector<8x128xf32> -> vector<8x128xf32>
    %9 = arith.addf %3, %8 : vector<8x128xf32>
    %c0_6 = arith.constant 0 : index
    %c0_7 = arith.constant 0 : index
    %10 = vector.load %arg7[%c0_6, %c0_7] : memref<8x128xf32, #tpu.memory_space<vmem>>, vector<8x128xf32>
    tpu.vector_store %arg7[%c0_6, %c0_7], %9 {strides = array<i32>} : memref<8x128xf32, #tpu.memory_space<vmem>>, vector<8x128xf32>,
    %c0_i32_8 = arith.constant 0 : i32
    %11 = arith.cmpi eq, %arg2, %c0_i32_8 : i32
    %12 = arith.extui %11 : i1 to i32
    %c0_i32_9 = arith.constant 0 : i32
    %13 = arith.cmpi ne, %12, %c0_i32_9 : i32
    scf.if %13 {
      %c0_10 = arith.constant 0 : index
      %c0_11 = arith.constant 0 : index
      %14 = vector.load %arg7[%c0_10, %c0_11] : memref<8x128xf32, #tpu.memory_space<vmem>>, vector<8x128xf32>
      %c0_12 = arith.constant 0 : index
      %c0_13 = arith.constant 0 : index
      %15 = vector.load %arg5[%c0_12, %c0_13] : memref<1x128xf32, #tpu.memory_space<vmem>>, vector<1x128xf32>
      %16 = vector.broadcast %15 : vector<1x128xf32> to vector<8x128xf32>
      %17 = arith.addf %14, %16 : vector<8x128xf32>
      %c0_14 = arith.constant 0 : index
      %c0_15 = arith.constant 0 : index
      %18 = vector.load %arg6[%c0_14, %c0_15] : memref<8x128xf32, #tpu.memory_space<vmem>>, vector<8x128xf32>
      tpu.vector_store %arg6[%c0_14, %c0_15], %17 {strides = array<i32>} : memref<8x128xf32, #tpu.memory_space<vmem>>, vector<8x128xf32>,
    } else {
    }
    return
  }
  func.func @transform_0(%arg0: i32, %arg1: i32, %arg2: i32) -> (i32, i32) {
    %c0_i32 = arith.constant 0 : i32
    return %arg0, %arg2 : i32, i32
  }
  func.func @transform_1(%arg0: i32, %arg1: i32, %arg2: i32) -> (i32, i32) {
    %c0_i32 = arith.constant 0 : i32
    return %arg2, %arg1 : i32, i32
  }
  func.func @transform_2(%arg0: i32, %arg1: i32, %arg2: i32) -> (i32, i32) {
    %c0_i32 = arith.constant 0 : i32
    %c0_i32_0 = arith.constant 0 : i32
    return %c0_i32, %arg1 : i32, i32
  }
  func.func @transform_3(%arg0: i32, %arg1: i32, %arg2: i32) -> (i32, i32) {
    %c0_i32 = arith.constant 0 : i32
    return %arg0, %arg1 : i32, i32
  }
}

module attributes {stable_mosaic.version = 11 : i64} {
  func.func @_imu_lstm_kernel(%arg0: i32, %arg1: memref<5x8x6xf32, #tpu.memory_space<vmem>>, %arg2: memref<6x24xf32, #tpu.memory_space<vmem>>, %arg3: memref<6x24xf32, #tpu.memory_space<vmem>>, %arg4: memref<1x24xf32, #tpu.memory_space<vmem>>, %arg5: memref<6x24xf32, #tpu.memory_space<vmem>>, %arg6: memref<6x24xf32, #tpu.memory_space<vmem>>, %arg7: memref<1x24xf32, #tpu.memory_space<vmem>>, %arg8: memref<8x6xf32, #tpu.memory_space<vmem>>) attributes {dimension_semantics = [#tpu.dimension_semantics<arbitrary>], iteration_bounds = array<i64: 1>, scalar_prefetch = 0 : i64, scratch_operands = 0 : i64, tpu.core_type = #tpu.core_type<tc>, window_params = [{pipeline_mode = #tpu.pipeline_mode<synchronous>, transform_indices = @transform_0, window_bounds = array<i64: 5, 8, 6>}, {pipeline_mode = #tpu.pipeline_mode<synchronous>, transform_indices = @transform_1, window_bounds = array<i64: 6, 24>}, {pipeline_mode = #tpu.pipeline_mode<synchronous>, transform_indices = @transform_2, window_bounds = array<i64: 6, 24>}, {pipeline_mode = #tpu.pipeline_mode<synchronous>, transform_indices = @transform_3, window_bounds = array<i64: 1, 24>}, {pipeline_mode = #tpu.pipeline_mode<synchronous>, transform_indices = @transform_4, window_bounds = array<i64: 6, 24>}, {pipeline_mode = #tpu.pipeline_mode<synchronous>, transform_indices = @transform_5, window_bounds = array<i64: 6, 24>}, {pipeline_mode = #tpu.pipeline_mode<synchronous>, transform_indices = @transform_6, window_bounds = array<i64: 1, 24>}, {pipeline_mode = #tpu.pipeline_mode<synchronous>, transform_indices = @transform_7, window_bounds = array<i64: 8, 6>}]} {
    %cst = arith.constant 0.000000e+00 : f32
    %0 = vector.broadcast %cst : f32 to vector<8x6xf32>
    %cst_0 = arith.constant 0.000000e+00 : f32
    %1 = vector.broadcast %cst_0 : f32 to vector<8x6xf32>
    %cst_1 = arith.constant 0.000000e+00 : f32
    %2 = vector.broadcast %cst_1 : f32 to vector<8x6xf32>
    %cst_2 = arith.constant 0.000000e+00 : f32
    %3 = vector.broadcast %cst_2 : f32 to vector<8x6xf32>
    %c0 = arith.constant 0 : index
    %c0_3 = arith.constant 0 : index
    %c0_4 = arith.constant 0 : index
    %4 = vector.load %arg1[%c0, %c0_3, %c0_4] : memref<5x8x6xf32, #tpu.memory_space<vmem>>, vector<1x8x6xf32>
    %5 = vector.shape_cast %4 : vector<1x8x6xf32> to vector<8x6xf32>
    %c0_5 = arith.constant 0 : index
    %c0_6 = arith.constant 0 : index
    %6 = vector.load %arg2[%c0_5, %c0_6] : memref<6x24xf32, #tpu.memory_space<vmem>>, vector<6x24xf32>
    %7 = arith.truncf %5 : vector<8x6xf32> to vector<8x6xbf16>
    %8 = arith.truncf %6 : vector<6x24xf32> to vector<6x24xbf16>
    %cst_7 = arith.constant dense<0.000000e+00> : vector<8x24xf32>
    %9 = tpu.matmul %7, %8, %cst_7 {dimension_numbers = #tpu.dot_dimension_numbers<[1], [0], [0], [1], [0, 0, 1, 1], [], []>} : vector<8x6xbf16>, vector<6x24xbf16>, vector<8x24xf32> -> vector<8x24xf32>
    %c0_8 = arith.constant 0 : index
    %c0_9 = arith.constant 0 : index
    %10 = vector.load %arg4[%c0_8, %c0_9] : memref<1x24xf32, #tpu.memory_space<vmem>>, vector<1x24xf32>
    %11 = vector.broadcast %10 : vector<1x24xf32> to vector<8x24xf32>
    %12 = arith.addf %9, %11 : vector<8x24xf32>
    %c0_10 = arith.constant 0 : index
    %c0_11 = arith.constant 0 : index
    %13 = vector.load %arg3[%c0_10, %c0_11] : memref<6x24xf32, #tpu.memory_space<vmem>>, vector<6x24xf32>
    %14 = arith.truncf %0 : vector<8x6xf32> to vector<8x6xbf16>
    %15 = arith.truncf %13 : vector<6x24xf32> to vector<6x24xbf16>
    %cst_12 = arith.constant dense<0.000000e+00> : vector<8x24xf32>
    %16 = tpu.matmul %14, %15, %cst_12 {dimension_numbers = #tpu.dot_dimension_numbers<[1], [0], [0], [1], [0, 0, 1, 1], [], []>} : vector<8x6xbf16>, vector<6x24xbf16>, vector<8x24xf32> -> vector<8x24xf32>
    %17 = arith.addf %12, %16 : vector<8x24xf32>
    %18 = vector.extract_strided_slice %17 {offsets = [0, 0], sizes = [8, 6], strides = [1, 1]} : vector<8x24xf32> to vector<8x6xf32>
    %cst_13 = arith.constant 0.000000e+00 : f32
    %19 = vector.broadcast %cst_13 : f32 to vector<8x6xf32>
    %20 = arith.subf %19, %18 : vector<8x6xf32>
    %21 = math.exp %20 : vector<8x6xf32>
    %cst_14 = arith.constant 1.000000e+00 : f32
    %22 = vector.broadcast %cst_14 : f32 to vector<8x6xf32>
    %23 = arith.addf %22, %21 : vector<8x6xf32>
    %cst_15 = arith.constant 1.000000e+00 : f32
    %24 = vector.broadcast %cst_15 : f32 to vector<8x6xf32>
    %25 = arith.divf %24, %23 : vector<8x6xf32>
    %26 = vector.extract_strided_slice %17 {offsets = [0, 6], sizes = [8, 6], strides = [1, 1]} : vector<8x24xf32> to vector<8x6xf32>
    %cst_16 = arith.constant 0.000000e+00 : f32
    %27 = vector.broadcast %cst_16 : f32 to vector<8x6xf32>
    %28 = arith.subf %27, %26 : vector<8x6xf32>
    %29 = math.exp %28 : vector<8x6xf32>
    %cst_17 = arith.constant 1.000000e+00 : f32
    %30 = vector.broadcast %cst_17 : f32 to vector<8x6xf32>
    %31 = arith.addf %30, %29 : vector<8x6xf32>
    %cst_18 = arith.constant 1.000000e+00 : f32
    %32 = vector.broadcast %cst_18 : f32 to vector<8x6xf32>
    %33 = arith.divf %32, %31 : vector<8x6xf32>
    %34 = vector.extract_strided_slice %17 {offsets = [0, 12], sizes = [8, 6], strides = [1, 1]} : vector<8x24xf32> to vector<8x6xf32>
    %35 = math.tanh %34 : vector<8x6xf32>
    %36 = vector.extract_strided_slice %17 {offsets = [0, 18], sizes = [8, 6], strides = [1, 1]} : vector<8x24xf32> to vector<8x6xf32>
    %cst_19 = arith.constant 0.000000e+00 : f32
    %37 = vector.broadcast %cst_19 : f32 to vector<8x6xf32>
    %38 = arith.subf %37, %36 : vector<8x6xf32>
    %39 = math.exp %38 : vector<8x6xf32>
    %cst_20 = arith.constant 1.000000e+00 : f32
    %40 = vector.broadcast %cst_20 : f32 to vector<8x6xf32>
    %41 = arith.addf %40, %39 : vector<8x6xf32>
    %cst_21 = arith.constant 1.000000e+00 : f32
    %42 = vector.broadcast %cst_21 : f32 to vector<8x6xf32>
    %43 = arith.divf %42, %41 : vector<8x6xf32>
    %44 = arith.mulf %33, %1 : vector<8x6xf32>
    %45 = arith.mulf %25, %35 : vector<8x6xf32>
    %46 = arith.addf %44, %45 : vector<8x6xf32>
    %47 = math.tanh %46 : vector<8x6xf32>
    %48 = arith.mulf %43, %47 : vector<8x6xf32>
    %c0_22 = arith.constant 0 : index
    %c0_23 = arith.constant 0 : index
    %49 = vector.load %arg5[%c0_22, %c0_23] : memref<6x24xf32, #tpu.memory_space<vmem>>, vector<6x24xf32>
    %50 = arith.truncf %48 : vector<8x6xf32> to vector<8x6xbf16>
    %51 = arith.truncf %49 : vector<6x24xf32> to vector<6x24xbf16>
    %cst_24 = arith.constant dense<0.000000e+00> : vector<8x24xf32>
    %52 = tpu.matmul %50, %51, %cst_24 {dimension_numbers = #tpu.dot_dimension_numbers<[1], [0], [0], [1], [0, 0, 1, 1], [], []>} : vector<8x6xbf16>, vector<6x24xbf16>, vector<8x24xf32> -> vector<8x24xf32>
    %c0_25 = arith.constant 0 : index
    %c0_26 = arith.constant 0 : index
    %53 = vector.load %arg7[%c0_25, %c0_26] : memref<1x24xf32, #tpu.memory_space<vmem>>, vector<1x24xf32>
    %54 = vector.broadcast %53 : vector<1x24xf32> to vector<8x24xf32>
    %55 = arith.addf %52, %54 : vector<8x24xf32>
    %c0_27 = arith.constant 0 : index
    %c0_28 = arith.constant 0 : index
    %56 = vector.load %arg6[%c0_27, %c0_28] : memref<6x24xf32, #tpu.memory_space<vmem>>, vector<6x24xf32>
    %57 = arith.truncf %2 : vector<8x6xf32> to vector<8x6xbf16>
    %58 = arith.truncf %56 : vector<6x24xf32> to vector<6x24xbf16>
    %cst_29 = arith.constant dense<0.000000e+00> : vector<8x24xf32>
    %59 = tpu.matmul %57, %58, %cst_29 {dimension_numbers = #tpu.dot_dimension_numbers<[1], [0], [0], [1], [0, 0, 1, 1], [], []>} : vector<8x6xbf16>, vector<6x24xbf16>, vector<8x24xf32> -> vector<8x24xf32>
    %60 = arith.addf %55, %59 : vector<8x24xf32>
    %61 = vector.extract_strided_slice %60 {offsets = [0, 0], sizes = [8, 6], strides = [1, 1]} : vector<8x24xf32> to vector<8x6xf32>
    %cst_30 = arith.constant 0.000000e+00 : f32
    %62 = vector.broadcast %cst_30 : f32 to vector<8x6xf32>
    %63 = arith.subf %62, %61 : vector<8x6xf32>
    %64 = math.exp %63 : vector<8x6xf32>
    %cst_31 = arith.constant 1.000000e+00 : f32
    %65 = vector.broadcast %cst_31 : f32 to vector<8x6xf32>
    %66 = arith.addf %65, %64 : vector<8x6xf32>
    %cst_32 = arith.constant 1.000000e+00 : f32
    %67 = vector.broadcast %cst_32 : f32 to vector<8x6xf32>
    %68 = arith.divf %67, %66 : vector<8x6xf32>
    %69 = vector.extract_strided_slice %60 {offsets = [0, 6], sizes = [8, 6], strides = [1, 1]} : vector<8x24xf32> to vector<8x6xf32>
    %cst_33 = arith.constant 0.000000e+00 : f32
    %70 = vector.broadcast %cst_33 : f32 to vector<8x6xf32>
    %71 = arith.subf %70, %69 : vector<8x6xf32>
    %72 = math.exp %71 : vector<8x6xf32>
    %cst_34 = arith.constant 1.000000e+00 : f32
    %73 = vector.broadcast %cst_34 : f32 to vector<8x6xf32>
    %74 = arith.addf %73, %72 : vector<8x6xf32>
    %cst_35 = arith.constant 1.000000e+00 : f32
    %75 = vector.broadcast %cst_35 : f32 to vector<8x6xf32>
    %76 = arith.divf %75, %74 : vector<8x6xf32>
    %77 = vector.extract_strided_slice %60 {offsets = [0, 12], sizes = [8, 6], strides = [1, 1]} : vector<8x24xf32> to vector<8x6xf32>
    %78 = math.tanh %77 : vector<8x6xf32>
    %79 = vector.extract_strided_slice %60 {offsets = [0, 18], sizes = [8, 6], strides = [1, 1]} : vector<8x24xf32> to vector<8x6xf32>
    %cst_36 = arith.constant 0.000000e+00 : f32
    %80 = vector.broadcast %cst_36 : f32 to vector<8x6xf32>
    %81 = arith.subf %80, %79 : vector<8x6xf32>
    %82 = math.exp %81 : vector<8x6xf32>
    %cst_37 = arith.constant 1.000000e+00 : f32
    %83 = vector.broadcast %cst_37 : f32 to vector<8x6xf32>
    %84 = arith.addf %83, %82 : vector<8x6xf32>
    %cst_38 = arith.constant 1.000000e+00 : f32
    %85 = vector.broadcast %cst_38 : f32 to vector<8x6xf32>
    %86 = arith.divf %85, %84 : vector<8x6xf32>
    %87 = arith.mulf %76, %3 : vector<8x6xf32>
    %88 = arith.mulf %68, %78 : vector<8x6xf32>
    %89 = arith.addf %87, %88 : vector<8x6xf32>
    %90 = math.tanh %89 : vector<8x6xf32>
    %91 = arith.mulf %86, %90 : vector<8x6xf32>
    %c1 = arith.constant 1 : index
    %c0_39 = arith.constant 0 : index
    %c0_40 = arith.constant 0 : index
    %92 = vector.load %arg1[%c1, %c0_39, %c0_40] : memref<5x8x6xf32, #tpu.memory_space<vmem>>, vector<1x8x6xf32>
    %93 = vector.shape_cast %92 : vector<1x8x6xf32> to vector<8x6xf32>
    %c0_41 = arith.constant 0 : index
    %c0_42 = arith.constant 0 : index
    %94 = vector.load %arg2[%c0_41, %c0_42] : memref<6x24xf32, #tpu.memory_space<vmem>>, vector<6x24xf32>
    %95 = arith.truncf %93 : vector<8x6xf32> to vector<8x6xbf16>
    %96 = arith.truncf %94 : vector<6x24xf32> to vector<6x24xbf16>
    %cst_43 = arith.constant dense<0.000000e+00> : vector<8x24xf32>
    %97 = tpu.matmul %95, %96, %cst_43 {dimension_numbers = #tpu.dot_dimension_numbers<[1], [0], [0], [1], [0, 0, 1, 1], [], []>} : vector<8x6xbf16>, vector<6x24xbf16>, vector<8x24xf32> -> vector<8x24xf32>
    %c0_44 = arith.constant 0 : index
    %c0_45 = arith.constant 0 : index
    %98 = vector.load %arg4[%c0_44, %c0_45] : memref<1x24xf32, #tpu.memory_space<vmem>>, vector<1x24xf32>
    %99 = vector.broadcast %98 : vector<1x24xf32> to vector<8x24xf32>
    %100 = arith.addf %97, %99 : vector<8x24xf32>
    %c0_46 = arith.constant 0 : index
    %c0_47 = arith.constant 0 : index
    %101 = vector.load %arg3[%c0_46, %c0_47] : memref<6x24xf32, #tpu.memory_space<vmem>>, vector<6x24xf32>
    %102 = arith.truncf %48 : vector<8x6xf32> to vector<8x6xbf16>
    %103 = arith.truncf %101 : vector<6x24xf32> to vector<6x24xbf16>
    %cst_48 = arith.constant dense<0.000000e+00> : vector<8x24xf32>
    %104 = tpu.matmul %102, %103, %cst_48 {dimension_numbers = #tpu.dot_dimension_numbers<[1], [0], [0], [1], [0, 0, 1, 1], [], []>} : vector<8x6xbf16>, vector<6x24xbf16>, vector<8x24xf32> -> vector<8x24xf32>
    %105 = arith.addf %100, %104 : vector<8x24xf32>
    %106 = vector.extract_strided_slice %105 {offsets = [0, 0], sizes = [8, 6], strides = [1, 1]} : vector<8x24xf32> to vector<8x6xf32>
    %cst_49 = arith.constant 0.000000e+00 : f32
    %107 = vector.broadcast %cst_49 : f32 to vector<8x6xf32>
    %108 = arith.subf %107, %106 : vector<8x6xf32>
    %109 = math.exp %108 : vector<8x6xf32>
    %cst_50 = arith.constant 1.000000e+00 : f32
    %110 = vector.broadcast %cst_50 : f32 to vector<8x6xf32>
    %111 = arith.addf %110, %109 : vector<8x6xf32>
    %cst_51 = arith.constant 1.000000e+00 : f32
    %112 = vector.broadcast %cst_51 : f32 to vector<8x6xf32>
    %113 = arith.divf %112, %111 : vector<8x6xf32>
    %114 = vector.extract_strided_slice %105 {offsets = [0, 6], sizes = [8, 6], strides = [1, 1]} : vector<8x24xf32> to vector<8x6xf32>
    %cst_52 = arith.constant 0.000000e+00 : f32
    %115 = vector.broadcast %cst_52 : f32 to vector<8x6xf32>
    %116 = arith.subf %115, %114 : vector<8x6xf32>
    %117 = math.exp %116 : vector<8x6xf32>
    %cst_53 = arith.constant 1.000000e+00 : f32
    %118 = vector.broadcast %cst_53 : f32 to vector<8x6xf32>
    %119 = arith.addf %118, %117 : vector<8x6xf32>
    %cst_54 = arith.constant 1.000000e+00 : f32
    %120 = vector.broadcast %cst_54 : f32 to vector<8x6xf32>
    %121 = arith.divf %120, %119 : vector<8x6xf32>
    %122 = vector.extract_strided_slice %105 {offsets = [0, 12], sizes = [8, 6], strides = [1, 1]} : vector<8x24xf32> to vector<8x6xf32>
    %123 = math.tanh %122 : vector<8x6xf32>
    %124 = vector.extract_strided_slice %105 {offsets = [0, 18], sizes = [8, 6], strides = [1, 1]} : vector<8x24xf32> to vector<8x6xf32>
    %cst_55 = arith.constant 0.000000e+00 : f32
    %125 = vector.broadcast %cst_55 : f32 to vector<8x6xf32>
    %126 = arith.subf %125, %124 : vector<8x6xf32>
    %127 = math.exp %126 : vector<8x6xf32>
    %cst_56 = arith.constant 1.000000e+00 : f32
    %128 = vector.broadcast %cst_56 : f32 to vector<8x6xf32>
    %129 = arith.addf %128, %127 : vector<8x6xf32>
    %cst_57 = arith.constant 1.000000e+00 : f32
    %130 = vector.broadcast %cst_57 : f32 to vector<8x6xf32>
    %131 = arith.divf %130, %129 : vector<8x6xf32>
    %132 = arith.mulf %121, %46 : vector<8x6xf32>
    %133 = arith.mulf %113, %123 : vector<8x6xf32>
    %134 = arith.addf %132, %133 : vector<8x6xf32>
    %135 = math.tanh %134 : vector<8x6xf32>
    %136 = arith.mulf %131, %135 : vector<8x6xf32>
    %c0_58 = arith.constant 0 : index
    %c0_59 = arith.constant 0 : index
    %137 = vector.load %arg5[%c0_58, %c0_59] : memref<6x24xf32, #tpu.memory_space<vmem>>, vector<6x24xf32>
    %138 = arith.truncf %136 : vector<8x6xf32> to vector<8x6xbf16>
    %139 = arith.truncf %137 : vector<6x24xf32> to vector<6x24xbf16>
    %cst_60 = arith.constant dense<0.000000e+00> : vector<8x24xf32>
    %140 = tpu.matmul %138, %139, %cst_60 {dimension_numbers = #tpu.dot_dimension_numbers<[1], [0], [0], [1], [0, 0, 1, 1], [], []>} : vector<8x6xbf16>, vector<6x24xbf16>, vector<8x24xf32> -> vector<8x24xf32>
    %c0_61 = arith.constant 0 : index
    %c0_62 = arith.constant 0 : index
    %141 = vector.load %arg7[%c0_61, %c0_62] : memref<1x24xf32, #tpu.memory_space<vmem>>, vector<1x24xf32>
    %142 = vector.broadcast %141 : vector<1x24xf32> to vector<8x24xf32>
    %143 = arith.addf %140, %142 : vector<8x24xf32>
    %c0_63 = arith.constant 0 : index
    %c0_64 = arith.constant 0 : index
    %144 = vector.load %arg6[%c0_63, %c0_64] : memref<6x24xf32, #tpu.memory_space<vmem>>, vector<6x24xf32>
    %145 = arith.truncf %91 : vector<8x6xf32> to vector<8x6xbf16>
    %146 = arith.truncf %144 : vector<6x24xf32> to vector<6x24xbf16>
    %cst_65 = arith.constant dense<0.000000e+00> : vector<8x24xf32>
    %147 = tpu.matmul %145, %146, %cst_65 {dimension_numbers = #tpu.dot_dimension_numbers<[1], [0], [0], [1], [0, 0, 1, 1], [], []>} : vector<8x6xbf16>, vector<6x24xbf16>, vector<8x24xf32> -> vector<8x24xf32>
    %148 = arith.addf %143, %147 : vector<8x24xf32>
    %149 = vector.extract_strided_slice %148 {offsets = [0, 0], sizes = [8, 6], strides = [1, 1]} : vector<8x24xf32> to vector<8x6xf32>
    %cst_66 = arith.constant 0.000000e+00 : f32
    %150 = vector.broadcast %cst_66 : f32 to vector<8x6xf32>
    %151 = arith.subf %150, %149 : vector<8x6xf32>
    %152 = math.exp %151 : vector<8x6xf32>
    %cst_67 = arith.constant 1.000000e+00 : f32
    %153 = vector.broadcast %cst_67 : f32 to vector<8x6xf32>
    %154 = arith.addf %153, %152 : vector<8x6xf32>
    %cst_68 = arith.constant 1.000000e+00 : f32
    %155 = vector.broadcast %cst_68 : f32 to vector<8x6xf32>
    %156 = arith.divf %155, %154 : vector<8x6xf32>
    %157 = vector.extract_strided_slice %148 {offsets = [0, 6], sizes = [8, 6], strides = [1, 1]} : vector<8x24xf32> to vector<8x6xf32>
    %cst_69 = arith.constant 0.000000e+00 : f32
    %158 = vector.broadcast %cst_69 : f32 to vector<8x6xf32>
    %159 = arith.subf %158, %157 : vector<8x6xf32>
    %160 = math.exp %159 : vector<8x6xf32>
    %cst_70 = arith.constant 1.000000e+00 : f32
    %161 = vector.broadcast %cst_70 : f32 to vector<8x6xf32>
    %162 = arith.addf %161, %160 : vector<8x6xf32>
    %cst_71 = arith.constant 1.000000e+00 : f32
    %163 = vector.broadcast %cst_71 : f32 to vector<8x6xf32>
    %164 = arith.divf %163, %162 : vector<8x6xf32>
    %165 = vector.extract_strided_slice %148 {offsets = [0, 12], sizes = [8, 6], strides = [1, 1]} : vector<8x24xf32> to vector<8x6xf32>
    %166 = math.tanh %165 : vector<8x6xf32>
    %167 = vector.extract_strided_slice %148 {offsets = [0, 18], sizes = [8, 6], strides = [1, 1]} : vector<8x24xf32> to vector<8x6xf32>
    %cst_72 = arith.constant 0.000000e+00 : f32
    %168 = vector.broadcast %cst_72 : f32 to vector<8x6xf32>
    %169 = arith.subf %168, %167 : vector<8x6xf32>
    %170 = math.exp %169 : vector<8x6xf32>
    %cst_73 = arith.constant 1.000000e+00 : f32
    %171 = vector.broadcast %cst_73 : f32 to vector<8x6xf32>
    %172 = arith.addf %171, %170 : vector<8x6xf32>
    %cst_74 = arith.constant 1.000000e+00 : f32
    %173 = vector.broadcast %cst_74 : f32 to vector<8x6xf32>
    %174 = arith.divf %173, %172 : vector<8x6xf32>
    %175 = arith.mulf %164, %89 : vector<8x6xf32>
    %176 = arith.mulf %156, %166 : vector<8x6xf32>
    %177 = arith.addf %175, %176 : vector<8x6xf32>
    %178 = math.tanh %177 : vector<8x6xf32>
    %179 = arith.mulf %174, %178 : vector<8x6xf32>
    %c2 = arith.constant 2 : index
    %c0_75 = arith.constant 0 : index
    %c0_76 = arith.constant 0 : index
    %180 = vector.load %arg1[%c2, %c0_75, %c0_76] : memref<5x8x6xf32, #tpu.memory_space<vmem>>, vector<1x8x6xf32>
    %181 = vector.shape_cast %180 : vector<1x8x6xf32> to vector<8x6xf32>
    %c0_77 = arith.constant 0 : index
    %c0_78 = arith.constant 0 : index
    %182 = vector.load %arg2[%c0_77, %c0_78] : memref<6x24xf32, #tpu.memory_space<vmem>>, vector<6x24xf32>
    %183 = arith.truncf %181 : vector<8x6xf32> to vector<8x6xbf16>
    %184 = arith.truncf %182 : vector<6x24xf32> to vector<6x24xbf16>
    %cst_79 = arith.constant dense<0.000000e+00> : vector<8x24xf32>
    %185 = tpu.matmul %183, %184, %cst_79 {dimension_numbers = #tpu.dot_dimension_numbers<[1], [0], [0], [1], [0, 0, 1, 1], [], []>} : vector<8x6xbf16>, vector<6x24xbf16>, vector<8x24xf32> -> vector<8x24xf32>
    %c0_80 = arith.constant 0 : index
    %c0_81 = arith.constant 0 : index
    %186 = vector.load %arg4[%c0_80, %c0_81] : memref<1x24xf32, #tpu.memory_space<vmem>>, vector<1x24xf32>
    %187 = vector.broadcast %186 : vector<1x24xf32> to vector<8x24xf32>
    %188 = arith.addf %185, %187 : vector<8x24xf32>
    %c0_82 = arith.constant 0 : index
    %c0_83 = arith.constant 0 : index
    %189 = vector.load %arg3[%c0_82, %c0_83] : memref<6x24xf32, #tpu.memory_space<vmem>>, vector<6x24xf32>
    %190 = arith.truncf %136 : vector<8x6xf32> to vector<8x6xbf16>
    %191 = arith.truncf %189 : vector<6x24xf32> to vector<6x24xbf16>
    %cst_84 = arith.constant dense<0.000000e+00> : vector<8x24xf32>
    %192 = tpu.matmul %190, %191, %cst_84 {dimension_numbers = #tpu.dot_dimension_numbers<[1], [0], [0], [1], [0, 0, 1, 1], [], []>} : vector<8x6xbf16>, vector<6x24xbf16>, vector<8x24xf32> -> vector<8x24xf32>
    %193 = arith.addf %188, %192 : vector<8x24xf32>
    %194 = vector.extract_strided_slice %193 {offsets = [0, 0], sizes = [8, 6], strides = [1, 1]} : vector<8x24xf32> to vector<8x6xf32>
    %cst_85 = arith.constant 0.000000e+00 : f32
    %195 = vector.broadcast %cst_85 : f32 to vector<8x6xf32>
    %196 = arith.subf %195, %194 : vector<8x6xf32>
    %197 = math.exp %196 : vector<8x6xf32>
    %cst_86 = arith.constant 1.000000e+00 : f32
    %198 = vector.broadcast %cst_86 : f32 to vector<8x6xf32>
    %199 = arith.addf %198, %197 : vector<8x6xf32>
    %cst_87 = arith.constant 1.000000e+00 : f32
    %200 = vector.broadcast %cst_87 : f32 to vector<8x6xf32>
    %201 = arith.divf %200, %199 : vector<8x6xf32>
    %202 = vector.extract_strided_slice %193 {offsets = [0, 6], sizes = [8, 6], strides = [1, 1]} : vector<8x24xf32> to vector<8x6xf32>
    %cst_88 = arith.constant 0.000000e+00 : f32
    %203 = vector.broadcast %cst_88 : f32 to vector<8x6xf32>
    %204 = arith.subf %203, %202 : vector<8x6xf32>
    %205 = math.exp %204 : vector<8x6xf32>
    %cst_89 = arith.constant 1.000000e+00 : f32
    %206 = vector.broadcast %cst_89 : f32 to vector<8x6xf32>
    %207 = arith.addf %206, %205 : vector<8x6xf32>
    %cst_90 = arith.constant 1.000000e+00 : f32
    %208 = vector.broadcast %cst_90 : f32 to vector<8x6xf32>
    %209 = arith.divf %208, %207 : vector<8x6xf32>
    %210 = vector.extract_strided_slice %193 {offsets = [0, 12], sizes = [8, 6], strides = [1, 1]} : vector<8x24xf32> to vector<8x6xf32>
    %211 = math.tanh %210 : vector<8x6xf32>
    %212 = vector.extract_strided_slice %193 {offsets = [0, 18], sizes = [8, 6], strides = [1, 1]} : vector<8x24xf32> to vector<8x6xf32>
    %cst_91 = arith.constant 0.000000e+00 : f32
    %213 = vector.broadcast %cst_91 : f32 to vector<8x6xf32>
    %214 = arith.subf %213, %212 : vector<8x6xf32>
    %215 = math.exp %214 : vector<8x6xf32>
    %cst_92 = arith.constant 1.000000e+00 : f32
    %216 = vector.broadcast %cst_92 : f32 to vector<8x6xf32>
    %217 = arith.addf %216, %215 : vector<8x6xf32>
    %cst_93 = arith.constant 1.000000e+00 : f32
    %218 = vector.broadcast %cst_93 : f32 to vector<8x6xf32>
    %219 = arith.divf %218, %217 : vector<8x6xf32>
    %220 = arith.mulf %209, %134 : vector<8x6xf32>
    %221 = arith.mulf %201, %211 : vector<8x6xf32>
    %222 = arith.addf %220, %221 : vector<8x6xf32>
    %223 = math.tanh %222 : vector<8x6xf32>
    %224 = arith.mulf %219, %223 : vector<8x6xf32>
    %c0_94 = arith.constant 0 : index
    %c0_95 = arith.constant 0 : index
    %225 = vector.load %arg5[%c0_94, %c0_95] : memref<6x24xf32, #tpu.memory_space<vmem>>, vector<6x24xf32>
    %226 = arith.truncf %224 : vector<8x6xf32> to vector<8x6xbf16>
    %227 = arith.truncf %225 : vector<6x24xf32> to vector<6x24xbf16>
    %cst_96 = arith.constant dense<0.000000e+00> : vector<8x24xf32>
    %228 = tpu.matmul %226, %227, %cst_96 {dimension_numbers = #tpu.dot_dimension_numbers<[1], [0], [0], [1], [0, 0, 1, 1], [], []>} : vector<8x6xbf16>, vector<6x24xbf16>, vector<8x24xf32> -> vector<8x24xf32>
    %c0_97 = arith.constant 0 : index
    %c0_98 = arith.constant 0 : index
    %229 = vector.load %arg7[%c0_97, %c0_98] : memref<1x24xf32, #tpu.memory_space<vmem>>, vector<1x24xf32>
    %230 = vector.broadcast %229 : vector<1x24xf32> to vector<8x24xf32>
    %231 = arith.addf %228, %230 : vector<8x24xf32>
    %c0_99 = arith.constant 0 : index
    %c0_100 = arith.constant 0 : index
    %232 = vector.load %arg6[%c0_99, %c0_100] : memref<6x24xf32, #tpu.memory_space<vmem>>, vector<6x24xf32>
    %233 = arith.truncf %179 : vector<8x6xf32> to vector<8x6xbf16>
    %234 = arith.truncf %232 : vector<6x24xf32> to vector<6x24xbf16>
    %cst_101 = arith.constant dense<0.000000e+00> : vector<8x24xf32>
    %235 = tpu.matmul %233, %234, %cst_101 {dimension_numbers = #tpu.dot_dimension_numbers<[1], [0], [0], [1], [0, 0, 1, 1], [], []>} : vector<8x6xbf16>, vector<6x24xbf16>, vector<8x24xf32> -> vector<8x24xf32>
    %236 = arith.addf %231, %235 : vector<8x24xf32>
    %237 = vector.extract_strided_slice %236 {offsets = [0, 0], sizes = [8, 6], strides = [1, 1]} : vector<8x24xf32> to vector<8x6xf32>
    %cst_102 = arith.constant 0.000000e+00 : f32
    %238 = vector.broadcast %cst_102 : f32 to vector<8x6xf32>
    %239 = arith.subf %238, %237 : vector<8x6xf32>
    %240 = math.exp %239 : vector<8x6xf32>
    %cst_103 = arith.constant 1.000000e+00 : f32
    %241 = vector.broadcast %cst_103 : f32 to vector<8x6xf32>
    %242 = arith.addf %241, %240 : vector<8x6xf32>
    %cst_104 = arith.constant 1.000000e+00 : f32
    %243 = vector.broadcast %cst_104 : f32 to vector<8x6xf32>
    %244 = arith.divf %243, %242 : vector<8x6xf32>
    %245 = vector.extract_strided_slice %236 {offsets = [0, 6], sizes = [8, 6], strides = [1, 1]} : vector<8x24xf32> to vector<8x6xf32>
    %cst_105 = arith.constant 0.000000e+00 : f32
    %246 = vector.broadcast %cst_105 : f32 to vector<8x6xf32>
    %247 = arith.subf %246, %245 : vector<8x6xf32>
    %248 = math.exp %247 : vector<8x6xf32>
    %cst_106 = arith.constant 1.000000e+00 : f32
    %249 = vector.broadcast %cst_106 : f32 to vector<8x6xf32>
    %250 = arith.addf %249, %248 : vector<8x6xf32>
    %cst_107 = arith.constant 1.000000e+00 : f32
    %251 = vector.broadcast %cst_107 : f32 to vector<8x6xf32>
    %252 = arith.divf %251, %250 : vector<8x6xf32>
    %253 = vector.extract_strided_slice %236 {offsets = [0, 12], sizes = [8, 6], strides = [1, 1]} : vector<8x24xf32> to vector<8x6xf32>
    %254 = math.tanh %253 : vector<8x6xf32>
    %255 = vector.extract_strided_slice %236 {offsets = [0, 18], sizes = [8, 6], strides = [1, 1]} : vector<8x24xf32> to vector<8x6xf32>
    %cst_108 = arith.constant 0.000000e+00 : f32
    %256 = vector.broadcast %cst_108 : f32 to vector<8x6xf32>
    %257 = arith.subf %256, %255 : vector<8x6xf32>
    %258 = math.exp %257 : vector<8x6xf32>
    %cst_109 = arith.constant 1.000000e+00 : f32
    %259 = vector.broadcast %cst_109 : f32 to vector<8x6xf32>
    %260 = arith.addf %259, %258 : vector<8x6xf32>
    %cst_110 = arith.constant 1.000000e+00 : f32
    %261 = vector.broadcast %cst_110 : f32 to vector<8x6xf32>
    %262 = arith.divf %261, %260 : vector<8x6xf32>
    %263 = arith.mulf %252, %177 : vector<8x6xf32>
    %264 = arith.mulf %244, %254 : vector<8x6xf32>
    %265 = arith.addf %263, %264 : vector<8x6xf32>
    %266 = math.tanh %265 : vector<8x6xf32>
    %267 = arith.mulf %262, %266 : vector<8x6xf32>
    %c3 = arith.constant 3 : index
    %c0_111 = arith.constant 0 : index
    %c0_112 = arith.constant 0 : index
    %268 = vector.load %arg1[%c3, %c0_111, %c0_112] : memref<5x8x6xf32, #tpu.memory_space<vmem>>, vector<1x8x6xf32>
    %269 = vector.shape_cast %268 : vector<1x8x6xf32> to vector<8x6xf32>
    %c0_113 = arith.constant 0 : index
    %c0_114 = arith.constant 0 : index
    %270 = vector.load %arg2[%c0_113, %c0_114] : memref<6x24xf32, #tpu.memory_space<vmem>>, vector<6x24xf32>
    %271 = arith.truncf %269 : vector<8x6xf32> to vector<8x6xbf16>
    %272 = arith.truncf %270 : vector<6x24xf32> to vector<6x24xbf16>
    %cst_115 = arith.constant dense<0.000000e+00> : vector<8x24xf32>
    %273 = tpu.matmul %271, %272, %cst_115 {dimension_numbers = #tpu.dot_dimension_numbers<[1], [0], [0], [1], [0, 0, 1, 1], [], []>} : vector<8x6xbf16>, vector<6x24xbf16>, vector<8x24xf32> -> vector<8x24xf32>
    %c0_116 = arith.constant 0 : index
    %c0_117 = arith.constant 0 : index
    %274 = vector.load %arg4[%c0_116, %c0_117] : memref<1x24xf32, #tpu.memory_space<vmem>>, vector<1x24xf32>
    %275 = vector.broadcast %274 : vector<1x24xf32> to vector<8x24xf32>
    %276 = arith.addf %273, %275 : vector<8x24xf32>
    %c0_118 = arith.constant 0 : index
    %c0_119 = arith.constant 0 : index
    %277 = vector.load %arg3[%c0_118, %c0_119] : memref<6x24xf32, #tpu.memory_space<vmem>>, vector<6x24xf32>
    %278 = arith.truncf %224 : vector<8x6xf32> to vector<8x6xbf16>
    %279 = arith.truncf %277 : vector<6x24xf32> to vector<6x24xbf16>
    %cst_120 = arith.constant dense<0.000000e+00> : vector<8x24xf32>
    %280 = tpu.matmul %278, %279, %cst_120 {dimension_numbers = #tpu.dot_dimension_numbers<[1], [0], [0], [1], [0, 0, 1, 1], [], []>} : vector<8x6xbf16>, vector<6x24xbf16>, vector<8x24xf32> -> vector<8x24xf32>
    %281 = arith.addf %276, %280 : vector<8x24xf32>
    %282 = vector.extract_strided_slice %281 {offsets = [0, 0], sizes = [8, 6], strides = [1, 1]} : vector<8x24xf32> to vector<8x6xf32>
    %cst_121 = arith.constant 0.000000e+00 : f32
    %283 = vector.broadcast %cst_121 : f32 to vector<8x6xf32>
    %284 = arith.subf %283, %282 : vector<8x6xf32>
    %285 = math.exp %284 : vector<8x6xf32>
    %cst_122 = arith.constant 1.000000e+00 : f32
    %286 = vector.broadcast %cst_122 : f32 to vector<8x6xf32>
    %287 = arith.addf %286, %285 : vector<8x6xf32>
    %cst_123 = arith.constant 1.000000e+00 : f32
    %288 = vector.broadcast %cst_123 : f32 to vector<8x6xf32>
    %289 = arith.divf %288, %287 : vector<8x6xf32>
    %290 = vector.extract_strided_slice %281 {offsets = [0, 6], sizes = [8, 6], strides = [1, 1]} : vector<8x24xf32> to vector<8x6xf32>
    %cst_124 = arith.constant 0.000000e+00 : f32
    %291 = vector.broadcast %cst_124 : f32 to vector<8x6xf32>
    %292 = arith.subf %291, %290 : vector<8x6xf32>
    %293 = math.exp %292 : vector<8x6xf32>
    %cst_125 = arith.constant 1.000000e+00 : f32
    %294 = vector.broadcast %cst_125 : f32 to vector<8x6xf32>
    %295 = arith.addf %294, %293 : vector<8x6xf32>
    %cst_126 = arith.constant 1.000000e+00 : f32
    %296 = vector.broadcast %cst_126 : f32 to vector<8x6xf32>
    %297 = arith.divf %296, %295 : vector<8x6xf32>
    %298 = vector.extract_strided_slice %281 {offsets = [0, 12], sizes = [8, 6], strides = [1, 1]} : vector<8x24xf32> to vector<8x6xf32>
    %299 = math.tanh %298 : vector<8x6xf32>
    %300 = vector.extract_strided_slice %281 {offsets = [0, 18], sizes = [8, 6], strides = [1, 1]} : vector<8x24xf32> to vector<8x6xf32>
    %cst_127 = arith.constant 0.000000e+00 : f32
    %301 = vector.broadcast %cst_127 : f32 to vector<8x6xf32>
    %302 = arith.subf %301, %300 : vector<8x6xf32>
    %303 = math.exp %302 : vector<8x6xf32>
    %cst_128 = arith.constant 1.000000e+00 : f32
    %304 = vector.broadcast %cst_128 : f32 to vector<8x6xf32>
    %305 = arith.addf %304, %303 : vector<8x6xf32>
    %cst_129 = arith.constant 1.000000e+00 : f32
    %306 = vector.broadcast %cst_129 : f32 to vector<8x6xf32>
    %307 = arith.divf %306, %305 : vector<8x6xf32>
    %308 = arith.mulf %297, %222 : vector<8x6xf32>
    %309 = arith.mulf %289, %299 : vector<8x6xf32>
    %310 = arith.addf %308, %309 : vector<8x6xf32>
    %311 = math.tanh %310 : vector<8x6xf32>
    %312 = arith.mulf %307, %311 : vector<8x6xf32>
    %c0_130 = arith.constant 0 : index
    %c0_131 = arith.constant 0 : index
    %313 = vector.load %arg5[%c0_130, %c0_131] : memref<6x24xf32, #tpu.memory_space<vmem>>, vector<6x24xf32>
    %314 = arith.truncf %312 : vector<8x6xf32> to vector<8x6xbf16>
    %315 = arith.truncf %313 : vector<6x24xf32> to vector<6x24xbf16>
    %cst_132 = arith.constant dense<0.000000e+00> : vector<8x24xf32>
    %316 = tpu.matmul %314, %315, %cst_132 {dimension_numbers = #tpu.dot_dimension_numbers<[1], [0], [0], [1], [0, 0, 1, 1], [], []>} : vector<8x6xbf16>, vector<6x24xbf16>, vector<8x24xf32> -> vector<8x24xf32>
    %c0_133 = arith.constant 0 : index
    %c0_134 = arith.constant 0 : index
    %317 = vector.load %arg7[%c0_133, %c0_134] : memref<1x24xf32, #tpu.memory_space<vmem>>, vector<1x24xf32>
    %318 = vector.broadcast %317 : vector<1x24xf32> to vector<8x24xf32>
    %319 = arith.addf %316, %318 : vector<8x24xf32>
    %c0_135 = arith.constant 0 : index
    %c0_136 = arith.constant 0 : index
    %320 = vector.load %arg6[%c0_135, %c0_136] : memref<6x24xf32, #tpu.memory_space<vmem>>, vector<6x24xf32>
    %321 = arith.truncf %267 : vector<8x6xf32> to vector<8x6xbf16>
    %322 = arith.truncf %320 : vector<6x24xf32> to vector<6x24xbf16>
    %cst_137 = arith.constant dense<0.000000e+00> : vector<8x24xf32>
    %323 = tpu.matmul %321, %322, %cst_137 {dimension_numbers = #tpu.dot_dimension_numbers<[1], [0], [0], [1], [0, 0, 1, 1], [], []>} : vector<8x6xbf16>, vector<6x24xbf16>, vector<8x24xf32> -> vector<8x24xf32>
    %324 = arith.addf %319, %323 : vector<8x24xf32>
    %325 = vector.extract_strided_slice %324 {offsets = [0, 0], sizes = [8, 6], strides = [1, 1]} : vector<8x24xf32> to vector<8x6xf32>
    %cst_138 = arith.constant 0.000000e+00 : f32
    %326 = vector.broadcast %cst_138 : f32 to vector<8x6xf32>
    %327 = arith.subf %326, %325 : vector<8x6xf32>
    %328 = math.exp %327 : vector<8x6xf32>
    %cst_139 = arith.constant 1.000000e+00 : f32
    %329 = vector.broadcast %cst_139 : f32 to vector<8x6xf32>
    %330 = arith.addf %329, %328 : vector<8x6xf32>
    %cst_140 = arith.constant 1.000000e+00 : f32
    %331 = vector.broadcast %cst_140 : f32 to vector<8x6xf32>
    %332 = arith.divf %331, %330 : vector<8x6xf32>
    %333 = vector.extract_strided_slice %324 {offsets = [0, 6], sizes = [8, 6], strides = [1, 1]} : vector<8x24xf32> to vector<8x6xf32>
    %cst_141 = arith.constant 0.000000e+00 : f32
    %334 = vector.broadcast %cst_141 : f32 to vector<8x6xf32>
    %335 = arith.subf %334, %333 : vector<8x6xf32>
    %336 = math.exp %335 : vector<8x6xf32>
    %cst_142 = arith.constant 1.000000e+00 : f32
    %337 = vector.broadcast %cst_142 : f32 to vector<8x6xf32>
    %338 = arith.addf %337, %336 : vector<8x6xf32>
    %cst_143 = arith.constant 1.000000e+00 : f32
    %339 = vector.broadcast %cst_143 : f32 to vector<8x6xf32>
    %340 = arith.divf %339, %338 : vector<8x6xf32>
    %341 = vector.extract_strided_slice %324 {offsets = [0, 12], sizes = [8, 6], strides = [1, 1]} : vector<8x24xf32> to vector<8x6xf32>
    %342 = math.tanh %341 : vector<8x6xf32>
    %343 = vector.extract_strided_slice %324 {offsets = [0, 18], sizes = [8, 6], strides = [1, 1]} : vector<8x24xf32> to vector<8x6xf32>
    %cst_144 = arith.constant 0.000000e+00 : f32
    %344 = vector.broadcast %cst_144 : f32 to vector<8x6xf32>
    %345 = arith.subf %344, %343 : vector<8x6xf32>
    %346 = math.exp %345 : vector<8x6xf32>
    %cst_145 = arith.constant 1.000000e+00 : f32
    %347 = vector.broadcast %cst_145 : f32 to vector<8x6xf32>
    %348 = arith.addf %347, %346 : vector<8x6xf32>
    %cst_146 = arith.constant 1.000000e+00 : f32
    %349 = vector.broadcast %cst_146 : f32 to vector<8x6xf32>
    %350 = arith.divf %349, %348 : vector<8x6xf32>
    %351 = arith.mulf %340, %265 : vector<8x6xf32>
    %352 = arith.mulf %332, %342 : vector<8x6xf32>
    %353 = arith.addf %351, %352 : vector<8x6xf32>
    %354 = math.tanh %353 : vector<8x6xf32>
    %355 = arith.mulf %350, %354 : vector<8x6xf32>
    %c4 = arith.constant 4 : index
    %c0_147 = arith.constant 0 : index
    %c0_148 = arith.constant 0 : index
    %356 = vector.load %arg1[%c4, %c0_147, %c0_148] : memref<5x8x6xf32, #tpu.memory_space<vmem>>, vector<1x8x6xf32>
    %357 = vector.shape_cast %356 : vector<1x8x6xf32> to vector<8x6xf32>
    %c0_149 = arith.constant 0 : index
    %c0_150 = arith.constant 0 : index
    %358 = vector.load %arg2[%c0_149, %c0_150] : memref<6x24xf32, #tpu.memory_space<vmem>>, vector<6x24xf32>
    %359 = arith.truncf %357 : vector<8x6xf32> to vector<8x6xbf16>
    %360 = arith.truncf %358 : vector<6x24xf32> to vector<6x24xbf16>
    %cst_151 = arith.constant dense<0.000000e+00> : vector<8x24xf32>
    %361 = tpu.matmul %359, %360, %cst_151 {dimension_numbers = #tpu.dot_dimension_numbers<[1], [0], [0], [1], [0, 0, 1, 1], [], []>} : vector<8x6xbf16>, vector<6x24xbf16>, vector<8x24xf32> -> vector<8x24xf32>
    %c0_152 = arith.constant 0 : index
    %c0_153 = arith.constant 0 : index
    %362 = vector.load %arg4[%c0_152, %c0_153] : memref<1x24xf32, #tpu.memory_space<vmem>>, vector<1x24xf32>
    %363 = vector.broadcast %362 : vector<1x24xf32> to vector<8x24xf32>
    %364 = arith.addf %361, %363 : vector<8x24xf32>
    %c0_154 = arith.constant 0 : index
    %c0_155 = arith.constant 0 : index
    %365 = vector.load %arg3[%c0_154, %c0_155] : memref<6x24xf32, #tpu.memory_space<vmem>>, vector<6x24xf32>
    %366 = arith.truncf %312 : vector<8x6xf32> to vector<8x6xbf16>
    %367 = arith.truncf %365 : vector<6x24xf32> to vector<6x24xbf16>
    %cst_156 = arith.constant dense<0.000000e+00> : vector<8x24xf32>
    %368 = tpu.matmul %366, %367, %cst_156 {dimension_numbers = #tpu.dot_dimension_numbers<[1], [0], [0], [1], [0, 0, 1, 1], [], []>} : vector<8x6xbf16>, vector<6x24xbf16>, vector<8x24xf32> -> vector<8x24xf32>
    %369 = arith.addf %364, %368 : vector<8x24xf32>
    %370 = vector.extract_strided_slice %369 {offsets = [0, 0], sizes = [8, 6], strides = [1, 1]} : vector<8x24xf32> to vector<8x6xf32>
    %cst_157 = arith.constant 0.000000e+00 : f32
    %371 = vector.broadcast %cst_157 : f32 to vector<8x6xf32>
    %372 = arith.subf %371, %370 : vector<8x6xf32>
    %373 = math.exp %372 : vector<8x6xf32>
    %cst_158 = arith.constant 1.000000e+00 : f32
    %374 = vector.broadcast %cst_158 : f32 to vector<8x6xf32>
    %375 = arith.addf %374, %373 : vector<8x6xf32>
    %cst_159 = arith.constant 1.000000e+00 : f32
    %376 = vector.broadcast %cst_159 : f32 to vector<8x6xf32>
    %377 = arith.divf %376, %375 : vector<8x6xf32>
    %378 = vector.extract_strided_slice %369 {offsets = [0, 6], sizes = [8, 6], strides = [1, 1]} : vector<8x24xf32> to vector<8x6xf32>
    %cst_160 = arith.constant 0.000000e+00 : f32
    %379 = vector.broadcast %cst_160 : f32 to vector<8x6xf32>
    %380 = arith.subf %379, %378 : vector<8x6xf32>
    %381 = math.exp %380 : vector<8x6xf32>
    %cst_161 = arith.constant 1.000000e+00 : f32
    %382 = vector.broadcast %cst_161 : f32 to vector<8x6xf32>
    %383 = arith.addf %382, %381 : vector<8x6xf32>
    %cst_162 = arith.constant 1.000000e+00 : f32
    %384 = vector.broadcast %cst_162 : f32 to vector<8x6xf32>
    %385 = arith.divf %384, %383 : vector<8x6xf32>
    %386 = vector.extract_strided_slice %369 {offsets = [0, 12], sizes = [8, 6], strides = [1, 1]} : vector<8x24xf32> to vector<8x6xf32>
    %387 = math.tanh %386 : vector<8x6xf32>
    %388 = vector.extract_strided_slice %369 {offsets = [0, 18], sizes = [8, 6], strides = [1, 1]} : vector<8x24xf32> to vector<8x6xf32>
    %cst_163 = arith.constant 0.000000e+00 : f32
    %389 = vector.broadcast %cst_163 : f32 to vector<8x6xf32>
    %390 = arith.subf %389, %388 : vector<8x6xf32>
    %391 = math.exp %390 : vector<8x6xf32>
    %cst_164 = arith.constant 1.000000e+00 : f32
    %392 = vector.broadcast %cst_164 : f32 to vector<8x6xf32>
    %393 = arith.addf %392, %391 : vector<8x6xf32>
    %cst_165 = arith.constant 1.000000e+00 : f32
    %394 = vector.broadcast %cst_165 : f32 to vector<8x6xf32>
    %395 = arith.divf %394, %393 : vector<8x6xf32>
    %396 = arith.mulf %385, %310 : vector<8x6xf32>
    %397 = arith.mulf %377, %387 : vector<8x6xf32>
    %398 = arith.addf %396, %397 : vector<8x6xf32>
    %399 = math.tanh %398 : vector<8x6xf32>
    %400 = arith.mulf %395, %399 : vector<8x6xf32>
    %c0_166 = arith.constant 0 : index
    %c0_167 = arith.constant 0 : index
    %401 = vector.load %arg5[%c0_166, %c0_167] : memref<6x24xf32, #tpu.memory_space<vmem>>, vector<6x24xf32>
    %402 = arith.truncf %400 : vector<8x6xf32> to vector<8x6xbf16>
    %403 = arith.truncf %401 : vector<6x24xf32> to vector<6x24xbf16>
    %cst_168 = arith.constant dense<0.000000e+00> : vector<8x24xf32>
    %404 = tpu.matmul %402, %403, %cst_168 {dimension_numbers = #tpu.dot_dimension_numbers<[1], [0], [0], [1], [0, 0, 1, 1], [], []>} : vector<8x6xbf16>, vector<6x24xbf16>, vector<8x24xf32> -> vector<8x24xf32>
    %c0_169 = arith.constant 0 : index
    %c0_170 = arith.constant 0 : index
    %405 = vector.load %arg7[%c0_169, %c0_170] : memref<1x24xf32, #tpu.memory_space<vmem>>, vector<1x24xf32>
    %406 = vector.broadcast %405 : vector<1x24xf32> to vector<8x24xf32>
    %407 = arith.addf %404, %406 : vector<8x24xf32>
    %c0_171 = arith.constant 0 : index
    %c0_172 = arith.constant 0 : index
    %408 = vector.load %arg6[%c0_171, %c0_172] : memref<6x24xf32, #tpu.memory_space<vmem>>, vector<6x24xf32>
    %409 = arith.truncf %355 : vector<8x6xf32> to vector<8x6xbf16>
    %410 = arith.truncf %408 : vector<6x24xf32> to vector<6x24xbf16>
    %cst_173 = arith.constant dense<0.000000e+00> : vector<8x24xf32>
    %411 = tpu.matmul %409, %410, %cst_173 {dimension_numbers = #tpu.dot_dimension_numbers<[1], [0], [0], [1], [0, 0, 1, 1], [], []>} : vector<8x6xbf16>, vector<6x24xbf16>, vector<8x24xf32> -> vector<8x24xf32>
    %412 = arith.addf %407, %411 : vector<8x24xf32>
    %413 = vector.extract_strided_slice %412 {offsets = [0, 0], sizes = [8, 6], strides = [1, 1]} : vector<8x24xf32> to vector<8x6xf32>
    %cst_174 = arith.constant 0.000000e+00 : f32
    %414 = vector.broadcast %cst_174 : f32 to vector<8x6xf32>
    %415 = arith.subf %414, %413 : vector<8x6xf32>
    %416 = math.exp %415 : vector<8x6xf32>
    %cst_175 = arith.constant 1.000000e+00 : f32
    %417 = vector.broadcast %cst_175 : f32 to vector<8x6xf32>
    %418 = arith.addf %417, %416 : vector<8x6xf32>
    %cst_176 = arith.constant 1.000000e+00 : f32
    %419 = vector.broadcast %cst_176 : f32 to vector<8x6xf32>
    %420 = arith.divf %419, %418 : vector<8x6xf32>
    %421 = vector.extract_strided_slice %412 {offsets = [0, 6], sizes = [8, 6], strides = [1, 1]} : vector<8x24xf32> to vector<8x6xf32>
    %cst_177 = arith.constant 0.000000e+00 : f32
    %422 = vector.broadcast %cst_177 : f32 to vector<8x6xf32>
    %423 = arith.subf %422, %421 : vector<8x6xf32>
    %424 = math.exp %423 : vector<8x6xf32>
    %cst_178 = arith.constant 1.000000e+00 : f32
    %425 = vector.broadcast %cst_178 : f32 to vector<8x6xf32>
    %426 = arith.addf %425, %424 : vector<8x6xf32>
    %cst_179 = arith.constant 1.000000e+00 : f32
    %427 = vector.broadcast %cst_179 : f32 to vector<8x6xf32>
    %428 = arith.divf %427, %426 : vector<8x6xf32>
    %429 = vector.extract_strided_slice %412 {offsets = [0, 12], sizes = [8, 6], strides = [1, 1]} : vector<8x24xf32> to vector<8x6xf32>
    %430 = math.tanh %429 : vector<8x6xf32>
    %431 = vector.extract_strided_slice %412 {offsets = [0, 18], sizes = [8, 6], strides = [1, 1]} : vector<8x24xf32> to vector<8x6xf32>
    %cst_180 = arith.constant 0.000000e+00 : f32
    %432 = vector.broadcast %cst_180 : f32 to vector<8x6xf32>
    %433 = arith.subf %432, %431 : vector<8x6xf32>
    %434 = math.exp %433 : vector<8x6xf32>
    %cst_181 = arith.constant 1.000000e+00 : f32
    %435 = vector.broadcast %cst_181 : f32 to vector<8x6xf32>
    %436 = arith.addf %435, %434 : vector<8x6xf32>
    %cst_182 = arith.constant 1.000000e+00 : f32
    %437 = vector.broadcast %cst_182 : f32 to vector<8x6xf32>
    %438 = arith.divf %437, %436 : vector<8x6xf32>
    %439 = arith.mulf %428, %353 : vector<8x6xf32>
    %440 = arith.mulf %420, %430 : vector<8x6xf32>
    %441 = arith.addf %439, %440 : vector<8x6xf32>
    %442 = math.tanh %441 : vector<8x6xf32>
    %443 = arith.mulf %438, %442 : vector<8x6xf32>
    %c0_183 = arith.constant 0 : index
    %c0_184 = arith.constant 0 : index
    %444 = vector.load %arg8[%c0_183, %c0_184] : memref<8x6xf32, #tpu.memory_space<vmem>>, vector<8x6xf32>
    tpu.vector_store %arg8[%c0_183, %c0_184], %443 {strides = array<i32>} : memref<8x6xf32, #tpu.memory_space<vmem>>, vector<8x6xf32>,
    return
  }
  func.func @transform_0(%arg0: i32) -> (i32, i32, i32) {
    %c0_i32 = arith.constant 0 : i32
    %c0_i32_0 = arith.constant 0 : i32
    %c0_i32_1 = arith.constant 0 : i32
    %c0_i32_2 = arith.constant 0 : i32
    return %c0_i32, %c0_i32_0, %c0_i32_1 : i32, i32, i32
  }
  func.func @transform_1(%arg0: i32) -> (i32, i32) {
    %c0_i32 = arith.constant 0 : i32
    %c0_i32_0 = arith.constant 0 : i32
    %c0_i32_1 = arith.constant 0 : i32
    return %c0_i32, %c0_i32_0 : i32, i32
  }
  func.func @transform_2(%arg0: i32) -> (i32, i32) {
    %c0_i32 = arith.constant 0 : i32
    %c0_i32_0 = arith.constant 0 : i32
    %c0_i32_1 = arith.constant 0 : i32
    return %c0_i32, %c0_i32_0 : i32, i32
  }
  func.func @transform_3(%arg0: i32) -> (i32, i32) {
    %c0_i32 = arith.constant 0 : i32
    %c0_i32_0 = arith.constant 0 : i32
    %c0_i32_1 = arith.constant 0 : i32
    return %c0_i32, %c0_i32_0 : i32, i32
  }
  func.func @transform_4(%arg0: i32) -> (i32, i32) {
    %c0_i32 = arith.constant 0 : i32
    %c0_i32_0 = arith.constant 0 : i32
    %c0_i32_1 = arith.constant 0 : i32
    return %c0_i32, %c0_i32_0 : i32, i32
  }
  func.func @transform_5(%arg0: i32) -> (i32, i32) {
    %c0_i32 = arith.constant 0 : i32
    %c0_i32_0 = arith.constant 0 : i32
    %c0_i32_1 = arith.constant 0 : i32
    return %c0_i32, %c0_i32_0 : i32, i32
  }
  func.func @transform_6(%arg0: i32) -> (i32, i32) {
    %c0_i32 = arith.constant 0 : i32
    %c0_i32_0 = arith.constant 0 : i32
    %c0_i32_1 = arith.constant 0 : i32
    return %c0_i32, %c0_i32_0 : i32, i32
  }
  func.func @transform_7(%arg0: i32) -> (i32, i32) {
    %c0_i32 = arith.constant 0 : i32
    %c0_i32_0 = arith.constant 0 : i32
    %c0_i32_1 = arith.constant 0 : i32
    return %c0_i32, %c0_i32_0 : i32, i32
  }
}

module attributes {stable_mosaic.version = 11 : i64} {
  func.func @_linear_kernel(%arg0: i32, %arg1: i32, %arg2: i32, %arg3: memref<8x134xf32, #tpu.memory_space<vmem>>, %arg4: memref<134x256xf32, #tpu.memory_space<vmem>>, %arg5: memref<1x256xf32, #tpu.memory_space<vmem>>, %arg6: memref<8x256xf32, #tpu.memory_space<vmem>>, %arg7: memref<8x256xf32, #tpu.memory_space<vmem>>) attributes {dimension_semantics = [#tpu.dimension_semantics<parallel>, #tpu.dimension_semantics<parallel>, #tpu.dimension_semantics<arbitrary>], iteration_bounds = array<i64: 1, 2, 1>, scalar_prefetch = 0 : i64, scratch_operands = 1 : i64, tpu.core_type = #tpu.core_type<tc>, window_params = [{transform_indices = @transform_0, window_bounds = array<i64: 8, 134>}, {transform_indices = @transform_1, window_bounds = array<i64: 134, 256>}, {transform_indices = @transform_2, window_bounds = array<i64: 1, 256>}, {transform_indices = @transform_3, window_bounds = array<i64: 8, 256>}]} {
    %c0_i32 = arith.constant 0 : i32
    %0 = arith.cmpi eq, %arg2, %c0_i32 : i32
    %1 = arith.extui %0 : i1 to i32
    %c0_i32_0 = arith.constant 0 : i32
    %2 = arith.cmpi ne, %1, %c0_i32_0 : i32
    scf.if %2 {
      %cst_10 = arith.constant 0.000000e+00 : f32
      %14 = vector.broadcast %cst_10 : f32 to vector<8x256xf32>
      %c0_11 = arith.constant 0 : index
      %c0_12 = arith.constant 0 : index
      %15 = vector.load %arg7[%c0_11, %c0_12] : memref<8x256xf32, #tpu.memory_space<vmem>>, vector<8x256xf32>
      tpu.vector_store %arg7[%c0_11, %c0_12], %14 {strides = array<i32>} : memref<8x256xf32, #tpu.memory_space<vmem>>, vector<8x256xf32>,
    } else {
    }
    %c0 = arith.constant 0 : index
    %c0_1 = arith.constant 0 : index
    %3 = vector.load %arg7[%c0, %c0_1] : memref<8x256xf32, #tpu.memory_space<vmem>>, vector<8x256xf32>
    %c0_2 = arith.constant 0 : index
    %c0_3 = arith.constant 0 : index
    %4 = vector.load %arg3[%c0_2, %c0_3] : memref<8x134xf32, #tpu.memory_space<vmem>>, vector<8x134xf32>
    %c0_4 = arith.constant 0 : index
    %c0_5 = arith.constant 0 : index
    %5 = vector.load %arg4[%c0_4, %c0_5] : memref<134x256xf32, #tpu.memory_space<vmem>>, vector<134x256xf32>
    %6 = arith.truncf %4 : vector<8x134xf32> to vector<8x134xbf16>
    %7 = arith.truncf %5 : vector<134x256xf32> to vector<134x256xbf16>
    %cst = arith.constant dense<0.000000e+00> : vector<8x256xf32>
    %8 = tpu.matmul %6, %7, %cst {dimension_numbers = #tpu.dot_dimension_numbers<[1], [0], [0], [1], [0, 0, 1, 1], [], []>} : vector<8x134xbf16>, vector<134x256xbf16>, vector<8x256xf32> -> vector<8x256xf32>
    %9 = arith.addf %3, %8 : vector<8x256xf32>
    %c0_6 = arith.constant 0 : index
    %c0_7 = arith.constant 0 : index
    %10 = vector.load %arg7[%c0_6, %c0_7] : memref<8x256xf32, #tpu.memory_space<vmem>>, vector<8x256xf32>
    tpu.vector_store %arg7[%c0_6, %c0_7], %9 {strides = array<i32>} : memref<8x256xf32, #tpu.memory_space<vmem>>, vector<8x256xf32>,
    %c0_i32_8 = arith.constant 0 : i32
    %11 = arith.cmpi eq, %arg2, %c0_i32_8 : i32
    %12 = arith.extui %11 : i1 to i32
    %c0_i32_9 = arith.constant 0 : i32
    %13 = arith.cmpi ne, %12, %c0_i32_9 : i32
    scf.if %13 {
      %c0_10 = arith.constant 0 : index
      %c0_11 = arith.constant 0 : index
      %14 = vector.load %arg7[%c0_10, %c0_11] : memref<8x256xf32, #tpu.memory_space<vmem>>, vector<8x256xf32>
      %c0_12 = arith.constant 0 : index
      %c0_13 = arith.constant 0 : index
      %15 = vector.load %arg5[%c0_12, %c0_13] : memref<1x256xf32, #tpu.memory_space<vmem>>, vector<1x256xf32>
      %16 = vector.broadcast %15 : vector<1x256xf32> to vector<8x256xf32>
      %17 = arith.addf %14, %16 : vector<8x256xf32>
      %c0_14 = arith.constant 0 : index
      %c0_15 = arith.constant 0 : index
      %18 = vector.load %arg6[%c0_14, %c0_15] : memref<8x256xf32, #tpu.memory_space<vmem>>, vector<8x256xf32>
      tpu.vector_store %arg6[%c0_14, %c0_15], %17 {strides = array<i32>} : memref<8x256xf32, #tpu.memory_space<vmem>>, vector<8x256xf32>,
    } else {
    }
    return
  }
  func.func @transform_0(%arg0: i32, %arg1: i32, %arg2: i32) -> (i32, i32) {
    %c0_i32 = arith.constant 0 : i32
    return %arg0, %arg2 : i32, i32
  }
  func.func @transform_1(%arg0: i32, %arg1: i32, %arg2: i32) -> (i32, i32) {
    %c0_i32 = arith.constant 0 : i32
    return %arg2, %arg1 : i32, i32
  }
  func.func @transform_2(%arg0: i32, %arg1: i32, %arg2: i32) -> (i32, i32) {
    %c0_i32 = arith.constant 0 : i32
    %c0_i32_0 = arith.constant 0 : i32
    return %c0_i32, %arg1 : i32, i32
  }
  func.func @transform_3(%arg0: i32, %arg1: i32, %arg2: i32) -> (i32, i32) {
    %c0_i32 = arith.constant 0 : i32
    return %arg0, %arg1 : i32, i32
  }
}

module attributes {stable_mosaic.version = 11 : i64} {
  func.func @_lstm2_recurrent_kernel(%arg0: i32, %arg1: memref<1x2x512xf32, #tpu.memory_space<vmem>>, %arg2: memref<128x512xbf16, #tpu.memory_space<vmem>>, %arg3: memref<128x512xbf16, #tpu.memory_space<vmem>>, %arg4: memref<128x512xbf16, #tpu.memory_space<vmem>>, %arg5: memref<1x512xf32, #tpu.memory_space<vmem>>, %arg6: memref<1x2x128xf32, #tpu.memory_space<vmem>>, %arg7: memref<2x128xf32, #tpu.memory_space<vmem>>, %arg8: memref<2x128xf32, #tpu.memory_space<vmem>>, %arg9: memref<2x128xf32, #tpu.memory_space<vmem>>, %arg10: memref<2x128xf32, #tpu.memory_space<vmem>>) attributes {dimension_semantics = [#tpu.dimension_semantics<arbitrary>], iteration_bounds = array<i64: 4>, scalar_prefetch = 0 : i64, scratch_operands = 4 : i64, tpu.core_type = #tpu.core_type<tc>, window_params = [{transform_indices = @transform_0, window_bounds = array<i64: 1, 2, 512>}, {pipeline_mode = #tpu.pipeline_mode<synchronous>, transform_indices = @transform_1, window_bounds = array<i64: 128, 512>}, {pipeline_mode = #tpu.pipeline_mode<synchronous>, transform_indices = @transform_2, window_bounds = array<i64: 128, 512>}, {pipeline_mode = #tpu.pipeline_mode<synchronous>, transform_indices = @transform_3, window_bounds = array<i64: 128, 512>}, {pipeline_mode = #tpu.pipeline_mode<synchronous>, transform_indices = @transform_4, window_bounds = array<i64: 1, 512>}, {transform_indices = @transform_5, window_bounds = array<i64: 1, 2, 128>}]} {
    %c0_i32 = arith.constant 0 : i32
    %0 = arith.cmpi eq, %arg0, %c0_i32 : i32
    %1 = arith.extui %0 : i1 to i32
    %c0_i32_0 = arith.constant 0 : i32
    %2 = arith.cmpi ne, %1, %c0_i32_0 : i32
    scf.if %2 {
      %cst_50 = arith.constant 0.000000e+00 : f32
      %91 = vector.broadcast %cst_50 : f32 to vector<2x128xf32>
      %c0_51 = arith.constant 0 : index
      %c0_52 = arith.constant 0 : index
      %92 = vector.load %arg7[%c0_51, %c0_52] : memref<2x128xf32, #tpu.memory_space<vmem>>, vector<2x128xf32>
      tpu.vector_store %arg7[%c0_51, %c0_52], %91 {strides = array<i32>} : memref<2x128xf32, #tpu.memory_space<vmem>>, vector<2x128xf32>,
      %cst_53 = arith.constant 0.000000e+00 : f32
      %93 = vector.broadcast %cst_53 : f32 to vector<2x128xf32>
      %c0_54 = arith.constant 0 : index
      %c0_55 = arith.constant 0 : index
      %94 = vector.load %arg8[%c0_54, %c0_55] : memref<2x128xf32, #tpu.memory_space<vmem>>, vector<2x128xf32>
      tpu.vector_store %arg8[%c0_54, %c0_55], %93 {strides = array<i32>} : memref<2x128xf32, #tpu.memory_space<vmem>>, vector<2x128xf32>,
      %cst_56 = arith.constant 0.000000e+00 : f32
      %95 = vector.broadcast %cst_56 : f32 to vector<2x128xf32>
      %c0_57 = arith.constant 0 : index
      %c0_58 = arith.constant 0 : index
      %96 = vector.load %arg9[%c0_57, %c0_58] : memref<2x128xf32, #tpu.memory_space<vmem>>, vector<2x128xf32>
      tpu.vector_store %arg9[%c0_57, %c0_58], %95 {strides = array<i32>} : memref<2x128xf32, #tpu.memory_space<vmem>>, vector<2x128xf32>,
      %cst_59 = arith.constant 0.000000e+00 : f32
      %97 = vector.broadcast %cst_59 : f32 to vector<2x128xf32>
      %c0_60 = arith.constant 0 : index
      %c0_61 = arith.constant 0 : index
      %98 = vector.load %arg10[%c0_60, %c0_61] : memref<2x128xf32, #tpu.memory_space<vmem>>, vector<2x128xf32>
      tpu.vector_store %arg10[%c0_60, %c0_61], %97 {strides = array<i32>} : memref<2x128xf32, #tpu.memory_space<vmem>>, vector<2x128xf32>,
    } else {
    }
    %c0 = arith.constant 0 : index
    %c0_1 = arith.constant 0 : index
    %c0_2 = arith.constant 0 : index
    %3 = vector.load %arg1[%c0, %c0_1, %c0_2] : memref<1x2x512xf32, #tpu.memory_space<vmem>>, vector<1x2x512xf32>
    %4 = vector.shape_cast %3 : vector<1x2x512xf32> to vector<2x512xf32>
    %c0_3 = arith.constant 0 : index
    %c0_4 = arith.constant 0 : index
    %5 = vector.load %arg7[%c0_3, %c0_4] : memref<2x128xf32, #tpu.memory_space<vmem>>, vector<2x128xf32>
    %c0_5 = arith.constant 0 : index
    %c0_6 = arith.constant 0 : index
    %6 = vector.load %arg2[%c0_5, %c0_6] : memref<128x512xbf16, #tpu.memory_space<vmem>>, vector<128x512xbf16>
    %7 = arith.truncf %5 : vector<2x128xf32> to vector<2x128xbf16>
    %cst = arith.constant dense<0.000000e+00> : vector<2x512xf32>
    %8 = tpu.matmul %7, %6, %cst {dimension_numbers = #tpu.dot_dimension_numbers<[1], [0], [0], [1], [0, 0, 1, 1], [], []>} : vector<2x128xbf16>, vector<128x512xbf16>, vector<2x512xf32> -> vector<2x512xf32>
    %9 = arith.addf %4, %8 : vector<2x512xf32>
    %c0_7 = arith.constant 0 : index
    %c0_8 = arith.constant 0 : index
    %10 = vector.load %arg8[%c0_7, %c0_8] : memref<2x128xf32, #tpu.memory_space<vmem>>, vector<2x128xf32>
    %11 = vector.extract_strided_slice %9 {offsets = [0, 0], sizes = [2, 128], strides = [1, 1]} : vector<2x512xf32> to vector<2x128xf32>
    %cst_9 = arith.constant 0.000000e+00 : f32
    %12 = vector.broadcast %cst_9 : f32 to vector<2x128xf32>
    %13 = arith.subf %12, %11 : vector<2x128xf32>
    %14 = math.exp %13 : vector<2x128xf32>
    %cst_10 = arith.constant 1.000000e+00 : f32
    %15 = vector.broadcast %cst_10 : f32 to vector<2x128xf32>
    %16 = arith.addf %15, %14 : vector<2x128xf32>
    %cst_11 = arith.constant 1.000000e+00 : f32
    %17 = vector.broadcast %cst_11 : f32 to vector<2x128xf32>
    %18 = arith.divf %17, %16 : vector<2x128xf32>
    %19 = vector.extract_strided_slice %9 {offsets = [0, 128], sizes = [2, 128], strides = [1, 1]} : vector<2x512xf32> to vector<2x128xf32>
    %cst_12 = arith.constant 0.000000e+00 : f32
    %20 = vector.broadcast %cst_12 : f32 to vector<2x128xf32>
    %21 = arith.subf %20, %19 : vector<2x128xf32>
    %22 = math.exp %21 : vector<2x128xf32>
    %cst_13 = arith.constant 1.000000e+00 : f32
    %23 = vector.broadcast %cst_13 : f32 to vector<2x128xf32>
    %24 = arith.addf %23, %22 : vector<2x128xf32>
    %cst_14 = arith.constant 1.000000e+00 : f32
    %25 = vector.broadcast %cst_14 : f32 to vector<2x128xf32>
    %26 = arith.divf %25, %24 : vector<2x128xf32>
    %27 = vector.extract_strided_slice %9 {offsets = [0, 256], sizes = [2, 128], strides = [1, 1]} : vector<2x512xf32> to vector<2x128xf32>
    %28 = math.tanh %27 : vector<2x128xf32>
    %29 = vector.extract_strided_slice %9 {offsets = [0, 384], sizes = [2, 128], strides = [1, 1]} : vector<2x512xf32> to vector<2x128xf32>
    %cst_15 = arith.constant 0.000000e+00 : f32
    %30 = vector.broadcast %cst_15 : f32 to vector<2x128xf32>
    %31 = arith.subf %30, %29 : vector<2x128xf32>
    %32 = math.exp %31 : vector<2x128xf32>
    %cst_16 = arith.constant 1.000000e+00 : f32
    %33 = vector.broadcast %cst_16 : f32 to vector<2x128xf32>
    %34 = arith.addf %33, %32 : vector<2x128xf32>
    %cst_17 = arith.constant 1.000000e+00 : f32
    %35 = vector.broadcast %cst_17 : f32 to vector<2x128xf32>
    %36 = arith.divf %35, %34 : vector<2x128xf32>
    %37 = arith.mulf %26, %10 : vector<2x128xf32>
    %38 = arith.mulf %18, %28 : vector<2x128xf32>
    %39 = arith.addf %37, %38 : vector<2x128xf32>
    %40 = math.tanh %39 : vector<2x128xf32>
    %41 = arith.mulf %36, %40 : vector<2x128xf32>
    %c0_18 = arith.constant 0 : index
    %c0_19 = arith.constant 0 : index
    %42 = vector.load %arg7[%c0_18, %c0_19] : memref<2x128xf32, #tpu.memory_space<vmem>>, vector<2x128xf32>
    tpu.vector_store %arg7[%c0_18, %c0_19], %41 {strides = array<i32>} : memref<2x128xf32, #tpu.memory_space<vmem>>, vector<2x128xf32>,
    %c0_20 = arith.constant 0 : index
    %c0_21 = arith.constant 0 : index
    %43 = vector.load %arg8[%c0_20, %c0_21] : memref<2x128xf32, #tpu.memory_space<vmem>>, vector<2x128xf32>
    tpu.vector_store %arg8[%c0_20, %c0_21], %39 {strides = array<i32>} : memref<2x128xf32, #tpu.memory_space<vmem>>, vector<2x128xf32>,
    %c0_22 = arith.constant 0 : index
    %c0_23 = arith.constant 0 : index
    %44 = vector.load %arg3[%c0_22, %c0_23] : memref<128x512xbf16, #tpu.memory_space<vmem>>, vector<128x512xbf16>
    %45 = arith.truncf %41 : vector<2x128xf32> to vector<2x128xbf16>
    %cst_24 = arith.constant dense<0.000000e+00> : vector<2x512xf32>
    %46 = tpu.matmul %45, %44, %cst_24 {dimension_numbers = #tpu.dot_dimension_numbers<[1], [0], [0], [1], [0, 0, 1, 1], [], []>} : vector<2x128xbf16>, vector<128x512xbf16>, vector<2x512xf32> -> vector<2x512xf32>
    %c0_25 = arith.constant 0 : index
    %c0_26 = arith.constant 0 : index
    %47 = vector.load %arg5[%c0_25, %c0_26] : memref<1x512xf32, #tpu.memory_space<vmem>>, vector<1x512xf32>
    %48 = vector.broadcast %47 : vector<1x512xf32> to vector<2x512xf32>
    %49 = arith.addf %46, %48 : vector<2x512xf32>
    %c0_27 = arith.constant 0 : index
    %c0_28 = arith.constant 0 : index
    %50 = vector.load %arg9[%c0_27, %c0_28] : memref<2x128xf32, #tpu.memory_space<vmem>>, vector<2x128xf32>
    %c0_29 = arith.constant 0 : index
    %c0_30 = arith.constant 0 : index
    %51 = vector.load %arg4[%c0_29, %c0_30] : memref<128x512xbf16, #tpu.memory_space<vmem>>, vector<128x512xbf16>
    %52 = arith.truncf %50 : vector<2x128xf32> to vector<2x128xbf16>
    %cst_31 = arith.constant dense<0.000000e+00> : vector<2x512xf32>
    %53 = tpu.matmul %52, %51, %cst_31 {dimension_numbers = #tpu.dot_dimension_numbers<[1], [0], [0], [1], [0, 0, 1, 1], [], []>} : vector<2x128xbf16>, vector<128x512xbf16>, vector<2x512xf32> -> vector<2x512xf32>
    %54 = arith.addf %49, %53 : vector<2x512xf32>
    %c0_32 = arith.constant 0 : index
    %c0_33 = arith.constant 0 : index
    %55 = vector.load %arg10[%c0_32, %c0_33] : memref<2x128xf32, #tpu.memory_space<vmem>>, vector<2x128xf32>
    %56 = vector.extract_strided_slice %54 {offsets = [0, 0], sizes = [2, 128], strides = [1, 1]} : vector<2x512xf32> to vector<2x128xf32>
    %cst_34 = arith.constant 0.000000e+00 : f32
    %57 = vector.broadcast %cst_34 : f32 to vector<2x128xf32>
    %58 = arith.subf %57, %56 : vector<2x128xf32>
    %59 = math.exp %58 : vector<2x128xf32>
    %cst_35 = arith.constant 1.000000e+00 : f32
    %60 = vector.broadcast %cst_35 : f32 to vector<2x128xf32>
    %61 = arith.addf %60, %59 : vector<2x128xf32>
    %cst_36 = arith.constant 1.000000e+00 : f32
    %62 = vector.broadcast %cst_36 : f32 to vector<2x128xf32>
    %63 = arith.divf %62, %61 : vector<2x128xf32>
    %64 = vector.extract_strided_slice %54 {offsets = [0, 128], sizes = [2, 128], strides = [1, 1]} : vector<2x512xf32> to vector<2x128xf32>
    %cst_37 = arith.constant 0.000000e+00 : f32
    %65 = vector.broadcast %cst_37 : f32 to vector<2x128xf32>
    %66 = arith.subf %65, %64 : vector<2x128xf32>
    %67 = math.exp %66 : vector<2x128xf32>
    %cst_38 = arith.constant 1.000000e+00 : f32
    %68 = vector.broadcast %cst_38 : f32 to vector<2x128xf32>
    %69 = arith.addf %68, %67 : vector<2x128xf32>
    %cst_39 = arith.constant 1.000000e+00 : f32
    %70 = vector.broadcast %cst_39 : f32 to vector<2x128xf32>
    %71 = arith.divf %70, %69 : vector<2x128xf32>
    %72 = vector.extract_strided_slice %54 {offsets = [0, 256], sizes = [2, 128], strides = [1, 1]} : vector<2x512xf32> to vector<2x128xf32>
    %73 = math.tanh %72 : vector<2x128xf32>
    %74 = vector.extract_strided_slice %54 {offsets = [0, 384], sizes = [2, 128], strides = [1, 1]} : vector<2x512xf32> to vector<2x128xf32>
    %cst_40 = arith.constant 0.000000e+00 : f32
    %75 = vector.broadcast %cst_40 : f32 to vector<2x128xf32>
    %76 = arith.subf %75, %74 : vector<2x128xf32>
    %77 = math.exp %76 : vector<2x128xf32>
    %cst_41 = arith.constant 1.000000e+00 : f32
    %78 = vector.broadcast %cst_41 : f32 to vector<2x128xf32>
    %79 = arith.addf %78, %77 : vector<2x128xf32>
    %cst_42 = arith.constant 1.000000e+00 : f32
    %80 = vector.broadcast %cst_42 : f32 to vector<2x128xf32>
    %81 = arith.divf %80, %79 : vector<2x128xf32>
    %82 = arith.mulf %71, %55 : vector<2x128xf32>
    %83 = arith.mulf %63, %73 : vector<2x128xf32>
    %84 = arith.addf %82, %83 : vector<2x128xf32>
    %85 = math.tanh %84 : vector<2x128xf32>
    %86 = arith.mulf %81, %85 : vector<2x128xf32>
    %c0_43 = arith.constant 0 : index
    %c0_44 = arith.constant 0 : index
    %87 = vector.load %arg9[%c0_43, %c0_44] : memref<2x128xf32, #tpu.memory_space<vmem>>, vector<2x128xf32>
    tpu.vector_store %arg9[%c0_43, %c0_44], %86 {strides = array<i32>} : memref<2x128xf32, #tpu.memory_space<vmem>>, vector<2x128xf32>,
    %c0_45 = arith.constant 0 : index
    %c0_46 = arith.constant 0 : index
    %88 = vector.load %arg10[%c0_45, %c0_46] : memref<2x128xf32, #tpu.memory_space<vmem>>, vector<2x128xf32>
    tpu.vector_store %arg10[%c0_45, %c0_46], %84 {strides = array<i32>} : memref<2x128xf32, #tpu.memory_space<vmem>>, vector<2x128xf32>,
    %89 = vector.shape_cast %86 : vector<2x128xf32> to vector<1x2x128xf32>
    %c0_47 = arith.constant 0 : index
    %c0_48 = arith.constant 0 : index
    %c0_49 = arith.constant 0 : index
    %90 = vector.load %arg6[%c0_47, %c0_48, %c0_49] : memref<1x2x128xf32, #tpu.memory_space<vmem>>, vector<1x2x128xf32>
    tpu.vector_store %arg6[%c0_47, %c0_48, %c0_49], %89 {strides = array<i32>} : memref<1x2x128xf32, #tpu.memory_space<vmem>>, vector<1x2x128xf32>,
    return
  }
  func.func @transform_0(%arg0: i32) -> (i32, i32, i32) {
    %c0_i32 = arith.constant 0 : i32
    %c0_i32_0 = arith.constant 0 : i32
    %c0_i32_1 = arith.constant 0 : i32
    return %arg0, %c0_i32, %c0_i32_0 : i32, i32, i32
  }
  func.func @transform_1(%arg0: i32) -> (i32, i32) {
    %c0_i32 = arith.constant 0 : i32
    %c0_i32_0 = arith.constant 0 : i32
    %c0_i32_1 = arith.constant 0 : i32
    return %c0_i32, %c0_i32_0 : i32, i32
  }
  func.func @transform_2(%arg0: i32) -> (i32, i32) {
    %c0_i32 = arith.constant 0 : i32
    %c0_i32_0 = arith.constant 0 : i32
    %c0_i32_1 = arith.constant 0 : i32
    return %c0_i32, %c0_i32_0 : i32, i32
  }
  func.func @transform_3(%arg0: i32) -> (i32, i32) {
    %c0_i32 = arith.constant 0 : i32
    %c0_i32_0 = arith.constant 0 : i32
    %c0_i32_1 = arith.constant 0 : i32
    return %c0_i32, %c0_i32_0 : i32, i32
  }
  func.func @transform_4(%arg0: i32) -> (i32, i32) {
    %c0_i32 = arith.constant 0 : i32
    %c0_i32_0 = arith.constant 0 : i32
    %c0_i32_1 = arith.constant 0 : i32
    return %c0_i32, %c0_i32_0 : i32, i32
  }
  func.func @transform_5(%arg0: i32) -> (i32, i32, i32) {
    %c0_i32 = arith.constant 0 : i32
    %c0_i32_0 = arith.constant 0 : i32
    %c0_i32_1 = arith.constant 0 : i32
    return %arg0, %c0_i32, %c0_i32_0 : i32, i32, i32
  }
}

module attributes {stable_mosaic.version = 11 : i64} {
  func.func @_head_kernel(%arg0: i32, %arg1: memref<8x128xf32, #tpu.memory_space<vmem>>, %arg2: memref<128x128xf32, #tpu.memory_space<vmem>>, %arg3: memref<1x128xf32, #tpu.memory_space<vmem>>, %arg4: memref<128x6xf32, #tpu.memory_space<vmem>>, %arg5: memref<1x6xf32, #tpu.memory_space<vmem>>, %arg6: memref<8x6xf32, #tpu.memory_space<vmem>>) attributes {dimension_semantics = [#tpu.dimension_semantics<arbitrary>], iteration_bounds = array<i64: 1>, scalar_prefetch = 0 : i64, scratch_operands = 0 : i64, tpu.core_type = #tpu.core_type<tc>, window_params = [{pipeline_mode = #tpu.pipeline_mode<synchronous>, transform_indices = @transform_0, window_bounds = array<i64: 8, 128>}, {pipeline_mode = #tpu.pipeline_mode<synchronous>, transform_indices = @transform_1, window_bounds = array<i64: 128, 128>}, {pipeline_mode = #tpu.pipeline_mode<synchronous>, transform_indices = @transform_2, window_bounds = array<i64: 1, 128>}, {pipeline_mode = #tpu.pipeline_mode<synchronous>, transform_indices = @transform_3, window_bounds = array<i64: 128, 6>}, {pipeline_mode = #tpu.pipeline_mode<synchronous>, transform_indices = @transform_4, window_bounds = array<i64: 1, 6>}, {pipeline_mode = #tpu.pipeline_mode<synchronous>, transform_indices = @transform_5, window_bounds = array<i64: 8, 6>}]} {
    %c0 = arith.constant 0 : index
    %c0_0 = arith.constant 0 : index
    %0 = vector.load %arg1[%c0, %c0_0] : memref<8x128xf32, #tpu.memory_space<vmem>>, vector<8x128xf32>
    %c0_1 = arith.constant 0 : index
    %c0_2 = arith.constant 0 : index
    %1 = vector.load %arg2[%c0_1, %c0_2] : memref<128x128xf32, #tpu.memory_space<vmem>>, vector<128x128xf32>
    %2 = arith.truncf %0 : vector<8x128xf32> to vector<8x128xbf16>
    %3 = arith.truncf %1 : vector<128x128xf32> to vector<128x128xbf16>
    %cst = arith.constant dense<0.000000e+00> : vector<8x128xf32>
    %4 = tpu.matmul %2, %3, %cst {dimension_numbers = #tpu.dot_dimension_numbers<[1], [0], [0], [1], [0, 0, 1, 1], [], []>} : vector<8x128xbf16>, vector<128x128xbf16>, vector<8x128xf32> -> vector<8x128xf32>
    %c0_3 = arith.constant 0 : index
    %c0_4 = arith.constant 0 : index
    %5 = vector.load %arg3[%c0_3, %c0_4] : memref<1x128xf32, #tpu.memory_space<vmem>>, vector<1x128xf32>
    %6 = vector.broadcast %5 : vector<1x128xf32> to vector<8x128xf32>
    %7 = arith.addf %4, %6 : vector<8x128xf32>
    %c0_5 = arith.constant 0 : index
    %c0_6 = arith.constant 0 : index
    %8 = vector.load %arg4[%c0_5, %c0_6] : memref<128x6xf32, #tpu.memory_space<vmem>>, vector<128x6xf32>
    %9 = arith.truncf %7 : vector<8x128xf32> to vector<8x128xbf16>
    %10 = arith.truncf %8 : vector<128x6xf32> to vector<128x6xbf16>
    %cst_7 = arith.constant dense<0.000000e+00> : vector<8x6xf32>
    %11 = tpu.matmul %9, %10, %cst_7 {dimension_numbers = #tpu.dot_dimension_numbers<[1], [0], [0], [1], [0, 0, 1, 1], [], []>} : vector<8x128xbf16>, vector<128x6xbf16>, vector<8x6xf32> -> vector<8x6xf32>
    %c0_8 = arith.constant 0 : index
    %c0_9 = arith.constant 0 : index
    %12 = vector.load %arg5[%c0_8, %c0_9] : memref<1x6xf32, #tpu.memory_space<vmem>>, vector<1x6xf32>
    %13 = vector.broadcast %12 : vector<1x6xf32> to vector<8x6xf32>
    %14 = arith.addf %11, %13 : vector<8x6xf32>
    %c0_10 = arith.constant 0 : index
    %c0_11 = arith.constant 0 : index
    %15 = vector.load %arg6[%c0_10, %c0_11] : memref<8x6xf32, #tpu.memory_space<vmem>>, vector<8x6xf32>
    tpu.vector_store %arg6[%c0_10, %c0_11], %14 {strides = array<i32>} : memref<8x6xf32, #tpu.memory_space<vmem>>, vector<8x6xf32>,
    return
  }
  func.func @transform_0(%arg0: i32) -> (i32, i32) {
    %c0_i32 = arith.constant 0 : i32
    %c0_i32_0 = arith.constant 0 : i32
    %c0_i32_1 = arith.constant 0 : i32
    return %c0_i32, %c0_i32_0 : i32, i32
  }
  func.func @transform_1(%arg0: i32) -> (i32, i32) {
    %c0_i32 = arith.constant 0 : i32
    %c0_i32_0 = arith.constant 0 : i32
    %c0_i32_1 = arith.constant 0 : i32
    return %c0_i32, %c0_i32_0 : i32, i32
  }
  func.func @transform_2(%arg0: i32) -> (i32, i32) {
    %c0_i32 = arith.constant 0 : i32
    %c0_i32_0 = arith.constant 0 : i32
    %c0_i32_1 = arith.constant 0 : i32
    return %c0_i32, %c0_i32_0 : i32, i32
  }
  func.func @transform_3(%arg0: i32) -> (i32, i32) {
    %c0_i32 = arith.constant 0 : i32
    %c0_i32_0 = arith.constant 0 : i32
    %c0_i32_1 = arith.constant 0 : i32
    return %c0_i32, %c0_i32_0 : i32, i32
  }
  func.func @transform_4(%arg0: i32) -> (i32, i32) {
    %c0_i32 = arith.constant 0 : i32
    %c0_i32_0 = arith.constant 0 : i32
    %c0_i32_1 = arith.constant 0 : i32
    return %c0_i32, %c0_i32_0 : i32, i32
  }
  func.func @transform_5(%arg0: i32) -> (i32, i32) {
    %c0_i32 = arith.constant 0 : i32
    %c0_i32_0 = arith.constant 0 : i32
    %c0_i32_1 = arith.constant 0 : i32
    return %c0_i32, %c0_i32_0 : i32, i32
  }
}

</mosaic_0001>

<bundles_post_ra>
// kernel: vinet_forward.5
= control target key start
LH: loop header
LB: loop body
LE: loop exit
PB: predicated region body
PF: predicated region fallthrough
CT: control target
= control target key end

     0   :  { %8 = vsyncpa [#allocation4], 0  ;;  %s487_s0 = inlined_call_operand.hbm [shape: f32[8,384], index: 0, kind: input, shape index: {}]   ;;  %s488_s1 = inlined_call_operand.hbm [shape: f32[384,128], index: 1, kind: input, shape index: {}]   ;;  %s489_s2 = inlined_call_operand.hbm [shape: f32[1,128], index: 2, kind: input, shape index: {}]   ;;  %s490_s3 = inlined_call_operand.hbm [shape: f32[8,128], index: 3, kind: output, shape index: {}]  }
   0x1   :  { %9 = vsyncpa [#allocation7], 0 }
   0x2   :  { %10 = vsyncpa [#allocation5], 0  ;;  %s402_s12 = smov [#allocation6]   ;;  %s308_s16 = scalar_lea.hbm %s488_s1, 6144 }
   0x3   :  { %s26_s13 = sshll.u32 %s402_s12, 4  ;;  %p309_p0 = scmp.ne.s32.totalorder %s488_s1, %s308_s16  ;;  %s27_s13 = int_to_ptr.vmem [resolvable:$true] %s26_s13 }
   0x4   :  { %p312_p1 = scmp.lt.u32.totalorder %s308_s16, %s488_s1 }
   0x6   :  { %p314_p2 = pnand %p312_p1, %p309_p0 }
   0x8   :  { %317 = shalt.err (!%p314_p2)
}
   0x9   :  { %s318_s21 = scalar_lea.vmem %s27_s13, 6144  ;;  %p323_p4 = scmp.lt.s32.totalorder %s27_s13, %s27_s13 }
   0xa   :  { %p319_p3 = scmp.ne.s32.totalorder %s27_s13, %s318_s21  ;;  %p324_p5 = scmp.lt.s32.totalorder %s318_s21, %s318_s21 }
   0xc   :  { %p325_p6 = por %p324_p5, %p323_p4 }
   0xe   :  { %p326_p7 = pnand %p325_p6, %p319_p3 }
  0x10   :  { %329 = shalt.err (!%p326_p7)
}
  0x11   :  { %s403_s22 = smov 128   ;;  %s404_s23 = smov 8  }
  0x12   :  { %32 = dma.hbm_to_vmem [thread:$0]  %s488_s1, 6144, %s27_s13, [#allocation7], %s403_s22, %s403_s22, %s404_s23  }
  0x13   :  { %s405_s26 = smov [#allocation3]   ;;  %s406_s28 = smov [#allocation8]  }
  0x14   :  { %s17_s27 = sshll.u32 %s405_s26, 4  ;;  %s39_s29 = sshll.u32 %s406_s28, 4  ;;  %s18_s27 = int_to_ptr.vmem [resolvable:$true] %s17_s27  ;;  %s40_s29 = int_to_ptr.vmem [resolvable:$true] %s39_s29 }
  0x15   :  { %s330_s5 = scalar_lea.hbm %s487_s0, 384 }
  0x16   :  { %p331_p8 = scmp.ne.s32.totalorder %s487_s0, %s330_s5  ;;  %p334_p9 = scmp.lt.u32.totalorder %s330_s5, %s487_s0 }
  0x18   :  { %p336_p10 = pnand %p334_p9, %p331_p8 }
  0x1a   :  { %339 = shalt.err (!%p336_p10)
}
  0x1b   :  { %s340_s1 = scalar_lea.vmem %s18_s27, 384  ;;  %p345_p12 = scmp.lt.s32.totalorder %s18_s27, %s18_s27 }
  0x1c   :  { %p341_p11 = scmp.ne.s32.totalorder %s18_s27, %s340_s1  ;;  %p346_p13 = scmp.lt.s32.totalorder %s340_s1, %s340_s1 }
  0x1e   :  { %p347_p0 = por %p346_p13, %p345_p12 }
  0x20   :  { %p348_p1 = pnand %p347_p0, %p341_p11 }
  0x22   :  { %351 = shalt.err (!%p348_p1)
}
  0x23   :  { %20 = dma.hbm_to_vmem [thread:$0]  %s487_s0, 384, %s18_s27, [#allocation4]  }
  0x24   :  { %s352_s14 = scalar_lea.hbm %s489_s2, 16 }
  0x25   :  { %p353_p2 = scmp.ne.s32.totalorder %s489_s2, %s352_s14  ;;  %p356_p3 = scmp.lt.u32.totalorder %s352_s14, %s489_s2 }
  0x27   :  { %p358_p4 = pnand %p356_p3, %p353_p2 }
  0x29   :  { %361 = shalt.err (!%p358_p4)
}
  0x2a   :  { %s362_s19 = scalar_lea.vmem %s40_s29, 16  ;;  %s366_s20 = scalar_lea.vmem %s40_s29, 32 }
  0x2b   :  { %p363_p5 = scmp.ne.s32.totalorder %s40_s29, %s362_s19  ;;  %p367_p6 = scmp.lt.s32.totalorder %s40_s29, %s40_s29 }
  0x2c   :  { %p368_p7 = scmp.lt.s32.totalorder %s366_s20, %s362_s19 }
  0x2e   :  { %p369_p8 = por %p368_p7, %p367_p6 }
  0x30   :  { %p370_p9 = pnand %p369_p8, %p363_p5 }
  0x32   :  { %373 = shalt.err (!%p370_p9)
}
  0x33   :  { %42 = dma.hbm_to_vmem [thread:$0]  %s489_s2, 16, %s40_s29, [#allocation7]  }
  0x34   :  { %396 = dma.done.wait [#allocation4], 384  }
  0x35   :  { %397 = vsyncadd [#allocation4], 4294966912 }
  0x36   :  { %398 = dma.done.wait [#allocation7], 6160  }
  0x37   :  { %399 = vsyncadd [#allocation7], 4294961136  ;;  %v407_v0 = vmov 0.0   ;;  %vm408_vm0 = vmmov 0   ;;  %v78_v1 = vld [vmem:[#allocation6 + $0x80] sm:$0xff]  ;;  %v79_v2 = vld [vmem:[#allocation6 + $0x88] sm:$0xff] }
  0x38   :  { %280 = vmatprep.subr.bf16.mxu1 %v407_v0  ;;  %296 = vmatprep.mubr.msk.bf16.mxu1 %vm408_vm0, %v407_v0  ;;  %v62_v3 = vld [vmem:[#allocation6] sm:$0xff]  ;;  %v121_v4 = vpack.c.bf16 %v79_v2, %v78_v1  ;;  %v63_v5 = vld [vmem:[#allocation6 + $0x8] sm:$0xff]  ;;  %v80_v10 = vld [vmem:[#allocation6 + $0x90] sm:$0xff]  ;;  %s409_s2 = smov [#allocation9]  }
  0x39   :  { %v94_v6 = vld [vmem:[#allocation6 + $0x100] sm:$0xff]  ;;  %v95_v7 = vld [vmem:[#allocation6 + $0x108] sm:$0xff]  ;;  %v113_v8 = vpack.c.bf16 %v63_v5, %v62_v3  ;;  %v81_v11 = vld [vmem:[#allocation6 + $0x98] sm:$0xff]  ;;  %s238_s22 = sshll.u32 %s409_s2, 4  ;;  %s239_s22 = int_to_ptr.vmem [resolvable:$true] %s238_s22 }
  0x3a   :  { %v129_v9 = vpack.c.bf16 %v95_v7, %v94_v6  ;;  %v64_v12 = vld [vmem:[#allocation6 + $0x10] sm:$0xff]  ;;  %249 = vmatprep.subr.bf16.mxu0 %v121_v4  ;;  %v122_v13 = vpack.c.bf16 %v81_v11, %v80_v10  ;;  %v65_v14 = vld [vmem:[#allocation6 + $0x18] sm:$0xff]  ;;  %v82_v19 = vld [vmem:[#allocation6 + $0xa0] sm:$0xff]  ;;  %s374_s23 = scalar_lea.vmem %s239_s22, 128  ;;  %p379_p11 = scmp.lt.s32.totalorder %s239_s22, %s239_s22 }
  0x3b   :  { %v96_v15 = vld [vmem:[#allocation6 + $0x110] sm:$0xff]  ;;  %v97_v16 = vld [vmem:[#allocation6 + $0x118] sm:$0xff]  ;;  %250 = vmatpush3.bf16.msra.mxu0 %v113_v8  ;;  %v114_v17 = vpack.c.bf16 %v65_v14, %v64_v12  ;;  %v83_v20 = vld [vmem:[#allocation6 + $0xa8] sm:$0xff]  ;;  %p375_p10 = scmp.ne.s32.totalorder %s239_s22, %s374_s23  ;;  %p380_p12 = scmp.lt.s32.totalorder %s374_s23, %s374_s23 }
  0x3c   :  { %281 = vmatpush3.bf16.msra.mxu1 %v129_v9  ;;  %v130_v18 = vpack.c.bf16 %v97_v16, %v96_v15  ;;  %v66_v21 = vld [vmem:[#allocation6 + $0x20] sm:$0xff]  ;;  %251 = vmatprep.subr.bf16.mxu0 %v122_v13  ;;  %v123_v22 = vpack.c.bf16 %v83_v20, %v82_v19  ;;  %v67_v23 = vld [vmem:[#allocation6 + $0x28] sm:$0xff]  ;;  %v84_v26 = vld [vmem:[#allocation6 + $0xb0] sm:$0xff] }
  0x3d   :  { %282 = vmatprep.subr.bf16.mxu1 %v407_v0  ;;  %v98_v24 = vld [vmem:[#allocation6 + $0x120] sm:$0xff]  ;;  %v99_v25 = vld [vmem:[#allocation6 + $0x128] sm:$0xff]  ;;  %v85_v27 = vld [vmem:[#allocation6 + $0xb8] sm:$0xff]  ;;  %v115_v28 = vpack.c.bf16 %v67_v23, %v66_v21  ;;  %p381_p13 = por %p380_p12, %p379_p11 }
  0x3e   :  { %v131_v29 = vpack.c.bf16 %v99_v25, %v98_v24  ;;  %v68_v30 = vld [vmem:[#allocation6 + $0x30] sm:$0xff]  ;;  %v124_v31 = vpack.c.bf16 %v85_v27, %v84_v26  ;;  %v69_v32 = vld [vmem:[#allocation6 + $0x38] sm:$0xff]  ;;  %v86_v35 = vld [vmem:[#allocation6 + $0xc0] sm:$0xff] }
  0x3f   :  { %252 = vmatpush3.bf16.msra.mxu0 %v114_v17  ;;  %v100_v33 = vld [vmem:[#allocation6 + $0x130] sm:$0xff]  ;;  %v101_v34 = vld [vmem:[#allocation6 + $0x138] sm:$0xff]  ;;  %v87_v36 = vld [vmem:[#allocation6 + $0xc8] sm:$0xff]  ;;  %v116_v37 = vpack.c.bf16 %v69_v32, %v68_v30  ;;  %p382_p0 = pnand %p381_p13, %p375_p10 }
  0x40   :  { %283 = vmatpush3.bf16.msra.mxu1 %v130_v18  ;;  %253 = vmatprep.subr.bf16.mxu0 %v123_v22  ;;  %v132_v38 = vpack.c.bf16 %v101_v34, %v100_v33  ;;  %v70_v39 = vld [vmem:[#allocation6 + $0x40] sm:$0xff]  ;;  %v125_v40 = vpack.c.bf16 %v87_v36, %v86_v35  ;;  %v71_v41 = vld [vmem:[#allocation6 + $0x48] sm:$0xff]  ;;  %v88_v44 = vld [vmem:[#allocation6 + $0xd0] sm:$0xff] }
  0x41   :  { %284 = vmatprep.subr.bf16.mxu1 %v407_v0  ;;  %v102_v42 = vld [vmem:[#allocation6 + $0x140] sm:$0xff]  ;;  %v103_v43 = vld [vmem:[#allocation6 + $0x148] sm:$0xff]  ;;  %v89_v45 = vld [vmem:[#allocation6 + $0xd8] sm:$0xff]  ;;  %v117_v46 = vpack.c.bf16 %v71_v41, %v70_v39 }
  0x42   :  { %v133_v47 = vpack.c.bf16 %v103_v43, %v102_v42  ;;  %v72_v48 = vld [vmem:[#allocation6 + $0x50] sm:$0xff]  ;;  %v126_v50 = vpack.c.bf16 %v89_v45, %v88_v44  ;;  %v73_v51 = vld [vmem:[#allocation6 + $0x58] sm:$0xff]  ;;  %v90_v55 = vld [vmem:[#allocation6 + $0xe0] sm:$0xff] }
  0x43   :  { %254 = vmatpush3.bf16.msra.mxu0 %v115_v28  ;;  %v60_v49 = vld [vmem:[#allocation3 + $0x8] sm:$0xff]  ;;  %v105_v53 = vld [vmem:[#allocation6 + $0x158] sm:$0xff]  ;;  %v91_v56 = vld [vmem:[#allocation6 + $0xe8] sm:$0xff]  ;;  %v118_v57 = vpack.c.bf16 %v73_v51, %v72_v48 }
  0x44   :  { %285 = vmatpush3.bf16.msra.mxu1 %v131_v29  ;;  %255 = vmatprep.subr.bf16.mxu0 %v124_v31  ;;  %v104_v52 = vld [vmem:[#allocation6 + $0x150] sm:$0xff]  ;;  %v111_v54 = vpack.c.bf16 %v60_v49, %v60_v49  ;;  %v74_v59 = vld [vmem:[#allocation6 + $0x60] sm:$0xff]  ;;  %v127_v60 = vpack.c.bf16 %v91_v56, %v90_v55  ;;  %v75_v61 = vld [vmem:[#allocation6 + $0x68] sm:$0xff] }
  0x45   :  { %286 = vmatprep.subr.bf16.mxu1 %v407_v0  ;;  %v134_v58 = vpack.c.bf16 %v105_v53, %v104_v52  ;;  %v106_v62 = vld [vmem:[#allocation6 + $0x160] sm:$0xff]  ;;  %v107_v63 = vld [vmem:[#allocation6 + $0x168] sm:$0xff]  ;;  %v92_v1 = vld [vmem:[#allocation6 + $0xf0] sm:$0xff]  ;;  %v119_v3 = vpack.c.bf16 %v75_v61, %v74_v59 }
  0x46   :  { %169 = vmatprep.mubr.bf16.mxu0 %v111_v54  ;;  %v93_v2 = vld [vmem:[#allocation6 + $0xf8] sm:$0xff]  ;;  %v135_v4 = vpack.c.bf16 %v107_v63, %v106_v62  ;;  %v76_v5 = vld [vmem:[#allocation6 + $0x70] sm:$0xff]  ;;  %v59_v12 = vld [vmem:[#allocation3] sm:$0xff] }
  0x47   :  { %256 = vmatpush3.bf16.msra.mxu0 %v116_v37  ;;  %v128_v6 = vpack.c.bf16 %v93_v2, %v92_v1  ;;  %v77_v7 = vld [vmem:[#allocation6 + $0x78] sm:$0xff]  ;;  %v108_v8 = vld [vmem:[#allocation6 + $0x170] sm:$0xff]  ;;  %v110_v14 = vpack.c.bf16 %v59_v12, %v59_v12  ;;  %v248_v25 = vld [vmem:[#allocation8] ss:$0 sm:$0xff] }
  0x48   :  { %287 = vmatpush3.bf16.msra.mxu1 %v132_v38  ;;  %257 = vmatprep.subr.bf16.mxu0 %v125_v40  ;;  %v109_v9 = vld [vmem:[#allocation6 + $0x178] sm:$0xff]  ;;  %v120_v10 = vpack.c.bf16 %v77_v7, %v76_v5 }
  0x49   :  { %288 = vmatprep.subr.bf16.mxu1 %v407_v0  ;;  %v136_v11 = vpack.c.bf16 %v109_v9, %v108_v8  ;;  %v61_v13 = vld [vmem:[#allocation3 + $0x10] sm:$0xff] }
  0x4a   :  { %v112_v15 = vpack.c.bf16 %v61_v13, %v61_v13 }
  0x4b   :  { %258 = vmatpush3.bf16.msra.mxu0 %v117_v46 }
  0x4c   :  { %289 = vmatpush3.bf16.msra.mxu1 %v133_v47  ;;  %259 = vmatprep.subr.bf16.mxu0 %v126_v50 }
  0x4d   :  { %290 = vmatprep.subr.bf16.mxu1 %v407_v0 }
  0x4f   :  { %260 = vmatpush3.bf16.msra.mxu0 %v118_v57 }
  0x50   :  { %291 = vmatpush3.bf16.msra.mxu1 %v134_v58  ;;  %261 = vmatprep.subr.bf16.mxu0 %v127_v60 }
  0x51   :  { %292 = vmatprep.subr.bf16.mxu1 %v407_v0 }
  0x53   :  { %262 = vmatpush3.bf16.msra.mxu0 %v119_v3 }
  0x54   :  { %293 = vmatpush3.bf16.msra.mxu1 %v135_v4  ;;  %263 = vmatprep.subr.bf16.mxu0 %v128_v6 }
  0x55   :  { %294 = vmatprep.subr.bf16.mxu1 %v407_v0 }
  0x57   :  { %264 = vmatpush3.bf16.msra.mxu0 %v120_v10 }
  0x58   :  { %295 = vmatpush3.bf16.msra.mxu1 %v136_v11 }
  0x5a   :  { %170 = vmatmul.mubr.bf16.vlgmr.msra.gmra.mrb[0].mxu0 %v110_v14 }
  0x5b   :  { %297 = vmatmul.mubr.bf16.vlgmr.msra.gmra.mrb[0].mxu1 %v112_v15 }
 0x12d   :  { %v265_v16 = vpop.f32.mrb[0].mxu0 }
 0x12e   :  { %v211_v17 = vpop.f32.mrb[0].mxu1  ;;  %v266_v18 = vpop.f32.mrb[1].mxu0 }
 0x12f   :  { %v298_v19 = vpop.f32.mrb[1].mxu1  ;;  %v267_v20 = vadd.f32 %v266_v18, %v265_v16  ;;  %v268_v21 = vpop.f32.mrb[2].mxu0 }
 0x130   :  { %v214_v22 = vpop.f32.mrb[2].mxu1  ;;  %v269_v23 = vpop.f32.mrb[3].mxu0 }
 0x131   :  { %v299_v24 = vpop.f32.mrb[3].mxu1  ;;  %v212_v26 = vadd.f32 %v267_v20, %v211_v17 }
 0x133   :  { %v230_v0 = vadd.f32 %v248_v25, %v212_v26 }
 0x135   :  { %231 = vst [vmem:[#allocation9] sm:$0xff] %v230_v0 }
 0x136   :  { %385 = shalt.err (!%p382_p0)
}
 0x137   :  { %s386_s26 = scalar_lea.hbm %s490_s3, 128 }
 0x138   :  { %p387_p1 = scmp.ne.s32.totalorder %s490_s3, %s386_s26  ;;  %p390_p2 = scmp.lt.u32.totalorder %s386_s26, %s490_s3 }
 0x13a   :  { %p392_p3 = pnand %p390_p2, %p387_p1 }
 0x13c   :  { %395 = shalt.err (!%p392_p3)
}
 0x13d   :  { %241 = dma.vmem_to_hbm [thread:$0]  %s239_s22, 128, %s490_s3, [#allocation5]  }
 0x13e   :  { %400 = dma.done.wait [#allocation5], 128  }
 0x13f   :  { %401 = vsyncadd [#allocation5], 4294967168 }
 0x140   :  { %245 = vsyncpa [#allocation4], 1 }
 0x141   :  { %246 = vsyncpa [#allocation7], 1 }
 0x142   :  { %247 = vsyncpa [#allocation5], 1 }

// kernel: vinet_forward.7
= control target key start
LH: loop header
LB: loop body
LE: loop exit
PB: predicated region body
PF: predicated region fallthrough
CT: control target
= control target key end

     0   :  { %s1160_s0 = inlined_call_operand.hbm [shape: f32[8,134], index: 0, kind: input, shape index: {}]   ;;  %s1161_s1 = inlined_call_operand.hbm [shape: f32[134,512], index: 1, kind: input, shape index: {}]   ;;  %s1162_s2 = inlined_call_operand.hbm [shape: f32[1,512], index: 2, kind: input, shape index: {}]   ;;  %s1163_s3 = inlined_call_operand.hbm [shape: f32[8,512], index: 3, kind: output, shape index: {}]  }
   0x1   :  { %1169 = sst [smem:[#allocation13_spill]] %s1161_s1 }
   0x2   :  { %8 = vsyncpa [#allocation4], 0 }
   0x3   :  { %9 = vsyncpa [#allocation7], 0 }
   0x4   :  { %11 = vsyncpa [#allocation7 + $0x1], 0 }
   0x5   :  { %12 = vsyncpa [#allocation5], 0 }
   0x6   :  { %14 = vsyncpa [#allocation5 + $0x1], 0  ;;  %s873_s12 = smov 0   ;;  %s875_s13 = smov 0  }
   0x7   :  { %s877_s14 = smov 0   ;;  %s879_s15 = smov 0  }
   0x8   :  { %s881_s16 = smov 0   ;;  %s883_s17 = smov 0  }
   0x9 LB: > { %s35_s18 = sadd.s32 1, %s840_s16  ;;  %s76_s19 = sadd.s32 1, %s832_s14  ;;  %s844_s17 = sphi %s883_s17, %s20_s17   ;;  %s840_s16 = sphi %s881_s16, %s1189_s16   ;;  %s836_s15 = sphi %s879_s15, %s1188_s15   ;;  %s832_s14 = sphi %s877_s14, %s1187_s14   ;;  %s828_s13 = sphi %s875_s13, %s1186_s13   ;;  %s824_s12 = sphi %s873_s12, %s1185_s12  }
   0xa   : > { %p37_p0 = scmp.ge.s32.totalorder %s35_s18, 2  ;;  %p83_p1 = scmp.ne.s32.totalorder %s832_s14, %s828_s13 }
   0xb   : > { %p84_p2 = scmp.eq.s32.totalorder %s844_s17, 0  ;;  %p615_p5 = scmp.lt.s32.totalorder %s844_s17, 2 }
   0xc   : > { %s1191_s18 = smov (%p37_p0, %s35_s18), 0  ;;  %s183_s21 = sand.u32 1, %s844_s17  }
   0xd   : > { %p85_p4 = por %p84_p2, %p83_p1  ;;  %s72_s20 = ssub.s32 %s840_s16, %s1191_s18 }
   0xe   : > { %p74_p6 = scmp.eq.s32.totalorder %s72_s20, 0  ;;  %s185_s22 = sand.u32 1, %s832_s14  }
   0xf   : > { %s584_s23 = sshll.u32 %s840_s16, 8  ;;  %s587_s25 = smul.u32 272, %s185_s22 }
  0x10   : > { %s921_s24 = scalar_select %p74_p6, %s832_s14, %s76_s19  }
  0x11   : > { %s1170_s1 = sld [smem:[#allocation13_spill]]  ;;  %p930_p7 = pnand %p615_p5, %p85_p4 }
  0x12   : > { %s187_s30 = scalar_lea.vmem [#allocation6], %s587_s25  ;;  %s936_s5 = scalar_lea.sflag [#allocation7], %s183_s21 }
  0x13   : > { %s197_s4 = sshll.u32 %s187_s30, 4  ;;  %p672_p9 = pneg %p930_p7  ;;  %s934_s4 = int_to_ptr.vmem [resolvable:$true] %s197_s4 }
  0x17   : > { %s928_s28 = scalar_lea.hbm %s1170_s1, %s584_s23  ;;  %s675_s9 = scalar_lea.hbm %s1170_s1, 8704 }
  0x18   : > { %s670_s6 = scalar_lea.hbm %s928_s28, 4352  ;;  %p676_p12 = scmp.lt.u32.totalorder %s928_s28, %s1170_s1 }
  0x19   : > { %p671_p8 = scmp.ne.s32.totalorder %s928_s28, %s670_s6  ;;  %p677_p13 = scmp.lt.u32.totalorder %s675_s9, %s670_s6 }
  0x1a   : > { %p679_p2 = scmp.lt.u32.totalorder %s670_s6, %s928_s28 }
  0x1b   : > { %p673_p10 = pnand %p672_p9, %p671_p8  ;;  %p678_p0 = por %p677_p13, %p676_p12 }
  0x1d   : > { %p674_p11 = pneg %p673_p10  ;;  %p680_p4 = por %p679_p2, %p678_p0 }
  0x1f   : > { %p681_p5 = pnand %p680_p4, %p674_p11 }
  0x21   : > { %684 = shalt.err (!%p681_p5)
}
  0x22   : > { %s685_s19 = scalar_lea.vmem %s934_s4, 4352  ;;  %s846_s20 = smov [#allocation6]  }
  0x23   : > { %p686_p6 = scmp.ne.s32.totalorder %s934_s4, %s685_s19  ;;  %s690_s21 = sshll.u32 %s846_s20, 4  ;;  %s691_s21 = int_to_ptr.vmem [resolvable:$false] %s690_s21 }
  0x24   : > { %s692_s23 = scalar_lea.vmem %s691_s21, 8704  ;;  %p693_p3 = scmp.lt.s32.totalorder %s934_s4, %s691_s21 }
  0x25   : > { %p688_p8 = pnand %p686_p6, %p672_p9  ;;  %p694_p12 = scmp.lt.s32.totalorder %s692_s23, %s685_s19 }
  0x27   : > { %p689_p10 = pneg %p688_p8  ;;  %p695_p13 = por %p694_p12, %p693_p3 }
  0x29   : > { %p696_p0 = pnand %p695_p13, %p689_p10 }
  0x2b   : > { %699 = shalt.err (!%p696_p0)
}
  0x2c   : > { %s847_s25 = smov 512   ;;  %s848_s26 = smov 256  }
  0x2d   : > { %s849_s27 = smov 16   ;;  %s965_s30 = sadd.s32 4294967295, %s844_s17  }
  0x2e   : > { %606 = dma.hbm_to_vmem [thread:$0]  (!%p930_p7), %s928_s28, 4352, %s934_s4, %s936_s5, %s847_s25, %s848_s26, %s849_s27  }
  0x2f   : > { %s564_s6 = sadd.s32 4294967294, %s844_s17   ;;  %p89_p3 = scmp.ne.s32.totalorder %s828_s13, %s824_s12 }
  0x30   : > { %p1164_p11 = scmp.eq.s32.totalorder %s965_s30, 0  ;;  %p141_p2 = scmp.eq.s32.totalorder %s965_s30, 1 }
  0x31   : > { %p147_p4 = scmp.eq.s32.totalorder %s564_s6, 1  ;;  %p565_p6 = scmp.ge.s32.totalorder %s844_s17, 1 }
  0x32   : > { %p974_p5 = por %p1164_p11, %p89_p3  ;;  %p982_p8 = por %p141_p2, %p83_p1 }
  0x33   : > { %p986_p10 = por %p147_p4, %p89_p3  ;;  %p154_p12 = scmp.lt.s32.totalorder %s844_s17, 3 }
  0x34   : > { %s1172_s7 = scalar_select %p974_p5, 1, 0 }
  0x35   : > { %s1173_s28 = scalar_select %p982_p8, 1, 0 }
  0x36   : > { %s1174_s4 = scalar_select %p986_p10, 1, 0 }
  0x37   : > { %s570_s8 = sshll.u32 %s185_s22, 1  ;;  %p993_p13 = pnand %p565_p6, %p154_p12 }
  0x38   : > { %s850_s10 = smov [#allocation3]   ;;  %s585_s19 = sshll.u32 %s840_s16, 5 }
  0x39   : > { %s1175_s9 = scalar_select %p993_p13, 1, 0 }
  0x3a   : > { %s172_s11 = sshll.u32 %s850_s10, 4  ;;  %p599_p1 = pneg %p993_p13  ;;  %s997_s11 = int_to_ptr.vmem [resolvable:$true] %s172_s11 }
  0x3b   : > { %s1005_s23 = scalar_lea.hbm %s1162_s2, %s585_s19  ;;  %s211_s22 = scalar_lea.vmem [#allocation8], %s570_s8 }
  0x3c   : > { %s219_s25 = sshll.u32 %s211_s22, 4  ;;  %p1009_p0 = pnand %p599_p1, %p1164_p11  ;;  %s220_s25 = int_to_ptr.vmem [resolvable:$true] %s219_s25 }
  0x3d   : > { %s700_s27 = scalar_lea.hbm %s1005_s23, 32  ;;  %s705_s19 = scalar_lea.hbm %s1162_s2, 64 }
  0x3e   : > { %s1176_s26 = scalar_select %p1009_p0, 1, 0 }
  0x3f   : > { %p701_p3 = scmp.ne.s32.totalorder %s1005_s23, %s700_s27  ;;  %p706_p6 = scmp.lt.u32.totalorder %s1005_s23, %s1162_s2 }
  0x40   : > { %p707_p12 = scmp.lt.u32.totalorder %s705_s19, %s700_s27  ;;  %p709_p11 = scmp.lt.u32.totalorder %s700_s27, %s1005_s23 }
  0x41   : > { %p703_p2 = pnand %p701_p3, %p672_p9 }
  0x42   : > { %p708_p1 = por %p707_p12, %p706_p6 }
  0x43   : > { %p704_p4 = pneg %p703_p2 }
  0x44   : > { %p710_p10 = por %p709_p11, %p708_p1 }
  0x46   : > { %p711_p8 = pnand %p710_p10, %p704_p4 }
  0x48   : > { %714 = shalt.err (!%p711_p8)
}
  0x49   : > { %s715_s8 = scalar_lea.vmem %s220_s25, 32  ;;  %s851_s22 = smov [#allocation8]  }
  0x4a   : > { %p716_p5 = scmp.ne.s32.totalorder %s220_s25, %s715_s8  ;;  %s720_s6 = sshll.u32 %s851_s22, 4  ;;  %s721_s6 = int_to_ptr.vmem [resolvable:$false] %s720_s6 }
  0x4b   : > { %s722_s10 = scalar_lea.vmem %s721_s6, 64  ;;  %p723_p13 = scmp.lt.s32.totalorder %s220_s25, %s721_s6 }
  0x4c   : > { %p718_p3 = pnand %p716_p5, %p672_p9  ;;  %p724_p0 = scmp.lt.s32.totalorder %s722_s10, %s715_s8 }
  0x4e   : > { %p719_p2 = pneg %p718_p3  ;;  %p725_p6 = por %p724_p0, %p723_p13 }
  0x50   : > { %p726_p12 = pnand %p725_p6, %p719_p2 }
  0x52   : > { %729 = shalt.err (!%p726_p12)
}
  0x53   : > { %609 = dma.hbm_to_vmem [thread:$0]  (!%p930_p7), %s1005_s23, 32, %s220_s25, %s936_s5  }
  0x54   : > { %s730_s20 = scalar_lea.hbm %s1160_s0, 256  ;;  %p1177_p11 = scmp.ne.s32.totalorder %s1176_s26, 0 }
  0x55   : > { %p731_p9 = scmp.ne.s32.totalorder %s1160_s0, %s730_s20  ;;  %p737_p13 = scmp.lt.u32.totalorder %s730_s20, %s1160_s0 }
  0x56   : > { %p732_p5 = pneg %p1177_p11 }
  0x58   : > { %p733_p8 = pnand %p732_p5, %p731_p9 }
  0x5a   : > { %p734_p10 = pneg %p733_p8 }
  0x5c   : > { %p739_p0 = pnand %p737_p13, %p734_p10 }
  0x5e   : > { %742 = shalt.err (!%p739_p0)
}
  0x5f   : > { %s743_s29 = scalar_lea.vmem %s997_s11, 256  ;;  %p751_p3 = scmp.lt.s32.totalorder %s997_s11, %s997_s11 }
  0x60   : > { %p744_p7 = scmp.ne.s32.totalorder %s997_s11, %s743_s29  ;;  %p752_p2 = scmp.lt.s32.totalorder %s743_s29, %s743_s29 }
  0x62   : > { %p746_p4 = pnand %p744_p7, %p732_p5  ;;  %p753_p6 = por %p752_p2, %p751_p3 }
  0x64   : > { %p747_p1 = pneg %p746_p4 }
  0x66   : > { %p754_p12 = pnand %p753_p6, %p747_p1 }
  0x68   : > { %757 = shalt.err (!%p754_p12)
}
  0x69   : > { %602 = dma.hbm_to_vmem [thread:$0]  (!%p1177_p11), %s1160_s0, 256, %s997_s11, [#allocation4]  }
  0x6a   : > { %p1178_p9 = scmp.ne.s32.totalorder %s1175_s9, 0 }
  0x6b   : > { %p1179_p8 = scmp.eq.s32.totalorder (!%p1178_p9), %s965_s30, 0 }
  0x6c   : > { %228 = sbr.rel (%p1178_p9) target bundleno = 389 (0x185), region = 32 }
  0x73   : > { %811 = dma.done.wait (%p1179_p8), [#allocation4], 256   ;;  %p1180_p5 = pmov %p1179_p8 }
  0x74   : > { %s234_s23 = sand.u32 1, %s965_s30   ;;  %s1062_s25 = sand.u32 1, %s828_s13  }
  0x75   : > { %813 = vsyncadd (%p1180_p5), [#allocation4], 4294967040  ;;  %s588_s26 = smul.u32 272, %s1062_s25  ;;  %s235_s6 = scalar_lea.sflag [#allocation7], %s234_s23 }
  0x76   : > { %p1181_p11 = scmp.ne.s32.totalorder %s1172_s7, 0 }
  0x77   : > { %s1065_s10 = scalar_lea.vmem [#allocation6], %s588_s26 }
  0x78   : > { %815 = dma.done.wait (%p1181_p11), %s235_s6, 4384  }
  0x79   : > { %817 = vsyncadd (%p1181_p11), %s235_s6, 4294962912  ;;  %v292_v0 = vld [vmem:[%s1065_s10 + $0x8] sm:$0xff]  ;;  %v294_v1 = vld [vmem:[%s1065_s10 + $0x18] sm:$0xff]  ;;  %vm345_vm0 = vcmask 48128   ;;  %vm349_vm1 = vcmask 1042432   ;;  %v408_v57 = vlaneseq  ;;  %s575_s30 = sshll.u32 %s1062_s25, 1 }
  0x7a   : > { %v291_v2 = vld [vmem:[%s1065_s10] sm:$0xff]  ;;  %v328_v3 = vpack.c.bf16 %v294_v1, %v292_v0  ;;  %v293_v4 = vld [vmem:[%s1065_s10 + $0x10] sm:$0xff]  ;;  %v296_v5 = vld [vmem:[%s1065_s10 + $0x28] sm:$0xff]  ;;  %s576_s7 = sshll.u32 %s1062_s25, 4  ;;  %s247_s9 = scalar_lea.vmem [#allocation8], %s575_s30 }
  0x7b   : > { %v298_v6 = vld [vmem:[%s1065_s10 + $0x38] sm:$0xff]  ;;  %v327_v7 = vpack.c.bf16 %v293_v4, %v291_v2  ;;  %v295_v9 = vld [vmem:[%s1065_s10 + $0x20] sm:$0xff]  ;;  %v297_v10 = vld [vmem:[%s1065_s10 + $0x30] sm:$0xff]  ;;  %v409_v58 = vshrl.u32 %v408_v57, 7  ;;  %s586_s11 = sshll.u32 %s836_s15, 8  ;;  %s274_s27 = scalar_lea.vmem [#allocation9], %s576_s7 }
  0x7c   : > { %v330_v8 = vpack.c.bf16 %v298_v6, %v296_v5  ;;  %v300_v11 = vld [vmem:[%s1065_s10 + $0x48] sm:$0xff]  ;;  %356 = vmatprep.subr.bf16.mxu0 %v328_v3  ;;  %v302_v12 = vld [vmem:[%s1065_s10 + $0x58] sm:$0xff]  ;;  %v329_v13 = vpack.c.bf16 %v297_v10, %v295_v9  ;;  %v299_v15 = vld [vmem:[%s1065_s10 + $0x40] sm:$0xff]  ;;  %s439_s19 = sshll.u32 %s274_s27, 4  ;;  %s1111_s8 = scalar_lea.hbm %s1163_s3, %s586_s11  ;;  %s1113_s19 = int_to_ptr.vmem [resolvable:$true] %s439_s19 }
  0x7d   : > { %357 = vmatpush1.bf16.msra.mxu0 %v327_v7  ;;  %v332_v14 = vpack.c.bf16 %v302_v12, %v300_v11  ;;  %v301_v16 = vld [vmem:[%s1065_s10 + $0x50] sm:$0xff]  ;;  %v304_v17 = vld [vmem:[%s1065_s10 + $0x68] sm:$0xff]  ;;  %v306_v18 = vld [vmem:[%s1065_s10 + $0x78] sm:$0xff]  ;;  %v410_v59 = vsub.s32 0, %v409_v58  ;;  %v414_v61 = vsub.s32 1, %v409_v58  ;;  %s423_s15 = scalar_lea.sflag [#allocation5], %s1062_s25 }
  0x7e   : > { %358 = vmatprep.subr.bf16.mxu0 %v330_v8  ;;  %v331_v19 = vpack.c.bf16 %v301_v16, %v299_v15  ;;  %v334_v20 = vpack.c.bf16 %v306_v18, %v304_v17  ;;  %v303_v21 = vld [vmem:[%s1065_s10 + $0x60] sm:$0xff]  ;;  %v305_v22 = vld [vmem:[%s1065_s10 + $0x70] sm:$0xff]  ;;  %v308_v23 = vld [vmem:[%s1065_s10 + $0x88] sm:$0xff]  ;;  %s758_s22 = scalar_lea.vmem %s1113_s19, 256  ;;  %p1182_p13 = scmp.ne.s32.totalorder %s1173_s28, 0 }
  0x7f   : > { %v310_v24 = vld [vmem:[%s1065_s10 + $0x98] sm:$0xff]  ;;  %v333_v26 = vpack.c.bf16 %v305_v22, %v303_v21  ;;  %v307_v29 = vld [vmem:[%s1065_s10 + $0x80] sm:$0xff]  ;;  %v309_v30 = vld [vmem:[%s1065_s10 + $0x90] sm:$0xff]  ;;  %p759_p10 = scmp.ne.s32.totalorder %s1113_s19, %s758_s22  ;;  %s852_s29 = smov [#allocation9]  }
  0x80   : > { %v290_v25 = vld [vmem:[#allocation3 + $0x8] sm:$0xff]  ;;  %v336_v28 = vpack.c.bf16 %v310_v24, %v308_v23  ;;  %v335_v33 = vpack.c.bf16 %v309_v30, %v307_v29  ;;  %v311_v35 = vld [vmem:[%s1065_s10 + $0xa0] sm:$0xff]  ;;  %v313_v36 = vld [vmem:[%s1065_s10 + $0xb0] sm:$0xff]  ;;  %s762_s1 = sshll.u32 %s852_s29, 4  ;;  %s763_s1 = int_to_ptr.vmem [resolvable:$false] %s762_s1 }
  0x81   : > { %359 = vmatpush1.bf16.msra.mxu0 %v329_v13  ;;  %v326_v27 = vpack.c.bf16 %v290_v25, %v290_v25  ;;  %v312_v31 = vld [vmem:[%s1065_s10 + $0xa8] sm:$0xff]  ;;  %v314_v32 = vld [vmem:[%s1065_s10 + $0xb8] sm:$0xff]  ;;  %v337_v39 = vpack.c.bf16 %v313_v36, %v311_v35  ;;  %v315_v41 = vld [vmem:[%s1065_s10 + $0xc0] sm:$0xff]  ;;  %p760_p0 = pnand %p759_p10, %p1182_p13  ;;  %s764_s5 = scalar_lea.vmem %s763_s1, 512 }
  0x82   : > { %360 = vmatprep.subr.bf16.mxu0 %v332_v14  ;;  %v338_v34 = vpack.c.bf16 %v314_v32, %v312_v31  ;;  %v316_v37 = vld [vmem:[%s1065_s10 + $0xc8] sm:$0xff]  ;;  %v318_v38 = vld [vmem:[%s1065_s10 + $0xd8] sm:$0xff]  ;;  %v317_v42 = vld [vmem:[%s1065_s10 + $0xd0] sm:$0xff]  ;;  %p765_p4 = scmp.lt.s32.totalorder %s1113_s19, %s763_s1  ;;  %p766_p1 = scmp.lt.s32.totalorder %s764_s5, %s758_s22 }
  0x83   : > { %578 = vmatprep.mubr.msk.bf16.mxu0 %vm345_vm0, %v326_v27  ;;  %v340_v40 = vpack.c.bf16 %v318_v38, %v316_v37  ;;  %v320_v43 = vld [vmem:[%s1065_s10 + $0xe8] sm:$0xff]  ;;  %v322_v44 = vld [vmem:[%s1065_s10 + $0xf8] sm:$0xff]  ;;  %v339_v45 = vpack.c.bf16 %v317_v42, %v315_v41  ;;  %v319_v47 = vld [vmem:[%s1065_s10 + $0xe0] sm:$0xff]  ;;  %p761_p7 = pneg %p760_p0 }
  0x84   : > { %v342_v46 = vpack.c.bf16 %v322_v44, %v320_v43  ;;  %v321_v48 = vld [vmem:[%s1065_s10 + $0xf0] sm:$0xff]  ;;  %v324_v49 = vld [vmem:[%s1065_s10 + $0x108] sm:$0x3f]  ;;  %v323_v50 = vld [vmem:[%s1065_s10 + $0x100] sm:$0x3f]  ;;  %p767_p3 = por %p766_p1, %p765_p4 }
  0x85   : > { %361 = vmatpush1.bf16.msra.mxu0 %v331_v19  ;;  %v341_v51 = vpack.c.bf16 %v321_v48, %v319_v47  ;;  %v344_v52 = vpack.c.bf16 %v324_v49, %v324_v49  ;;  %v343_v53 = vpack.c.bf16 %v323_v50, %v323_v50  ;;  %v289_v54 = vld [vmem:[#allocation3] sm:$0xff]  ;;  %v406_v60 = vld [vmem:[%s247_s9] sm:$0x3] }
  0x86   : > { %362 = vmatprep.subr.bf16.mxu0 %v334_v20  ;;  %v325_v56 = vpack.c.bf16 %v289_v54, %v289_v54  ;;  %v411_v62 = vrot.slane %v406_v60, %v410_v59  ;;  %v415_v63 = vrot.slane %v406_v60, %v414_v61  ;;  %p768_p2 = pnand %p767_p3, %p761_p7 }
  0x87   : > { %v351_v55 = vsel %vm349_vm1, %v343_v53, 0 }
  0x89   : > { %363 = vmatpush1.bf16.msra.mxu0 %v333_v26 }
  0x8a   : > { %364 = vmatprep.subr.bf16.mxu0 %v336_v28 }
  0x8d   : > { %365 = vmatpush1.bf16.msra.mxu0 %v335_v33 }
  0x8e   : > { %366 = vmatprep.subr.bf16.mxu0 %v338_v34 }
  0x91   : > { %367 = vmatpush1.bf16.msra.mxu0 %v337_v39 }
  0x92   : > { %368 = vmatprep.subr.bf16.mxu0 %v340_v40 }
  0x95   : > { %369 = vmatpush1.bf16.msra.mxu0 %v339_v45 }
  0x96   : > { %370 = vmatprep.subr.bf16.mxu0 %v342_v46 }
  0x99   : > { %371 = vmatpush1.bf16.msra.mxu0 %v341_v51 }
  0x9a   : > { %577 = vmatprep.subr.msk.bf16.mxu0 %vm349_vm1, %v344_v52 }
  0x9d   : > { %373 = vmatpush1.bf16.msra.mxu0 %v351_v55 }
  0xa0   : > { %389 = vmatmul.mubr.bf16.vlgmr.msra.gmra.mrb[0].mxu0 %v325_v56 }
 0x173   : > { %v390_v0 = vpop.f32.mrb[0].mxu0 }
 0x174   : > { %v418_v1 = vadd.f32 %v411_v62, %v390_v0  ;;  %v392_v2 = vpop.f32.mrb[1].mxu0 }
 0x175   : > { %v419_v3 = vadd.f32 %v415_v63, %v392_v2  ;;  %v394_v4 = vpop.f32.mrb[2].mxu0 }
 0x176   : > { %420 = vst [vmem:[%s274_s27] sm:$0xff] %v418_v1  ;;  %v395_v5 = vpop.f32.mrb[3].mxu0 }
 0x177   : > { %421 = vst [vmem:[%s274_s27 + $0x8] sm:$0xff] %v419_v3 }
 0x178   : > { %771 = shalt.err (!%p768_p2)
}
 0x179   : > { %s772_s23 = scalar_lea.hbm %s1111_s8, 256  ;;  %s776_s6 = scalar_lea.hbm %s1163_s3, 512 }
 0x17a   : > { %p773_p6 = scmp.ne.s32.totalorder %s1111_s8, %s772_s23  ;;  %p777_p8 = scmp.lt.u32.totalorder %s1111_s8, %s1163_s3 }
 0x17b   : > { %p778_p5 = scmp.lt.u32.totalorder %s776_s6, %s772_s23  ;;  %p780_p10 = scmp.lt.u32.totalorder %s772_s23, %s1111_s8 }
 0x17c   : > { %p774_p12 = pnand %p773_p6, %p1182_p13 }
 0x17d   : > { %p779_p11 = por %p778_p5, %p777_p8 }
 0x17e   : > { %p775_p9 = pneg %p774_p12 }
 0x17f   : > { %p781_p0 = por %p780_p10, %p779_p11 }
 0x181   : > { %p782_p7 = pnand %p781_p0, %p775_p9 }
 0x183   : > { %785 = shalt.err (!%p782_p7)
}
 0x184   : > { %597 = dma.vmem_to_hbm [thread:$0]  (%p1182_p13), %s1113_s19, 256, %s1111_s8, %s423_s15  }
 0x185 PF: > { %s451_s7 = sand.u32 1, %s824_s12   ;;  %p1183_p4 = scmp.ne.s32.totalorder %s1174_s4, 0 }
 0x186   : > { %p1184_p1 = scmp.ge.s32.totalorder %s844_s17, 2  ;;  %s452_s9 = scalar_lea.sflag [#allocation5], %s451_s7 }
 0x188   : > { %p611_p3 = pnand %p1184_p1, %p1183_p4 }
 0x18a   : > { %819 = dma.done.wait (!%p611_p3), %s452_s9, 256  }
 0x18b   : > { %821 = vsyncadd (!%p611_p3), %s452_s9, 4294967040  ;;  %s20_s17 = sadd.s32 1, %s844_s17   ;;  %s1185_s12 = smov %s828_s13 }
 0x18c   : > { %p17_p2 = scmp.ge.s32.totalorder %s20_s17, 4   ;;  %s1186_s13 = smov %s832_s14 }
 0x18d   : > { %s1187_s14 = smov %s921_s24  ;;  %s1188_s15 = smov %s840_s16 }
 0x18e   : > { %s1189_s16 = smov %s1191_s18  ;;  %19 = sbr.rel (!%p17_p2) target bundleno = 9 (0x9), region = 102 }
 0x195   :  { %457 = vsyncpa [#allocation4], 1 }
 0x196   :  { %459 = vsyncpa [#allocation4 + $0x1], 1 }
 0x197   :  { %460 = vsyncpa [#allocation7], 1 }
 0x198   :  { %462 = vsyncpa [#allocation7 + $0x1], 1 }
 0x199   :  { %463 = vsyncpa [#allocation5], 1 }
 0x19a   :  { %465 = vsyncpa [#allocation5 + $0x1], 1 }

// kernel: vinet_forward.6
= control target key start
LH: loop header
LB: loop body
LE: loop exit
PB: predicated region body
PF: predicated region fallthrough
CT: control target
= control target key end

     0   :  { %vm43_vm0 = vcmask 1042432   ;;  %v1574_v2 = vmov 0.0   ;;  %vm1575_vm1 = vmmov 0   ;;  %s1860_s0 = inlined_call_operand.vmem [shape: f32[5,8,6], index: 0, kind: input, shape index: {}]   ;;  %s1861_s1 = inlined_call_operand.vmem [shape: f32[6,24], index: 1, kind: input, shape index: {}]   ;;  %s1862_s2 = inlined_call_operand.vmem [shape: f32[6,24], index: 2, kind: input, shape index: {}]   ;;  %s1863_s3 = inlined_call_operand.vmem [shape: f32[1,24], index: 3, kind: input, shape index: {}]   ;;  %s1864_s4 = inlined_call_operand.vmem [shape: f32[6,24], index: 4, kind: input, shape index: {}]   ;;  %s1865_s5 = inlined_call_operand.vmem [shape: f32[6,24], index: 5, kind: input, shape index: {}]   ;;  %s1866_s6 = inlined_call_operand.vmem [shape: f32[1,24], index: 6, kind: input, shape index: {}]   ;;  %s1867_s7 = inlined_call_operand.hbm [shape: f32[8,6], index: 7, kind: output, shape index: {}]  }
   0x1   :  { %v29_v0 = vld [vmem:[%s1861_s1] sm:$0x3f]  ;;  %1292 = vmatprep.subr.bf16.mxu0 %v1574_v2  ;;  %1294 = vmatprep.mubr.msk.bf16.mxu0 %vm1575_vm1, %v1574_v2 }
   0x2   :  { %v28_v1 = vld [vmem:[%s1860_s0] sm:$0xff]  ;;  %v31_v3 = vpack.c.bf16 %v29_v0, %v29_v0  ;;  %1304 = vmatprep.subr.bf16.mxu1 %v1574_v2  ;;  %1306 = vmatprep.mubr.msk.bf16.mxu1 %vm1575_vm1, %v1574_v2 }
   0x3   :  { %v87_v4 = vld [vmem:[%s1862_s2] sm:$0x3f] }
   0x4   :  { %v88_v5 = vpack.c.bf16 %v87_v4, %v87_v4 }
   0x5   :  { %12 = vsyncpa [#allocation3], 0  ;;  %v1638_v6 = vsel %vm43_vm0, %v31_v3, 0  ;;  %v30_v7 = vpack.c.bf16 %v28_v1, %v28_v1  ;;  %vm39_vm2 = vcmask 48128   ;;  %v1576_v9 = vmov 0   ;;  %s1577_s30 = smov 116  }
   0x6   :  { %1293 = vmatpush3.bf16.msra.mxu0 %v1638_v6  ;;  %v1643_v8 = vsel %vm43_vm0, %v88_v5, 0  ;;  %v1657_v10 = vld [vmem:[%s1863_s3] ss:$0 sm:$0xff]  ;;  %s1578_s3 = smov 6   ;;  %v1232_v27 = vld [vmem:[%s1860_s0 + $0x8] sm:$0xff]  ;;  %s1580_s12 = smov 110  }
   0x7   :  { %1298 = vmatprep.subr.bf16.mxu0 %v1574_v2  ;;  %v160_v28 = vld [vmem:[%s1864_s4] sm:$0x3f]  ;;  %v291_v29 = vpack.c.bf16 %v1232_v27, %v1232_v27  ;;  %s1579_s4 = smov 12  }
   0x8   :  { %v162_v30 = vpack.c.bf16 %v160_v28, %v160_v28  ;;  %v219_v36 = vld [vmem:[%s1865_s5] sm:$0x3f] }
   0x9   :  { %1295 = vmatmul.mubr.msk.bf16.vlgmr.msra.gmra.mrb[0].mxu0 %vm39_vm2, %v30_v7  ;;  %v220_v37 = vpack.c.bf16 %v219_v36, %v219_v36  ;;  %v1707_v45 = vld [vmem:[%s1866_s6] ss:$0 sm:$0xff] }
   0xa   :  { %1299 = vmatpush3.bf16.msra.mxu0 %v1643_v8  ;;  %1300 = vmatprep.mubr.msk.bf16.mxu0 %vm1575_vm1, %v1574_v2  ;;  %v1673_v31 = vsel %vm43_vm0, %v162_v30, 0 }
   0xb   :  { %1316 = vmatprep.subr.bf16.mxu0 %v1574_v2  ;;  %1305 = vmatpush3.bf16.msra.mxu1 %v1673_v31  ;;  %v1687_v38 = vsel %vm43_vm0, %v220_v37, 0 }
   0xc   :  { %1310 = vmatprep.subr.bf16.mxu1 %v1574_v2 }
  0x15   :  { %1301 = vmatmul.mubr.bf16.vlgmr.msra.gmra.mrb[0].mxu0 %v1576_v9 }
  0x16   :  { %1317 = vmatpush3.bf16.msra.mxu0 %v1638_v6  ;;  %1318 = vmatprep.mubr.msk.bf16.mxu0 %vm1575_vm1, %v1574_v2 }
  0x17   :  { %1322 = vmatprep.subr.bf16.mxu0 %v1574_v2 }
  0x1d   :  { %1319 = vmatmul.mubr.msk.bf16.vlgmr.msra.gmra.mrb[4].mxu0 %vm39_vm2, %v291_v29 }
  0x1e   :  { %1323 = vmatpush3.bf16.msra.mxu0 %v1643_v8  ;;  %1324 = vmatprep.mubr.msk.bf16.mxu0 %vm1575_vm1, %v1574_v2 }
  0x1f   :  { %1340 = vmatprep.subr.bf16.mxu0 %v1574_v2 }
  0xe8   :  { %v129_v11 = vpop.f32.mrb[0].mxu0 }
  0xe9   :  { %v1412_v12 = vadd.f32 %v1657_v10, %v129_v11  ;;  %v1302_v13 = vpop.f32.mrb[1].mxu0 }
  0xea   :  { %v132_v14 = vpop.f32.mrb[2].mxu0 }
  0xeb   :  { %1470 = vtanh.f32 %v1412_v12  ;;  %v1303_v15 = vpop.f32.mrb[3].mxu0  ;;  %v136_v17 = vsub.f32 0.0, %v1412_v12  ;;  %v1237_v14 = vld [vmem:[%s1860_s0 + $0x10] sm:$0xff] }
  0xec   :  { %v521_v15 = vpack.c.bf16 %v1237_v14, %v1237_v14 }
  0xed   :  { %v137_v18 = vmul.f32 1.442695, %v136_v17 }
  0xef   :  { %1472 = vpow2.f32 %v137_v18 }
  0xf5   :  { %v1471_v16 = vpop.eup %1470 }
  0xf6   :  { %145 = vrot.lane.b32.xlu0 %v1471_v16, %s1577_s30 }
  0xf9   :  { %v1473_v19 = vpop.eup %1472 }
  0xfa   :  { %v139_v20 = vadd.f32 1.0, %v1473_v19 }
  0xfc   :  { %1474 = vrcp.f32 %v139_v20 }
 0x106   :  { %v1475_v21 = vpop.eup %1474 }
 0x107   :  { %v143_v24 = vmul.f32 0.0, %v1475_v21 }
 0x168   :  { %v146_v22 = vpop.permute.xlu0 %145 }
 0x169   :  { %v148_v23 = vmul.f32 %v1475_v21, %v146_v22 }
 0x16b   :  { %150 = vrot.lane.b32.xlu0 %v148_v23, %s1578_s3 }
 0x1dd   :  { %v151_v25 = vpop.permute.xlu0 %150 }
 0x1de   :  { %v1662_v26 = vadd.f32 %v151_v25, %v143_v24 }
 0x1e0   :  { %1476 = vtanh.f32 %v1662_v26 }
 0x1ea   :  { %v1477_v32 = vpop.eup %1476 }
 0x1eb   :  { %156 = vrot.lane.b32.xlu1 %v1477_v32, %s1579_s4 }
 0x25d   :  { %v157_v33 = vpop.permute.xlu1 %156 }
 0x25e   :  { %v159_v34 = vmul.f32 %v1475_v21, %v157_v33 }
 0x260   :  { %v161_v35 = vpack.c.bf16 %v159_v34, %v159_v34 }
 0x262   :  { %171 = vrot.lane.b32.xlu1 %v161_v35, %s1580_s12 }
 0x2d4   :  { %v172_v39 = vpop.permute.xlu1 %171 }
 0x2d5   :  { %1307 = vmatmul.mubr.msk.bf16.vlgmr.msra.gmra.mrb[0].mxu1 %vm39_vm2, %v172_v39  ;;  %1325 = vmatmul.mubr.msk.bf16.vlgmr.msra.gmra.mrb[4].mxu0 %vm39_vm2, %v172_v39 }
 0x2d6   :  { %1311 = vmatpush3.bf16.msra.mxu1 %v1687_v38  ;;  %1312 = vmatprep.mubr.msk.bf16.mxu1 %vm1575_vm1, %v1574_v2 }
 0x2d7   :  { %1341 = vmatpush3.bf16.msra.mxu0 %v1638_v6  ;;  %1342 = vmatprep.mubr.msk.bf16.mxu0 %vm1575_vm1, %v1574_v2 }
 0x2d8   :  { %1346 = vmatprep.subr.bf16.mxu0 %v1574_v2  ;;  %1328 = vmatprep.subr.bf16.mxu1 %v1574_v2 }
 0x2dd   :  { %1343 = vmatmul.mubr.msk.bf16.vlgmr.msra.gmra.mrb[8].mxu0 %vm39_vm2, %v521_v15 }
 0x2de   :  { %1347 = vmatpush3.bf16.msra.mxu0 %v1643_v8  ;;  %1348 = vmatprep.mubr.msk.bf16.mxu0 %vm1575_vm1, %v1574_v2 }
 0x2df   :  { %1364 = vmatprep.subr.bf16.mxu0 %v1574_v2 }
 0x2e1   :  { %1313 = vmatmul.mubr.bf16.vlgmr.msra.gmra.mrb[0].mxu1 %v1576_v9 }
 0x2e2   :  { %1329 = vmatpush3.bf16.msra.mxu1 %v1673_v31  ;;  %1330 = vmatprep.mubr.msk.bf16.mxu1 %vm1575_vm1, %v1574_v2 }
 0x2e3   :  { %1334 = vmatprep.subr.bf16.mxu1 %v1574_v2 }
 0x3a8   :  { %v369_v40 = vpop.f32.mrb[4].mxu0 }
 0x3a9   :  { %v1414_v41 = vadd.f32 %v1657_v10, %v369_v40  ;;  %v1326_v42 = vpop.f32.mrb[5].mxu0 }
 0x3aa   :  { %v372_v43 = vpop.f32.mrb[6].mxu0 }
 0x3ab   :  { %1478 = vtanh.f32 %v1414_v41  ;;  %v1327_v44 = vpop.f32.mrb[7].mxu0  ;;  %v376_v53 = vsub.f32 0.0, %v1414_v41 }
 0x3ad   :  { %v377_v54 = vmul.f32 1.442695, %v376_v53 }
 0x3b4   :  { %v258_v46 = vpop.f32.mrb[0].mxu1 }
 0x3b5   :  { %v1479_v47 = vpop.eup %1478  ;;  %v1413_v48 = vadd.f32 %v1707_v45, %v258_v46  ;;  %v1314_v49 = vpop.f32.mrb[1].mxu1 }
 0x3b6   :  { %v261_v50 = vpop.f32.mrb[2].mxu1  ;;  %385 = vrot.lane.b32.xlu0 %v1479_v47, %s1577_s30 }
 0x3b7   :  { %1480 = vtanh.f32 %v1413_v48  ;;  %v1315_v51 = vpop.f32.mrb[3].mxu1  ;;  %v265_v55 = vsub.f32 0.0, %v1413_v48 }
 0x3b8   :  { %1482 = vpow2.f32 %v377_v54 }
 0x3b9   :  { %v266_v56 = vmul.f32 1.442695, %v265_v55 }
 0x3bb   :  { %1484 = vpow2.f32 %v266_v56 }
 0x3c1   :  { %v1481_v52 = vpop.eup %1480 }
 0x3c2   :  { %274 = vrot.lane.b32.xlu1 %v1481_v52, %s1577_s30  ;;  %v1483_v57 = vpop.eup %1482 }
 0x3c3   :  { %v379_v58 = vadd.f32 1.0, %v1483_v57 }
 0x3c5   :  { %1486 = vrcp.f32 %v379_v58  ;;  %v1485_v59 = vpop.eup %1484 }
 0x3c6   :  { %v268_v60 = vadd.f32 1.0, %v1485_v59 }
 0x3c8   :  { %1488 = vrcp.f32 %v268_v60 }
 0x3cf   :  { %v1487_v61 = vpop.eup %1486 }
 0x3d0   :  { %v383_v4 = vmul.f32 %v1487_v61, %v1662_v26 }
 0x3d2   :  { %v1489_v0 = vpop.eup %1488 }
 0x3d3   :  { %v272_v9 = vmul.f32 0.0, %v1489_v0 }
 0x428   :  { %v386_v62 = vpop.permute.xlu0 %385 }
 0x429   :  { %v388_v63 = vmul.f32 %v1487_v61, %v386_v62 }
 0x42b   :  { %390 = vrot.lane.b32.xlu0 %v388_v63, %s1578_s3 }
 0x434   :  { %v275_v1 = vpop.permute.xlu1 %274 }
 0x435   :  { %v277_v3 = vmul.f32 %v1489_v0, %v275_v1 }
 0x437   :  { %279 = vrot.lane.b32.xlu1 %v277_v3, %s1578_s3 }
 0x49d   :  { %v391_v5 = vpop.permute.xlu0 %390 }
 0x49e   :  { %v1715_v7 = vadd.f32 %v391_v5, %v383_v4 }
 0x4a0   :  { %1490 = vtanh.f32 %v1715_v7 }
 0x4a9   :  { %v280_v11 = vpop.permute.xlu1 %279 }
 0x4aa   :  { %v1491_v12 = vpop.eup %1490  ;;  %v1718_v13 = vadd.f32 %v280_v11, %v272_v9 }
 0x4ab   :  { %396 = vrot.lane.b32.xlu0 %v1491_v12, %s1579_s4 }
 0x4ac   :  { %1492 = vtanh.f32 %v1718_v13 }
 0x4b6   :  { %v1493_v16 = vpop.eup %1492 }
 0x4b7   :  { %285 = vrot.lane.b32.xlu1 %v1493_v16, %s1579_s4 }
 0x51d   :  { %v397_v17 = vpop.permute.xlu0 %396 }
 0x51e   :  { %v399_v18 = vmul.f32 %v1487_v61, %v397_v17  ;;  %v1242_v61 = vld [vmem:[%s1860_s0 + $0x18] sm:$0xff] }
 0x51f   :  { %v751_v62 = vpack.c.bf16 %v1242_v61, %v1242_v61 }
 0x520   :  { %v400_v19 = vpack.c.bf16 %v399_v18, %v399_v18 }
 0x522   :  { %402 = vrot.lane.b32.xlu0 %v400_v19, %s1580_s12 }
 0x529   :  { %v286_v20 = vpop.permute.xlu1 %285 }
 0x52a   :  { %v288_v21 = vmul.f32 %v1489_v0, %v286_v20 }
 0x52c   :  { %v447_v22 = vpack.c.bf16 %v288_v21, %v288_v21 }
 0x52e   :  { %449 = vrot.lane.b32.xlu1 %v447_v22, %s1580_s12 }
 0x594   :  { %v403_v23 = vpop.permute.xlu0 %402 }
 0x595   :  { %1331 = vmatmul.mubr.msk.bf16.vlgmr.msra.gmra.mrb[4].mxu1 %vm39_vm2, %v403_v23  ;;  %1349 = vmatmul.mubr.msk.bf16.vlgmr.msra.gmra.mrb[8].mxu0 %vm39_vm2, %v403_v23 }
 0x596   :  { %1335 = vmatpush3.bf16.msra.mxu1 %v1687_v38  ;;  %1336 = vmatprep.mubr.msk.bf16.mxu1 %vm1575_vm1, %v1574_v2 }
 0x597   :  { %1365 = vmatpush3.bf16.msra.mxu0 %v1638_v6  ;;  %1366 = vmatprep.mubr.msk.bf16.mxu0 %vm1575_vm1, %v1574_v2 }
 0x598   :  { %1370 = vmatprep.subr.bf16.mxu0 %v1574_v2  ;;  %1352 = vmatprep.subr.bf16.mxu1 %v1574_v2 }
 0x59d   :  { %1367 = vmatmul.mubr.msk.bf16.vlgmr.msra.gmra.mrb[12].mxu0 %vm39_vm2, %v751_v62 }
 0x59e   :  { %1371 = vmatpush3.bf16.msra.mxu0 %v1643_v8  ;;  %1372 = vmatprep.mubr.msk.bf16.mxu0 %vm1575_vm1, %v1574_v2 }
 0x59f   :  { %1388 = vmatprep.subr.bf16.mxu0 %v1574_v2 }
 0x5a0   :  { %v450_v24 = vpop.permute.xlu1 %449 }
 0x5a1   :  { %1337 = vmatmul.mubr.msk.bf16.vlgmr.msra.gmra.mrb[4].mxu1 %vm39_vm2, %v450_v24 }
 0x5a2   :  { %1353 = vmatpush3.bf16.msra.mxu1 %v1673_v31  ;;  %1354 = vmatprep.mubr.msk.bf16.mxu1 %vm1575_vm1, %v1574_v2 }
 0x5a3   :  { %1358 = vmatprep.subr.bf16.mxu1 %v1574_v2 }
 0x668   :  { %v599_v25 = vpop.f32.mrb[8].mxu0 }
 0x669   :  { %v1416_v26 = vadd.f32 %v1657_v10, %v599_v25  ;;  %v1350_v27 = vpop.f32.mrb[9].mxu0 }
 0x66a   :  { %v602_v28 = vpop.f32.mrb[10].mxu0 }
 0x66b   :  { %1494 = vtanh.f32 %v1416_v26  ;;  %v1351_v29 = vpop.f32.mrb[11].mxu0  ;;  %v606_v39 = vsub.f32 0.0, %v1416_v26 }
 0x66d   :  { %v607_v40 = vmul.f32 1.442695, %v606_v39 }
 0x674   :  { %v488_v30 = vpop.f32.mrb[4].mxu1 }
 0x675   :  { %v1495_v32 = vpop.eup %1494  ;;  %v1415_v33 = vadd.f32 %v1707_v45, %v488_v30  ;;  %v1338_v34 = vpop.f32.mrb[5].mxu1 }
 0x676   :  { %v491_v35 = vpop.f32.mrb[6].mxu1  ;;  %615 = vrot.lane.b32.xlu0 %v1495_v32, %s1577_s30 }
 0x677   :  { %1496 = vtanh.f32 %v1415_v33  ;;  %v1339_v36 = vpop.f32.mrb[7].mxu1  ;;  %v495_v41 = vsub.f32 0.0, %v1415_v33 }
 0x678   :  { %1498 = vpow2.f32 %v607_v40 }
 0x679   :  { %v496_v42 = vmul.f32 1.442695, %v495_v41 }
 0x67b   :  { %1500 = vpow2.f32 %v496_v42 }
 0x681   :  { %v1497_v37 = vpop.eup %1496 }
 0x682   :  { %504 = vrot.lane.b32.xlu1 %v1497_v37, %s1577_s30  ;;  %v1499_v43 = vpop.eup %1498 }
 0x683   :  { %v609_v44 = vadd.f32 1.0, %v1499_v43 }
 0x685   :  { %1502 = vrcp.f32 %v609_v44  ;;  %v1501_v46 = vpop.eup %1500 }
 0x686   :  { %v498_v47 = vadd.f32 1.0, %v1501_v46 }
 0x688   :  { %1504 = vrcp.f32 %v498_v47  ;;  %v1247_v47 = vld [vmem:[%s1860_s0 + $0x20] sm:$0xff]  ;;  %s1581_s0 = smov [#allocation2]  }
 0x689   :  { %s1220_s21 = sshll.u32 %s1581_s0, 4  ;;  %s1221_s21 = int_to_ptr.vmem [resolvable:$true] %s1220_s21 }
 0x68a   :  { %s1550_s22 = scalar_lea.vmem %s1221_s21, 128  ;;  %p1555_p1 = scmp.lt.s32.totalorder %s1221_s21, %s1221_s21 }
 0x68b   :  { %p1551_p0 = scmp.ne.s32.totalorder %s1221_s21, %s1550_s22  ;;  %p1556_p2 = scmp.lt.s32.totalorder %s1550_s22, %s1550_s22 }
 0x68d   :  { %p1557_p3 = por %p1556_p2, %p1555_p1 }
 0x68f   :  { %v1503_v48 = vpop.eup %1502  ;;  %p1558_p4 = pnand %p1557_p3, %p1551_p0 }
 0x690   :  { %v613_v54 = vmul.f32 %v1503_v48, %v1715_v7 }
 0x692   :  { %v1505_v51 = vpop.eup %1504 }
 0x693   :  { %v502_v57 = vmul.f32 %v1505_v51, %v1718_v13 }
 0x6e8   :  { %v616_v49 = vpop.permute.xlu0 %615 }
 0x6e9   :  { %v618_v50 = vmul.f32 %v1503_v48, %v616_v49 }
 0x6eb   :  { %620 = vrot.lane.b32.xlu0 %v618_v50, %s1578_s3 }
 0x6f4   :  { %v505_v52 = vpop.permute.xlu1 %504 }
 0x6f5   :  { %v507_v53 = vmul.f32 %v1505_v51, %v505_v52 }
 0x6f7   :  { %509 = vrot.lane.b32.xlu1 %v507_v53, %s1578_s3 }
 0x75d   :  { %v621_v55 = vpop.permute.xlu0 %620 }
 0x75e   :  { %v1755_v56 = vadd.f32 %v621_v55, %v613_v54 }
 0x760   :  { %1506 = vtanh.f32 %v1755_v56 }
 0x769   :  { %v510_v58 = vpop.permute.xlu1 %509 }
 0x76a   :  { %v1507_v59 = vpop.eup %1506  ;;  %v1759_v60 = vadd.f32 %v510_v58, %v502_v57 }
 0x76b   :  { %626 = vrot.lane.b32.xlu0 %v1507_v59, %s1579_s4 }
 0x76c   :  { %1508 = vtanh.f32 %v1759_v60 }
 0x776   :  { %v1509_v63 = vpop.eup %1508 }
 0x777   :  { %515 = vrot.lane.b32.xlu1 %v1509_v63, %s1579_s4 }
 0x7dd   :  { %v627_v0 = vpop.permute.xlu0 %626 }
 0x7de   :  { %v629_v1 = vmul.f32 %v1503_v48, %v627_v0  ;;  %v981_v48 = vpack.c.bf16 %v1247_v47, %v1247_v47 }
 0x7e0   :  { %v630_v3 = vpack.c.bf16 %v629_v1, %v629_v1 }
 0x7e2   :  { %632 = vrot.lane.b32.xlu0 %v630_v3, %s1580_s12 }
 0x7e9   :  { %v516_v4 = vpop.permute.xlu1 %515 }
 0x7ea   :  { %v518_v5 = vmul.f32 %v1505_v51, %v516_v4 }
 0x7ec   :  { %v677_v7 = vpack.c.bf16 %v518_v5, %v518_v5 }
 0x7ee   :  { %679 = vrot.lane.b32.xlu1 %v677_v7, %s1580_s12 }
 0x854   :  { %v633_v9 = vpop.permute.xlu0 %632 }
 0x855   :  { %1355 = vmatmul.mubr.msk.bf16.vlgmr.msra.gmra.mrb[8].mxu1 %vm39_vm2, %v633_v9  ;;  %1373 = vmatmul.mubr.msk.bf16.vlgmr.msra.gmra.mrb[12].mxu0 %vm39_vm2, %v633_v9 }
 0x856   :  { %1359 = vmatpush3.bf16.msra.mxu1 %v1687_v38  ;;  %1360 = vmatprep.mubr.msk.bf16.mxu1 %vm1575_vm1, %v1574_v2 }
 0x857   :  { %1389 = vmatpush3.bf16.msra.mxu0 %v1638_v6  ;;  %1390 = vmatprep.mubr.msk.bf16.mxu0 %vm1575_vm1, %v1574_v2 }
 0x858   :  { %1394 = vmatprep.subr.bf16.mxu0 %v1574_v2  ;;  %1376 = vmatprep.subr.bf16.mxu1 %v1574_v2 }
 0x85d   :  { %1391 = vmatmul.mubr.msk.bf16.vlgmr.msra.gmra.mrb[16].mxu0 %vm39_vm2, %v981_v48 }
 0x85e   :  { %1395 = vmatpush3.bf16.msra.mxu0 %v1643_v8  ;;  %1396 = vmatprep.mubr.msk.bf16.mxu0 %vm1575_vm1, %v1574_v2 }
 0x860   :  { %v680_v11 = vpop.permute.xlu1 %679 }
 0x861   :  { %1361 = vmatmul.mubr.msk.bf16.vlgmr.msra.gmra.mrb[8].mxu1 %vm39_vm2, %v680_v11 }
 0x862   :  { %1377 = vmatpush3.bf16.msra.mxu1 %v1673_v31  ;;  %1378 = vmatprep.mubr.msk.bf16.mxu1 %vm1575_vm1, %v1574_v2 }
 0x863   :  { %1382 = vmatprep.subr.bf16.mxu1 %v1574_v2 }
 0x928   :  { %v829_v12 = vpop.f32.mrb[12].mxu0 }
 0x929   :  { %v1418_v6 = vadd.f32 %v1657_v10, %v829_v12  ;;  %v1374_v13 = vpop.f32.mrb[13].mxu0 }
 0x92a   :  { %v832_v14 = vpop.f32.mrb[14].mxu0 }
 0x92b   :  { %1510 = vtanh.f32 %v1418_v6  ;;  %v1375_v15 = vpop.f32.mrb[15].mxu0  ;;  %v836_v23 = vsub.f32 0.0, %v1418_v6 }
 0x92d   :  { %v837_v24 = vmul.f32 1.442695, %v836_v23 }
 0x934   :  { %v718_v16 = vpop.f32.mrb[8].mxu1 }
 0x935   :  { %v1511_v17 = vpop.eup %1510  ;;  %v1417_v18 = vadd.f32 %v1707_v45, %v718_v16  ;;  %v1362_v19 = vpop.f32.mrb[9].mxu1 }
 0x936   :  { %v721_v20 = vpop.f32.mrb[10].mxu1  ;;  %845 = vrot.lane.b32.xlu0 %v1511_v17, %s1577_s30 }
 0x937   :  { %1512 = vtanh.f32 %v1417_v18  ;;  %v1363_v21 = vpop.f32.mrb[11].mxu1  ;;  %v725_v25 = vsub.f32 0.0, %v1417_v18 }
 0x938   :  { %1514 = vpow2.f32 %v837_v24 }
 0x939   :  { %v726_v26 = vmul.f32 1.442695, %v725_v25 }
 0x93b   :  { %1516 = vpow2.f32 %v726_v26 }
 0x941   :  { %v1513_v22 = vpop.eup %1512 }
 0x942   :  { %734 = vrot.lane.b32.xlu1 %v1513_v22, %s1577_s30  ;;  %v1515_v27 = vpop.eup %1514 }
 0x943   :  { %v839_v28 = vadd.f32 1.0, %v1515_v27 }
 0x945   :  { %1518 = vrcp.f32 %v839_v28  ;;  %v1517_v29 = vpop.eup %1516 }
 0x946   :  { %v728_v30 = vadd.f32 1.0, %v1517_v29 }
 0x948   :  { %1520 = vrcp.f32 %v728_v30 }
 0x94f   :  { %v1519_v32 = vpop.eup %1518 }
 0x950   :  { %v843_v39 = vmul.f32 %v1519_v32, %v1755_v56 }
 0x952   :  { %v1521_v35 = vpop.eup %1520 }
 0x953   :  { %v732_v42 = vmul.f32 %v1521_v35, %v1759_v60 }
 0x9a8   :  { %v846_v33 = vpop.permute.xlu0 %845 }
 0x9a9   :  { %v848_v34 = vmul.f32 %v1519_v32, %v846_v33 }
 0x9ab   :  { %850 = vrot.lane.b32.xlu0 %v848_v34, %s1578_s3 }
 0x9b4   :  { %v735_v36 = vpop.permute.xlu1 %734 }
 0x9b5   :  { %v737_v37 = vmul.f32 %v1521_v35, %v735_v36 }
 0x9b7   :  { %739 = vrot.lane.b32.xlu1 %v737_v37, %s1578_s3 }
 0xa1d   :  { %v851_v40 = vpop.permute.xlu0 %850 }
 0xa1e   :  { %v1796_v41 = vadd.f32 %v851_v40, %v843_v39 }
 0xa20   :  { %1522 = vtanh.f32 %v1796_v41 }
 0xa29   :  { %v740_v43 = vpop.permute.xlu1 %739 }
 0xa2a   :  { %v1523_v44 = vpop.eup %1522  ;;  %v1800_v46 = vadd.f32 %v740_v43, %v732_v42 }
 0xa2b   :  { %856 = vrot.lane.b32.xlu0 %v1523_v44, %s1579_s4 }
 0xa2c   :  { %1524 = vtanh.f32 %v1800_v46 }
 0xa36   :  { %v1525_v49 = vpop.eup %1524 }
 0xa37   :  { %745 = vrot.lane.b32.xlu1 %v1525_v49, %s1579_s4 }
 0xa9d   :  { %v857_v50 = vpop.permute.xlu0 %856 }
 0xa9e   :  { %v859_v51 = vmul.f32 %v1519_v32, %v857_v50 }
 0xaa0   :  { %v860_v52 = vpack.c.bf16 %v859_v51, %v859_v51 }
 0xaa2   :  { %862 = vrot.lane.b32.xlu0 %v860_v52, %s1580_s12 }
 0xaa9   :  { %v746_v53 = vpop.permute.xlu1 %745 }
 0xaaa   :  { %v748_v54 = vmul.f32 %v1521_v35, %v746_v53 }
 0xaac   :  { %v907_v55 = vpack.c.bf16 %v748_v54, %v748_v54 }
 0xaae   :  { %909 = vrot.lane.b32.xlu1 %v907_v55, %s1580_s12 }
 0xb14   :  { %v863_v56 = vpop.permute.xlu0 %862 }
 0xb15   :  { %1379 = vmatmul.mubr.msk.bf16.vlgmr.msra.gmra.mrb[12].mxu1 %vm39_vm2, %v863_v56  ;;  %1397 = vmatmul.mubr.msk.bf16.vlgmr.msra.gmra.mrb[16].mxu0 %vm39_vm2, %v863_v56 }
 0xb16   :  { %1383 = vmatpush3.bf16.msra.mxu1 %v1687_v38  ;;  %1384 = vmatprep.mubr.msk.bf16.mxu1 %vm1575_vm1, %v1574_v2 }
 0xb17   :  { %1400 = vmatprep.subr.bf16.mxu1 %v1574_v2 }
 0xb20   :  { %v910_v8 = vpop.permute.xlu1 %909 }
 0xb21   :  { %1385 = vmatmul.mubr.msk.bf16.vlgmr.msra.gmra.mrb[12].mxu1 %vm39_vm2, %v910_v8 }
 0xb22   :  { %1401 = vmatpush3.bf16.msra.mxu1 %v1673_v31  ;;  %1402 = vmatprep.mubr.msk.bf16.mxu1 %vm1575_vm1, %v1574_v2 }
 0xb23   :  { %1406 = vmatprep.subr.bf16.mxu1 %v1574_v2 }
 0xbe8   :  { %v1059_v57 = vpop.f32.mrb[16].mxu0 }
 0xbe9   :  { %v1420_v58 = vadd.f32 %v1657_v10, %v1059_v57  ;;  %v1398_v59 = vpop.f32.mrb[17].mxu0 }
 0xbea   :  { %v1062_v60 = vpop.f32.mrb[18].mxu0 }
 0xbeb   :  { %1526 = vtanh.f32 %v1420_v58  ;;  %v1399_v61 = vpop.f32.mrb[19].mxu0  ;;  %v1066_v5 = vsub.f32 0.0, %v1420_v58 }
 0xbed   :  { %v1067_v7 = vmul.f32 1.442695, %v1066_v5 }
 0xbf4   :  { %v948_v62 = vpop.f32.mrb[12].mxu1 }
 0xbf5   :  { %v1527_v63 = vpop.eup %1526  ;;  %v1419_v0 = vadd.f32 %v1707_v45, %v948_v62  ;;  %v1386_v1 = vpop.f32.mrb[13].mxu1 }
 0xbf6   :  { %v951_v3 = vpop.f32.mrb[14].mxu1  ;;  %1075 = vrot.lane.b32.xlu0 %v1527_v63, %s1577_s30 }
 0xbf7   :  { %1528 = vtanh.f32 %v1419_v0  ;;  %v1387_v31 = vpop.f32.mrb[15].mxu1  ;;  %v955_v10 = vsub.f32 0.0, %v1419_v0 }
 0xbf8   :  { %1530 = vpow2.f32 %v1067_v7 }
 0xbf9   :  { %v956_v9 = vmul.f32 1.442695, %v955_v10 }
 0xbfb   :  { %1532 = vpow2.f32 %v956_v9 }
 0xc01   :  { %v1529_v4 = vpop.eup %1528 }
 0xc02   :  { %964 = vrot.lane.b32.xlu1 %v1529_v4, %s1577_s30  ;;  %v1531_v11 = vpop.eup %1530 }
 0xc03   :  { %v1069_v12 = vadd.f32 1.0, %v1531_v11 }
 0xc05   :  { %1534 = vrcp.f32 %v1069_v12  ;;  %v1533_v6 = vpop.eup %1532 }
 0xc06   :  { %v958_v13 = vadd.f32 1.0, %v1533_v6 }
 0xc08   :  { %1536 = vrcp.f32 %v958_v13 }
 0xc0f   :  { %v1535_v14 = vpop.eup %1534 }
 0xc10   :  { %v1073_v20 = vmul.f32 %v1535_v14, %v1796_v41 }
 0xc12   :  { %v1537_v17 = vpop.eup %1536 }
 0xc13   :  { %v962_v23 = vmul.f32 %v1537_v17, %v1800_v46 }
 0xc68   :  { %v1076_v15 = vpop.permute.xlu0 %1075 }
 0xc69   :  { %v1078_v16 = vmul.f32 %v1535_v14, %v1076_v15 }
 0xc6b   :  { %1080 = vrot.lane.b32.xlu0 %v1078_v16, %s1578_s3 }
 0xc74   :  { %v965_v18 = vpop.permute.xlu1 %964 }
 0xc75   :  { %v967_v19 = vmul.f32 %v1537_v17, %v965_v18 }
 0xc77   :  { %969 = vrot.lane.b32.xlu1 %v967_v19, %s1578_s3 }
 0xcdd   :  { %v1081_v21 = vpop.permute.xlu0 %1080 }
 0xcde   :  { %v1083_v22 = vadd.f32 %v1081_v21, %v1073_v20 }
 0xce0   :  { %1538 = vtanh.f32 %v1083_v22 }
 0xce9   :  { %v970_v24 = vpop.permute.xlu1 %969 }
 0xcea   :  { %v1539_v25 = vpop.eup %1538  ;;  %v972_v26 = vadd.f32 %v970_v24, %v962_v23 }
 0xceb   :  { %1086 = vrot.lane.b32.xlu0 %v1539_v25, %s1579_s4 }
 0xcec   :  { %1540 = vtanh.f32 %v972_v26 }
 0xcf6   :  { %v1541_v27 = vpop.eup %1540 }
 0xcf7   :  { %975 = vrot.lane.b32.xlu1 %v1541_v27, %s1579_s4 }
 0xd5d   :  { %v1087_v28 = vpop.permute.xlu0 %1086 }
 0xd5e   :  { %v1089_v29 = vmul.f32 %v1535_v14, %v1087_v28 }
 0xd60   :  { %v1090_v30 = vpack.c.bf16 %v1089_v29, %v1089_v29 }
 0xd62   :  { %1092 = vrot.lane.b32.xlu0 %v1090_v30, %s1580_s12 }
 0xd69   :  { %v976_v32 = vpop.permute.xlu1 %975 }
 0xd6a   :  { %v978_v33 = vmul.f32 %v1537_v17, %v976_v32 }
 0xd6c   :  { %v1137_v34 = vpack.c.bf16 %v978_v33, %v978_v33 }
 0xd6e   :  { %1139 = vrot.lane.b32.xlu1 %v1137_v34, %s1580_s12 }
 0xdd4   :  { %v1093_v35 = vpop.permute.xlu0 %1092 }
 0xdd5   :  { %1403 = vmatmul.mubr.msk.bf16.vlgmr.msra.gmra.mrb[16].mxu1 %vm39_vm2, %v1093_v35 }
 0xdd6   :  { %1407 = vmatpush3.bf16.msra.mxu1 %v1687_v38  ;;  %1408 = vmatprep.mubr.msk.bf16.mxu1 %vm1575_vm1, %v1574_v2 }
 0xde0   :  { %v1140_v36 = vpop.permute.xlu1 %1139 }
 0xde1   :  { %1409 = vmatmul.mubr.msk.bf16.vlgmr.msra.gmra.mrb[16].mxu1 %vm39_vm2, %v1140_v36 }
 0xeb4   :  { %v1178_v37 = vpop.f32.mrb[16].mxu1 }
 0xeb5   :  { %v1421_v39 = vadd.f32 %v1707_v45, %v1178_v37  ;;  %v1410_v40 = vpop.f32.mrb[17].mxu1 }
 0xeb6   :  { %v1181_v41 = vpop.f32.mrb[18].mxu1 }
 0xeb7   :  { %1542 = vtanh.f32 %v1421_v39  ;;  %v1411_v42 = vpop.f32.mrb[19].mxu1  ;;  %v1185_v44 = vsub.f32 0.0, %v1421_v39 }
 0xeb9   :  { %v1186_v46 = vmul.f32 1.442695, %v1185_v44 }
 0xebb   :  { %1544 = vpow2.f32 %v1186_v46 }
 0xec1   :  { %v1543_v43 = vpop.eup %1542 }
 0xec2   :  { %1194 = vrot.lane.b32.xlu0 %v1543_v43, %s1577_s30 }
 0xec5   :  { %v1545_v38 = vpop.eup %1544 }
 0xec6   :  { %v1188_v47 = vadd.f32 1.0, %v1545_v38 }
 0xec8   :  { %1546 = vrcp.f32 %v1188_v47 }
 0xed2   :  { %v1547_v2 = vpop.eup %1546 }
 0xed3   :  { %v1192_v50 = vmul.f32 %v1547_v2, %v972_v26 }
 0xf34   :  { %v1195_v48 = vpop.permute.xlu0 %1194 }
 0xf35   :  { %v1197_v49 = vmul.f32 %v1547_v2, %v1195_v48 }
 0xf37   :  { %1199 = vrot.lane.b32.xlu1 %v1197_v49, %s1578_s3 }
 0xfa9   :  { %v1200_v45 = vpop.permute.xlu1 %1199 }
 0xfaa   :  { %v1202_v51 = vadd.f32 %v1200_v45, %v1192_v50 }
 0xfac   :  { %1548 = vtanh.f32 %v1202_v51 }
 0xfb6   :  { %v1549_v52 = vpop.eup %1548 }
 0xfb7   :  { %1205 = vrot.lane.b32.xlu0 %v1549_v52, %s1579_s4 }
0x1029   :  { %v1206_v53 = vpop.permute.xlu0 %1205 }
0x102a   :  { %v1208_v54 = vmul.f32 %v1547_v2, %v1206_v53 }
0x102c   :  { %1210 = vrot.lane.b32.xlu1 %v1208_v54, %s1580_s12 }
0x109e   :  { %v1211_v55 = vpop.permute.xlu1 %1210 }
0x109f   :  { %1213 = vst.msk [vmem:[#allocation2] sm:$0xff] %vm39_vm2, %v1211_v55 }
0x10a0   :  { %1561 = shalt.err (!%p1558_p4)
}
0x10a1   :  { %s1562_s25 = scalar_lea.hbm %s1867_s7, 128 }
0x10a2   :  { %p1563_p5 = scmp.ne.s32.totalorder %s1867_s7, %s1562_s25  ;;  %p1566_p6 = scmp.lt.u32.totalorder %s1562_s25, %s1867_s7 }
0x10a4   :  { %p1568_p7 = pnand %p1566_p6, %p1563_p5 }
0x10a6   :  { %1571 = shalt.err (!%p1568_p7)
}
0x10a7   :  { %1223 = dma.vmem_to_hbm [thread:$0]  %s1221_s21, 128, %s1867_s7, [#allocation3]  }
0x10a8   :  { %1572 = dma.done.wait [#allocation3], 128  }
0x10a9   :  { %1573 = vsyncadd [#allocation3], 4294967168 }
0x10aa   :  { %1227 = vsyncpa [#allocation3], 1 }

// kernel: vinet_forward.9
= control target key start
LH: loop header
LB: loop body
LE: loop exit
PB: predicated region body
PF: predicated region fallthrough
CT: control target
= control target key end

     0   :  { %v234_v0 = vmov 0.0   ;;  %vm235_vm0 = vmmov 0   ;;  %vm166_vm1 = vcmask 48128   ;;  %s392_s1 = inlined_call_operand.vmem [shape: f32[128,128], index: 1, kind: input, shape index: {}]   ;;  %s393_s3 = inlined_call_operand.vmem [shape: f32[128,6], index: 3, kind: input, shape index: {}]   ;;  %s394_s0 = inlined_call_operand.vmem [shape: f32[8,128], index: 0, kind: input, shape index: {}]   ;;  %s395_s2 = inlined_call_operand.vmem [shape: f32[1,128], index: 2, kind: input, shape index: {}]   ;;  %s396_s4 = inlined_call_operand.vmem [shape: f32[1,6], index: 4, kind: input, shape index: {}]   ;;  %s397_s5 = inlined_call_operand.vmem [shape: f32[8,6], index: 5, kind: output, shape index: {}]  }
   0x1   :  { %192 = vmatprep.subr.bf16.mxu0 %v234_v0  ;;  %v22_v1 = vld [vmem:[%s392_s1] sm:$0xff]  ;;  %v23_v2 = vld [vmem:[%s392_s1 + $0x8] sm:$0xff]  ;;  %v24_v3 = vld [vmem:[%s392_s1 + $0x10] sm:$0xff]  ;;  %208 = vmatprep.mubr.msk.bf16.mxu0 %vm235_vm0, %v234_v0 }
   0x2   :  { %v39_v4 = vpack.c.bf16 %v23_v2, %v22_v1  ;;  %v25_v5 = vld [vmem:[%s392_s1 + $0x18] sm:$0xff]  ;;  %212 = vmatprep.subr.bf16.mxu1 %v234_v0  ;;  %228 = vmatprep.mubr.msk.bf16.mxu1 %vm235_vm0, %v234_v0  ;;  %v26_v7 = vld [vmem:[%s392_s1 + $0x20] sm:$0xff]  ;;  %v27_v8 = vld [vmem:[%s392_s1 + $0x28] sm:$0xff] }
   0x3   :  { %v40_v6 = vpack.c.bf16 %v25_v5, %v24_v3  ;;  %v94_v9 = vld [vmem:[%s393_s3] sm:$0xff]  ;;  %v95_v10 = vld [vmem:[%s393_s3 + $0x8] sm:$0xff]  ;;  %v96_v11 = vld [vmem:[%s393_s3 + $0x10] sm:$0xff]  ;;  %v41_v13 = vpack.c.bf16 %v27_v8, %v26_v7 }
   0x4   :  { %193 = vmatpush3.bf16.msra.mxu0 %v39_v4  ;;  %v97_v12 = vld [vmem:[%s393_s3 + $0x18] sm:$0xff]  ;;  %v111_v14 = vpack.c.bf16 %v95_v10, %v94_v9  ;;  %v28_v15 = vld [vmem:[%s392_s1 + $0x30] sm:$0xff]  ;;  %v98_v18 = vld [vmem:[%s393_s3 + $0x20] sm:$0xff] }
   0x5   :  { %194 = vmatprep.subr.bf16.mxu0 %v234_v0  ;;  %v29_v16 = vld [vmem:[%s392_s1 + $0x38] sm:$0xff]  ;;  %v112_v17 = vpack.c.bf16 %v97_v12, %v96_v11  ;;  %v99_v19 = vld [vmem:[%s393_s3 + $0x28] sm:$0xff]  ;;  %v30_v21 = vld [vmem:[%s392_s1 + $0x40] sm:$0xff] }
   0x6   :  { %213 = vmatpush3.bf16.msra.mxu1 %v111_v14  ;;  %v42_v20 = vpack.c.bf16 %v29_v16, %v28_v15  ;;  %v31_v22 = vld [vmem:[%s392_s1 + $0x48] sm:$0xff]  ;;  %v113_v23 = vpack.c.bf16 %v99_v19, %v98_v18  ;;  %v100_v24 = vld [vmem:[%s393_s3 + $0x30] sm:$0xff]  ;;  %v101_v25 = vld [vmem:[%s393_s3 + $0x38] sm:$0xff] }
   0x7   :  { %214 = vmatprep.subr.bf16.mxu1 %v234_v0  ;;  %v43_v26 = vpack.c.bf16 %v31_v22, %v30_v21  ;;  %v32_v27 = vld [vmem:[%s392_s1 + $0x50] sm:$0xff]  ;;  %v33_v28 = vld [vmem:[%s392_s1 + $0x58] sm:$0xff]  ;;  %v114_v29 = vpack.c.bf16 %v101_v25, %v100_v24  ;;  %v102_v30 = vld [vmem:[%s393_s3 + $0x40] sm:$0xff] }
   0x8   :  { %195 = vmatpush3.bf16.msra.mxu0 %v40_v6  ;;  %v103_v31 = vld [vmem:[%s393_s3 + $0x48] sm:$0xff]  ;;  %v44_v32 = vpack.c.bf16 %v33_v28, %v32_v27  ;;  %v34_v33 = vld [vmem:[%s392_s1 + $0x60] sm:$0xff]  ;;  %v104_v36 = vld [vmem:[%s393_s3 + $0x50] sm:$0xff] }
   0x9   :  { %196 = vmatprep.subr.bf16.mxu0 %v234_v0  ;;  %v35_v34 = vld [vmem:[%s392_s1 + $0x68] sm:$0xff]  ;;  %v115_v35 = vpack.c.bf16 %v103_v31, %v102_v30  ;;  %v105_v37 = vld [vmem:[%s393_s3 + $0x58] sm:$0xff]  ;;  %v36_v39 = vld [vmem:[%s392_s1 + $0x70] sm:$0xff] }
   0xa   :  { %215 = vmatpush3.bf16.msra.mxu1 %v112_v17  ;;  %v45_v38 = vpack.c.bf16 %v35_v34, %v34_v33  ;;  %v37_v40 = vld [vmem:[%s392_s1 + $0x78] sm:$0xff]  ;;  %v116_v41 = vpack.c.bf16 %v105_v37, %v104_v36  ;;  %v106_v42 = vld [vmem:[%s393_s3 + $0x60] sm:$0xff]  ;;  %v107_v43 = vld [vmem:[%s393_s3 + $0x68] sm:$0xff] }
   0xb   :  { %216 = vmatprep.subr.bf16.mxu1 %v234_v0  ;;  %v46_v44 = vpack.c.bf16 %v37_v40, %v36_v39  ;;  %v21_v45 = vld [vmem:[%s394_s0] sm:$0xff]  ;;  %v117_v46 = vpack.c.bf16 %v107_v43, %v106_v42  ;;  %v108_v48 = vld [vmem:[%s393_s3 + $0x70] sm:$0xff]  ;;  %v109_v49 = vld [vmem:[%s393_s3 + $0x78] sm:$0xff] }
   0xc   :  { %197 = vmatpush3.bf16.msra.mxu0 %v41_v13  ;;  %v38_v47 = vpack.c.bf16 %v21_v45, %v21_v45  ;;  %v118_v50 = vpack.c.bf16 %v109_v49, %v108_v48  ;;  %v172_v51 = vld [vmem:[%s395_s2] ss:$0 sm:$0xff] }
   0xd   :  { %198 = vmatprep.subr.bf16.mxu0 %v234_v0  ;;  %v173_v58 = vld [vmem:[%s396_s4] ss:$0 sm:$0xff] }
   0xe   :  { %217 = vmatpush3.bf16.msra.mxu1 %v113_v23 }
   0xf   :  { %218 = vmatprep.subr.bf16.mxu1 %v234_v0 }
  0x10   :  { %199 = vmatpush3.bf16.msra.mxu0 %v42_v20 }
  0x11   :  { %200 = vmatprep.subr.bf16.mxu0 %v234_v0 }
  0x12   :  { %219 = vmatpush3.bf16.msra.mxu1 %v114_v29 }
  0x13   :  { %220 = vmatprep.subr.bf16.mxu1 %v234_v0 }
  0x14   :  { %201 = vmatpush3.bf16.msra.mxu0 %v43_v26 }
  0x15   :  { %202 = vmatprep.subr.bf16.mxu0 %v234_v0 }
  0x16   :  { %221 = vmatpush3.bf16.msra.mxu1 %v115_v35 }
  0x17   :  { %222 = vmatprep.subr.bf16.mxu1 %v234_v0 }
  0x18   :  { %203 = vmatpush3.bf16.msra.mxu0 %v44_v32 }
  0x19   :  { %204 = vmatprep.subr.bf16.mxu0 %v234_v0 }
  0x1a   :  { %223 = vmatpush3.bf16.msra.mxu1 %v116_v41 }
  0x1b   :  { %224 = vmatprep.subr.bf16.mxu1 %v234_v0 }
  0x1c   :  { %205 = vmatpush3.bf16.msra.mxu0 %v45_v38 }
  0x1d   :  { %206 = vmatprep.subr.bf16.mxu0 %v234_v0 }
  0x1e   :  { %225 = vmatpush3.bf16.msra.mxu1 %v117_v46 }
  0x1f   :  { %226 = vmatprep.subr.bf16.mxu1 %v234_v0 }
  0x20   :  { %207 = vmatpush3.bf16.msra.mxu0 %v46_v44 }
  0x22   :  { %227 = vmatpush3.bf16.msra.mxu1 %v118_v50 }
  0x23   :  { %209 = vmatmul.mubr.bf16.vlgmr.msra.gmra.mrb[0].mxu0 %v38_v47 }
  0xf6   :  { %v88_v52 = vpop.f32.mrb[0].mxu0 }
  0xf7   :  { %v89_v53 = vadd.f32 %v172_v51, %v88_v52  ;;  %v210_v54 = vpop.f32.mrb[1].mxu0 }
  0xf8   :  { %v91_v55 = vpop.f32.mrb[2].mxu0 }
  0xf9   :  { %v110_v56 = vpack.c.bf16 %v89_v53, %v89_v53  ;;  %v211_v57 = vpop.f32.mrb[3].mxu0 }
  0xfb   :  { %229 = vmatmul.mubr.bf16.vlgmr.msra.gmra.mrb[0].mxu1 %v110_v56 }
 0x1ce   :  { %v160_v59 = vpop.f32.mrb[0].mxu1 }
 0x1cf   :  { %v161_v60 = vadd.f32 %v173_v58, %v160_v59  ;;  %v230_v61 = vpop.f32.mrb[1].mxu1 }
 0x1d0   :  { %v163_v62 = vpop.f32.mrb[2].mxu1 }
 0x1d1   :  { %167 = vst.msk [vmem:[%s397_s5] sm:$0xff] %vm166_vm1, %v161_v60  ;;  %v231_v63 = vpop.f32.mrb[3].mxu1 }

// kernel: vinet_forward.8
= control target key start
LH: loop header
LB: loop body
LE: loop exit
PB: predicated region body
PF: predicated region fallthrough
CT: control target
= control target key end

     0   :  { %10 = vsyncpa [#allocation7], 0  ;;  %s2336_s0 = inlined_call_operand.hbm [shape: f32[4,2,512], index: 0, kind: input, shape index: {}]   ;;  %s2337_s1 = inlined_call_operand.hbm [shape: bf16[128,512], index: 1, kind: input, shape index: {}]   ;;  %s2338_s2 = inlined_call_operand.hbm [shape: bf16[128,512], index: 2, kind: input, shape index: {}]   ;;  %s2339_s3 = inlined_call_operand.hbm [shape: bf16[128,512], index: 3, kind: input, shape index: {}]   ;;  %s2340_s4 = inlined_call_operand.hbm [shape: f32[1,512], index: 4, kind: input, shape index: {}]   ;;  %s2341_s5 = inlined_call_operand.hbm [shape: f32[4,2,128], index: 5, kind: output, shape index: {}]  }
   0x1   :  { %12 = vsyncpa [#allocation7 + $0x1], 0 }
   0x2   :  { %13 = vsyncpa [#allocation10], 0 }
   0x3   :  { %14 = vsyncpa [#allocation13], 0 }
   0x4   :  { %15 = vsyncpa [#allocation8], 0 }
   0x5   :  { %17 = vsyncpa [#allocation8 + $0x1], 0  ;;  %s2025_s18 = smov 0   ;;  %s2027_s19 = smov 0  }
   0x6   :  { %s2029_s20 = smov 0   ;;  %s2031_s21 = smov 0  }
   0x7 LB: > { %s1984_s22 = smov [#allocation9]   ;;  %s2046_s24 = sadd.s32 4294967295, %s1982_s21   ;;  %s1982_s21 = sphi %s2031_s21, %s2365_s21   ;;  %s1978_s20 = sphi %s2029_s20, %s2364_s20   ;;  %s1974_s19 = sphi %s2027_s19, %s2363_s19   ;;  %s1970_s18 = sphi %s2025_s18, %s2362_s18  }
   0x8   : > { %s176_s23 = sshll.u32 %s1984_s22, 4  ;;  %p1368_p0 = scmp.ge.s32.totalorder %s1982_s21, 1  ;;  %s2052_s23 = int_to_ptr.vmem [resolvable:$true] %s176_s23 }
   0x9   : > { %p2342_p1 = scmp.eq.s32.totalorder %s2046_s24, 0  ;;  %p164_p2 = scmp.lt.s32.totalorder %s1982_s21, 5 }
   0xa   : > { %s1985_s26 = smov [#allocation12]   ;;  %s1986_s29 = smov [#allocation11]  }
   0xb   : > { %p2054_p4 = pnand %p1368_p0, %p164_p2  ;;  %s202_s27 = sshll.u32 %s1985_s26, 4  ;;  %s2066_s27 = int_to_ptr.vmem [resolvable:$true] %s202_s27 }
   0xc   : > { %s189_s30 = sshll.u32 %s1986_s29, 4  ;;  %s1766_s8 = scalar_lea.hbm %s2337_s1, 4096  ;;  %s2068_s30 = int_to_ptr.vmem [resolvable:$true] %s189_s30 }
   0xd   : > { %s2345_s25 = scalar_select %p2054_p4, 1, 0 }
   0xe   : > { %p1518_p5 = pneg %p2054_p4  ;;  %p1767_p7 = scmp.ne.s32.totalorder %s2337_s1, %s1766_s8 }
   0xf   : > { %p1773_p11 = scmp.lt.u32.totalorder %s1766_s8, %s2337_s1 }
  0x10   : > { %p2062_p6 = pnand %p1518_p5, %p2342_p1 }
  0x12   : > { %p2078_p8 = pneg %p2062_p6 }
  0x14   : > { %p1769_p9 = pnand %p2078_p8, %p1767_p7 }
  0x16   : > { %p1770_p10 = pneg %p1769_p9 }
  0x18   : > { %p1775_p12 = pnand %p1773_p11, %p1770_p10 }
  0x1a   : > { %1778 = shalt.err (!%p1775_p12)
}
  0x1b   : > { %s1779_s14 = scalar_lea.vmem %s2052_s23, 4096  ;;  %p1787_p5 = scmp.lt.s32.totalorder %s2052_s23, %s2052_s23 }
  0x1c   : > { %p1780_p13 = scmp.ne.s32.totalorder %s2052_s23, %s1779_s14  ;;  %p1788_p3 = scmp.lt.s32.totalorder %s1779_s14, %s1779_s14 }
  0x1e   : > { %p1782_p0 = pnand %p1780_p13, %p2078_p8  ;;  %p1789_p7 = por %p1788_p3, %p1787_p5 }
  0x20   : > { %p1783_p2 = pneg %p1782_p0 }
  0x22   : > { %p1790_p9 = pnand %p1789_p7, %p1783_p2 }
  0x24   : > { %1793 = shalt.err (!%p1790_p9)
}
  0x25   : > { %s1987_s15 = smov 256   ;;  %s1988_s16 = smov 16  }
  0x26   : > { %1521 = dma.hbm_to_vmem [thread:$0]  (!%p2062_p6), %s2337_s1, 4096, %s2052_s23, [#allocation10], %s1987_s15, %s1987_s15, %s1988_s16  }
  0x27   : > { %s1794_s6 = scalar_lea.hbm %s2339_s3, 4096 }
  0x28   : > { %p1795_p3 = scmp.ne.s32.totalorder %s2339_s3, %s1794_s6  ;;  %p1801_p12 = scmp.lt.u32.totalorder %s1794_s6, %s2339_s3 }
  0x2a   : > { %p1797_p10 = pnand %p1795_p3, %p2078_p8 }
  0x2c   : > { %p1798_p11 = pneg %p1797_p10 }
  0x2e   : > { %p1803_p13 = pnand %p1801_p12, %p1798_p11 }
  0x30   : > { %1806 = shalt.err (!%p1803_p13)
}
  0x31   : > { %s1807_s23 = scalar_lea.vmem %s2066_s27, 4096  ;;  %p1815_p7 = scmp.lt.s32.totalorder %s2066_s27, %s2066_s27 }
  0x32   : > { %p1808_p0 = scmp.ne.s32.totalorder %s2066_s27, %s1807_s23  ;;  %p1816_p9 = scmp.lt.s32.totalorder %s1807_s23, %s1807_s23 }
  0x34   : > { %p1810_p2 = pnand %p1808_p0, %p2078_p8  ;;  %p1817_p3 = por %p1816_p9, %p1815_p7 }
  0x36   : > { %p1811_p5 = pneg %p1810_p2 }
  0x38   : > { %p1818_p10 = pnand %p1817_p3, %p1811_p5 }
  0x3a   : > { %1821 = shalt.err (!%p1818_p10)
}
  0x3b   : > { %1527 = dma.hbm_to_vmem [thread:$0]  (!%p2062_p6), %s2339_s3, 4096, %s2066_s27, [#allocation13], %s1987_s15, %s1987_s15, %s1988_s16  }
  0x3c   : > { %s1822_s22 = scalar_lea.hbm %s2338_s2, 4096 }
  0x3d   : > { %p1823_p11 = scmp.ne.s32.totalorder %s2338_s2, %s1822_s22  ;;  %p1829_p0 = scmp.lt.u32.totalorder %s1822_s22, %s2338_s2 }
  0x3f   : > { %p1825_p12 = pnand %p1823_p11, %p2078_p8 }
  0x41   : > { %p1826_p13 = pneg %p1825_p12 }
  0x43   : > { %p1831_p2 = pnand %p1829_p0, %p1826_p13 }
  0x45   : > { %1834 = shalt.err (!%p1831_p2)
}
  0x46   : > { %s1835_s27 = scalar_lea.vmem %s2068_s30, 4096  ;;  %p1843_p3 = scmp.lt.s32.totalorder %s2068_s30, %s2068_s30 }
  0x47   : > { %p1836_p5 = scmp.ne.s32.totalorder %s2068_s30, %s1835_s27  ;;  %p1844_p10 = scmp.lt.s32.totalorder %s1835_s27, %s1835_s27 }
  0x49   : > { %p1838_p7 = pnand %p1836_p5, %p2078_p8  ;;  %p1845_p11 = por %p1844_p10, %p1843_p3 }
  0x4b   : > { %p1839_p9 = pneg %p1838_p7 }
  0x4d   : > { %p1846_p12 = pnand %p1845_p11, %p1839_p9 }
  0x4f   : > { %1849 = shalt.err (!%p1846_p12)
}
  0x50   : > { %1524 = dma.hbm_to_vmem [thread:$0]  (!%p2062_p6), %s2338_s2, 4096, %s2068_s30, [#allocation10], %s1987_s15, %s1987_s15, %s1988_s16  }
  0x51   : > { %s1989_s10 = smov [#allocation14]   ;;  %s1850_s14 = scalar_lea.hbm %s2340_s4, 64 }
  0x52   : > { %s216_s23 = sshll.u32 %s1989_s10, 4  ;;  %p1851_p13 = scmp.ne.s32.totalorder %s2340_s4, %s1850_s14  ;;  %s217_s23 = int_to_ptr.vmem [resolvable:$true] %s216_s23 }
  0x53   : > { %p1857_p5 = scmp.lt.u32.totalorder %s1850_s14, %s2340_s4 }
  0x54   : > { %p1853_p0 = pnand %p1851_p13, %p2078_p8 }
  0x56   : > { %p1854_p2 = pneg %p1853_p0 }
  0x58   : > { %p1859_p7 = pnand %p1857_p5, %p1854_p2 }
  0x5a   : > { %1862 = shalt.err (!%p1859_p7)
}
  0x5b   : > { %s1863_s30 = scalar_lea.vmem %s217_s23, 64  ;;  %p1871_p11 = scmp.lt.s32.totalorder %s217_s23, %s217_s23 }
  0x5c   : > { %p1864_p9 = scmp.ne.s32.totalorder %s217_s23, %s1863_s30  ;;  %p1872_p12 = scmp.lt.s32.totalorder %s1863_s30, %s1863_s30 }
  0x5e   : > { %p1866_p3 = pnand %p1864_p9, %p2078_p8  ;;  %p1873_p1 = por %p1872_p12, %p1871_p11 }
  0x60   : > { %p1867_p10 = pneg %p1866_p3 }
  0x62   : > { %p1874_p4 = pnand %p1873_p1, %p1867_p10 }
  0x64   : > { %1877 = shalt.err (!%p1874_p4)
}
  0x65   : > { %1530 = dma.hbm_to_vmem [thread:$0]  (!%p2062_p6), %s2340_s4, 64, %s217_s23, [#allocation13]  }
  0x66   : > { %s1367_s11 = sadd.s32 4294967294, %s1982_s21   ;;  %s2174_s28 = sadd.s32 1, %s1982_s21  }
  0x67   : > { %s27_s6 = ssub.s32 %s1982_s21, %s2174_s28  ;;  %s30_s7 = sadd.s32 1, %s1978_s20 }
  0x68   : > { %p28_p1 = scmp.eq.s32.totalorder %s27_s6, 0  ;;  %p37_p4 = scmp.ne.s32.totalorder %s1978_s20, %s1974_s19 }
  0x69   : > { %p38_p8 = scmp.eq.s32.totalorder %s1982_s21, 0  ;;  %p43_p13 = scmp.ne.s32.totalorder %s1974_s19, %s1970_s18 }
  0x6a   : > { %s2185_s27 = scalar_select %p28_p1, %s1978_s20, %s30_s7  }
  0x6b   : > { %p2187_p0 = por %p38_p8, %p37_p4  ;;  %p2349_p2 = scmp.eq.s32.totalorder %s2046_s24, 0 }
  0x6c   : > { %p151_p5 = scmp.eq.s32.totalorder %s2046_s24, 3  ;;  %p157_p7 = scmp.eq.s32.totalorder %s1367_s11, 3 }
  0x6d   : > { %p2193_p6 = por %p2349_p2, %p43_p13  ;;  %p1543_p9 = scmp.lt.s32.totalorder %s1982_s21, 4 }
  0x6e   : > { %s227_s10 = sand.u32 1, %s1978_s20   ;;  %p2200_p3 = por %p151_p5, %p37_p4 }
  0x6f   : > { %p2204_p10 = por %p157_p7, %p43_p13  ;;  %s1374_s13 = sshll.u32 %s227_s10, 3 }
  0x70   : > { %s2351_s23 = scalar_select %p2200_p3, 1, 0 }
  0x71   : > { %s2352_s12 = scalar_select %p2204_p10, 1, 0 }
  0x72   : > { %s1485_s14 = sshll.u32 %s1982_s21, 7  ;;  %s231_s29 = scalar_lea.vmem [#allocation6], %s1374_s13 }
  0x73   : > { %s2212_s26 = scalar_lea.hbm %s2336_s0, %s1485_s14  ;;  %s239_s30 = sshll.u32 %s231_s29, 4  ;;  %s2214_s30 = int_to_ptr.vmem [resolvable:$true] %s239_s30 }
  0x74   : > { %p2218_p11 = pnand %p1543_p9, %p2187_p0  ;;  %s228_s16 = scalar_lea.sflag [#allocation7], %s227_s10 }
  0x75   : > { %s1878_s11 = scalar_lea.hbm %s2212_s26, 128  ;;  %s1883_s13 = scalar_lea.hbm %s2336_s0, 512 }
  0x76   : > { %p1879_p12 = scmp.ne.s32.totalorder %s2212_s26, %s1878_s11  ;;  %p1880_p1 = pneg %p2218_p11 }
  0x77   : > { %p1884_p13 = scmp.lt.u32.totalorder %s2212_s26, %s2336_s0  ;;  %p1885_p0 = scmp.lt.u32.totalorder %s1883_s13, %s1878_s11 }
  0x78   : > { %p1881_p4 = pnand %p1880_p1, %p1879_p12  ;;  %p1887_p5 = scmp.lt.u32.totalorder %s1878_s11, %s2212_s26 }
  0x79   : > { %p1886_p2 = por %p1885_p0, %p1884_p13 }
  0x7a   : > { %p1882_p8 = pneg %p1881_p4 }
  0x7b   : > { %p1888_p7 = por %p1887_p5, %p1886_p2 }
  0x7d   : > { %p1889_p9 = pnand %p1888_p7, %p1882_p8 }
  0x7f   : > { %1892 = shalt.err (!%p1889_p9)
}
  0x80   : > { %s1893_s10 = scalar_lea.vmem %s2214_s30, 128  ;;  %s1990_s17 = smov [#allocation6]  }
  0x81   : > { %p1894_p12 = scmp.ne.s32.totalorder %s2214_s30, %s1893_s10  ;;  %s1898_s22 = sshll.u32 %s1990_s17, 4  ;;  %s1899_s22 = int_to_ptr.vmem [resolvable:$false] %s1898_s22 }
  0x82   : > { %s1900_s29 = scalar_lea.vmem %s1899_s22, 256  ;;  %p1901_p3 = scmp.lt.s32.totalorder %s2214_s30, %s1899_s22 }
  0x83   : > { %p1896_p4 = pnand %p1894_p12, %p1880_p1  ;;  %p1902_p13 = scmp.lt.s32.totalorder %s1900_s29, %s1893_s10 }
  0x85   : > { %p1897_p10 = pneg %p1896_p4  ;;  %p1903_p0 = por %p1902_p13, %p1901_p3 }
  0x87   : > { %p1904_p2 = pnand %p1903_p0, %p1897_p10 }
  0x89   : > { %1907 = shalt.err (!%p1904_p2)
}
  0x8a   : > { %1534 = dma.hbm_to_vmem [thread:$0]  (!%p2218_p11), %s2212_s26, 128, %s2214_s30, %s228_s16  }
  0x8b   : > { %p2354_p8 = scmp.ne.s32.totalorder %s2345_s25, 0 }
  0x8c   : > { %s2250_s11 = sand.u32 (!%p2354_p8), 1, %s1974_s19  }
  0x8d   : > { %248 = sbr.rel (%p2354_p8) target bundleno = 774 (0x306), region = 40  ;;  %s1378_s6 = sshll.u32 (!%p2354_p8), %s2250_s11, 3 }
  0x8e   : > { %s251_s7 = scalar_lea.sflag (!%p2354_p8), [#allocation7], %s2250_s11  ;;  %s2254_s13 = scalar_lea.vmem (!%p2354_p8), [#allocation6], %s1378_s6 }
  0x94   : > { %1953 = dma.done.wait (%p2193_p6), %s251_s7, 128  }
  0x95   : > { %1955 = vsyncadd (%p2193_p6), %s251_s7, 4294967168  ;;  %p2355_p3 = scmp.eq.s32.totalorder %s2046_s24, 0 }
  0x97   : > { %1957 = dma.done.wait (%p2355_p3), [#allocation10], 8192   ;;  %p2356_p10 = pmov %p2355_p3 }
  0x98   : > { %p2357_p11 = pmov %p2355_p3 }
  0x99   : > { %1959 = vsyncadd (%p2356_p10), [#allocation10], 4294959104 }
  0x9a   : > { %1961 = dma.done.wait (%p2357_p11), [#allocation13], 4160   ;;  %p2358_p1 = pmov %p2355_p3 }
  0x9b   : > { %s1383_s25 = sshll.u32 %s2250_s11, 1  ;;  %p2359_p5 = scmp.ne.s32.totalorder %s2046_s24, 0 }
  0x9c   : > { %1963 = vsyncadd (%p2358_p1), [#allocation13], 4294963136  ;;  %s2269_s26 = scalar_lea.vmem [#allocation15], %s1383_s25  ;;  %v1991_v0 = vmov (!%p2359_p5), 0.0  }
  0x9d   : > { %301 = sbr.rel (%p2359_p5) target bundleno = 164 (0xa4), region = 64  ;;  %302 = vst [vmem:[#allocation2] sm:$0x3] (!%p2359_p5), %v1991_v0  ;;  %303 = vst [vmem:[#allocation3] sm:$0x3] (!%p2359_p5), %v1991_v0 }
  0x9e   : > { %304 = vst [vmem:[#allocation4] sm:$0x3] (!%p2359_p5), %v1991_v0  ;;  %305 = vst [vmem:[#allocation5] sm:$0x3] (!%p2359_p5), %v1991_v0 }
  0xa4 PF: > { %v1590_v1 = vld [vmem:[#allocation9 + $0x4] ss:$16 sps:$4 sm:$0xff]   ;;  %v1592_v2 = vld [vmem:[#allocation9 + $0xc] ss:$16 sps:$4 sm:$0xff]   ;;  %v1992_v3 = vmov 0   ;;  %s1482_s9 = sshll.u32 %s2046_s24, 5 }
  0xa5   : > { %533 = vmatprep.mubr.bf16.mxu0 %v1992_v3  ;;  %574 = vmatprep.mubr.bf16.mxu1 %v1992_v3  ;;  %v1594_v4 = vld [vmem:[#allocation9] ss:$16 sps:$4 sm:$0xff]   ;;  %v1595_v5 = vld [vmem:[#allocation9 + $0x8] ss:$16 sps:$4 sm:$0xff]   ;;  %v1596_v6 = vld [vmem:[#allocation9 + $0x24] ss:$16 sps:$4 sm:$0xff]   ;;  %s2292_s8 = scalar_lea.hbm %s2341_s5, %s1482_s9 }
  0xa6   : > { %501 = vmatprep.subr.bf16.mxu0 %v1590_v1  ;;  %542 = vmatprep.subr.bf16.mxu1 %v1592_v2  ;;  %v1598_v7 = vld [vmem:[#allocation9 + $0x2c] ss:$16 sps:$4 sm:$0xff]   ;;  %v1600_v8 = vld [vmem:[#allocation9 + $0x20] ss:$16 sps:$4 sm:$0xff]   ;;  %v1601_v9 = vld [vmem:[#allocation9 + $0x28] ss:$16 sps:$4 sm:$0xff]  }
  0xa7   : > { %502 = vmatpush1.bf16.msra.mxu0 %v1594_v4  ;;  %543 = vmatpush1.bf16.msra.mxu1 %v1595_v5  ;;  %v1602_v10 = vld [vmem:[#allocation9 + $0x44] ss:$16 sps:$4 sm:$0xff]   ;;  %v1604_v11 = vld [vmem:[#allocation9 + $0x4c] ss:$16 sps:$4 sm:$0xff]   ;;  %v1606_v12 = vld [vmem:[#allocation9 + $0x40] ss:$16 sps:$4 sm:$0xff]  }
  0xa8   : > { %503 = vmatprep.subr.bf16.mxu0 %v1596_v6  ;;  %544 = vmatprep.subr.bf16.mxu1 %v1598_v7  ;;  %v1607_v13 = vld [vmem:[#allocation9 + $0x48] ss:$16 sps:$4 sm:$0xff]   ;;  %v1608_v14 = vld [vmem:[#allocation9 + $0x64] ss:$16 sps:$4 sm:$0xff]   ;;  %v1610_v15 = vld [vmem:[#allocation9 + $0x6c] ss:$16 sps:$4 sm:$0xff]  }
  0xa9   : > { %v1612_v16 = vld [vmem:[#allocation9 + $0x60] ss:$16 sps:$4 sm:$0xff]   ;;  %v1613_v17 = vld [vmem:[#allocation9 + $0x68] ss:$16 sps:$4 sm:$0xff]   ;;  %v1614_v18 = vld [vmem:[#allocation9 + $0x84] ss:$16 sps:$4 sm:$0xff]  }
  0xaa   : > { %v1616_v19 = vld [vmem:[#allocation9 + $0x8c] ss:$16 sps:$4 sm:$0xff]   ;;  %v1618_v20 = vld [vmem:[#allocation9 + $0x80] ss:$16 sps:$4 sm:$0xff]   ;;  %v1619_v21 = vld [vmem:[#allocation9 + $0x88] ss:$16 sps:$4 sm:$0xff]  }
  0xab   : > { %504 = vmatpush1.bf16.msra.mxu0 %v1600_v8  ;;  %545 = vmatpush1.bf16.msra.mxu1 %v1601_v9  ;;  %v1620_v22 = vld [vmem:[#allocation9 + $0xa4] ss:$16 sps:$4 sm:$0xff]   ;;  %v1622_v23 = vld [vmem:[#allocation9 + $0xac] ss:$16 sps:$4 sm:$0xff]   ;;  %v1624_v24 = vld [vmem:[#allocation9 + $0xa0] ss:$16 sps:$4 sm:$0xff]   ;;  %v592_v9 = vlaneseq }
  0xac   : > { %505 = vmatprep.subr.bf16.mxu0 %v1602_v10  ;;  %546 = vmatprep.subr.bf16.mxu1 %v1604_v11  ;;  %v1625_v25 = vld [vmem:[#allocation9 + $0xa8] ss:$16 sps:$4 sm:$0xff]   ;;  %v1626_v26 = vld [vmem:[#allocation9 + $0xc4] ss:$16 sps:$4 sm:$0xff]   ;;  %v1628_v27 = vld [vmem:[#allocation9 + $0xcc] ss:$16 sps:$4 sm:$0xff]  }
  0xad   : > { %v1630_v28 = vld [vmem:[#allocation9 + $0xc0] ss:$16 sps:$4 sm:$0xff]   ;;  %v1631_v29 = vld [vmem:[#allocation9 + $0xc8] ss:$16 sps:$4 sm:$0xff]   ;;  %v1632_v30 = vld [vmem:[#allocation9 + $0xe4] ss:$16 sps:$4 sm:$0xff]  }
  0xae   : > { %v1634_v31 = vld [vmem:[#allocation9 + $0xec] ss:$16 sps:$4 sm:$0xff]   ;;  %v1636_v32 = vld [vmem:[#allocation9 + $0xe0] ss:$16 sps:$4 sm:$0xff]   ;;  %v1637_v33 = vld [vmem:[#allocation9 + $0xe8] ss:$16 sps:$4 sm:$0xff]  }
  0xaf   : > { %506 = vmatpush1.bf16.msra.mxu0 %v1606_v12  ;;  %547 = vmatpush1.bf16.msra.mxu1 %v1607_v13  ;;  %v307_v34 = vld [vmem:[#allocation2] sm:$0x3]  ;;  %v1640_v36 = vld [vmem:[#allocation11 + $0x4] ss:$16 sps:$4 sm:$0xff]   ;;  %v1643_v37 = vld [vmem:[#allocation11 + $0xc] ss:$16 sps:$4 sm:$0xff]  }
  0xb0   : > { %507 = vmatprep.subr.bf16.mxu0 %v1608_v14  ;;  %548 = vmatprep.subr.bf16.mxu1 %v1610_v15  ;;  %v340_v35 = vpack.c.bf16 %v307_v34, %v307_v34  ;;  %v1638_v38 = vld [vmem:[#allocation11] ss:$16 sps:$4 sm:$0xff]   ;;  %v1641_v39 = vld [vmem:[#allocation11 + $0x8] ss:$16 sps:$4 sm:$0xff]   ;;  %v1646_v40 = vld [vmem:[#allocation11 + $0x24] ss:$16 sps:$4 sm:$0xff]  }
  0xb1   : > { %v1649_v41 = vld [vmem:[#allocation11 + $0x2c] ss:$16 sps:$4 sm:$0xff]   ;;  %v1644_v42 = vld [vmem:[#allocation11 + $0x20] ss:$16 sps:$4 sm:$0xff]   ;;  %v1647_v43 = vld [vmem:[#allocation11 + $0x28] ss:$16 sps:$4 sm:$0xff]  }
  0xb2   : > { %v1652_v44 = vld [vmem:[#allocation11 + $0x44] ss:$16 sps:$4 sm:$0xff]   ;;  %v1655_v45 = vld [vmem:[#allocation11 + $0x4c] ss:$16 sps:$4 sm:$0xff]   ;;  %v1650_v46 = vld [vmem:[#allocation11 + $0x40] ss:$16 sps:$4 sm:$0xff]  }
  0xb3   : > { %508 = vmatpush1.bf16.msra.mxu0 %v1612_v16  ;;  %549 = vmatpush1.bf16.msra.mxu1 %v1613_v17  ;;  %v1653_v47 = vld [vmem:[#allocation11 + $0x48] ss:$16 sps:$4 sm:$0xff]   ;;  %v1658_v48 = vld [vmem:[#allocation11 + $0x64] ss:$16 sps:$4 sm:$0xff]   ;;  %v1661_v49 = vld [vmem:[#allocation11 + $0x6c] ss:$16 sps:$4 sm:$0xff]  }
  0xb4   : > { %509 = vmatprep.subr.bf16.mxu0 %v1614_v18  ;;  %550 = vmatprep.subr.bf16.mxu1 %v1616_v19  ;;  %v1656_v50 = vld [vmem:[#allocation11 + $0x60] ss:$16 sps:$4 sm:$0xff]   ;;  %v1659_v51 = vld [vmem:[#allocation11 + $0x68] ss:$16 sps:$4 sm:$0xff]   ;;  %v1664_v52 = vld [vmem:[#allocation11 + $0x84] ss:$16 sps:$4 sm:$0xff]  }
  0xb5   : > { %v1667_v53 = vld [vmem:[#allocation11 + $0x8c] ss:$16 sps:$4 sm:$0xff]   ;;  %v1662_v54 = vld [vmem:[#allocation11 + $0x80] ss:$16 sps:$4 sm:$0xff]   ;;  %v1665_v55 = vld [vmem:[#allocation11 + $0x88] ss:$16 sps:$4 sm:$0xff]  }
  0xb6   : > { %v1670_v56 = vld [vmem:[#allocation11 + $0xa4] ss:$16 sps:$4 sm:$0xff]   ;;  %v1673_v57 = vld [vmem:[#allocation11 + $0xac] ss:$16 sps:$4 sm:$0xff]   ;;  %v1668_v58 = vld [vmem:[#allocation11 + $0xa0] ss:$16 sps:$4 sm:$0xff]  }
  0xb7   : > { %510 = vmatpush1.bf16.msra.mxu0 %v1618_v20  ;;  %551 = vmatpush1.bf16.msra.mxu1 %v1619_v21  ;;  %v1671_v59 = vld [vmem:[#allocation11 + $0xa8] ss:$16 sps:$4 sm:$0xff]   ;;  %v1676_v60 = vld [vmem:[#allocation11 + $0xc4] ss:$16 sps:$4 sm:$0xff]   ;;  %v1679_v61 = vld [vmem:[#allocation11 + $0xcc] ss:$16 sps:$4 sm:$0xff]  }
  0xb8   : > { %511 = vmatprep.subr.bf16.mxu0 %v1620_v22  ;;  %552 = vmatprep.subr.bf16.mxu1 %v1622_v23  ;;  %v1674_v62 = vld [vmem:[#allocation11 + $0xc0] ss:$16 sps:$4 sm:$0xff]   ;;  %v1677_v63 = vld [vmem:[#allocation11 + $0xc8] ss:$16 sps:$4 sm:$0xff]   ;;  %v1682_v0 = vld [vmem:[#allocation11 + $0xe4] ss:$16 sps:$4 sm:$0xff]  }
  0xb9   : > { %v1685_v1 = vld [vmem:[#allocation11 + $0xec] ss:$16 sps:$4 sm:$0xff]   ;;  %v1680_v2 = vld [vmem:[#allocation11 + $0xe0] ss:$16 sps:$4 sm:$0xff]   ;;  %v1683_v4 = vld [vmem:[#allocation11 + $0xe8] ss:$16 sps:$4 sm:$0xff]  }
  0xba   : > { %v1688_v5 = vld [vmem:[#allocation12 + $0x4] ss:$16 sps:$4 sm:$0xff]   ;;  %v1691_v6 = vld [vmem:[#allocation12 + $0xc] ss:$16 sps:$4 sm:$0xff]   ;;  %v1993_v7 = vmov 1983009808  }
  0xbb   : > { %512 = vmatpush1.bf16.msra.mxu0 %v1624_v24  ;;  %553 = vmatpush1.bf16.msra.mxu1 %v1625_v25  ;;  %v590_v8 = vunpack.c.l.s4 %v1993_v7  ;;  %v2277_v11 = vshrl.u32 %v592_v9, 7  ;;  %v306_v25 = vld [vmem:[%s2254_s13] sm:$0xff]  ;;  %s1259_s30 = sshll.u32 %s2269_s26, 4  ;;  %s1246_s14 = scalar_lea.sflag [#allocation8], %s2250_s11  ;;  %s2294_s30 = int_to_ptr.vmem [resolvable:$true] %s1259_s30 }
  0xbc   : > { %513 = vmatprep.subr.bf16.mxu0 %v1626_v26  ;;  %554 = vmatprep.subr.bf16.mxu1 %v1628_v27  ;;  %v1710_v7 = vld [vmem:[#allocation12 + $0x80] ss:$16 sps:$4 sm:$0xff]   ;;  %v1721_v9 = vld [vmem:[#allocation12 + $0xac] ss:$16 sps:$4 sm:$0xff]   ;;  %s1908_s10 = scalar_lea.vmem %s2294_s30, 32  ;;  %p2360_p7 = scmp.ne.s32.totalorder %s2351_s23, 0 }
  0xbd   : > { %v591_v10 = vunpack.c.0.s8 %v590_v8  ;;  %v1718_v8 = vld [vmem:[#allocation12 + $0xa4] ss:$16 sps:$4 sm:$0xff]   ;;  %p1909_p6 = scmp.ne.s32.totalorder %s2294_s30, %s1908_s10  ;;  %s1994_s24 = smov [#allocation15]  }
  0xbe   : > { %s1912_s17 = sshll.u32 %s1994_s24, 4  ;;  %s1913_s17 = int_to_ptr.vmem [resolvable:$false] %s1912_s17 }
  0xbf   : > { %514 = vmatpush1.bf16.msra.mxu0 %v1630_v28  ;;  %555 = vmatpush1.bf16.msra.mxu1 %v1631_v29  ;;  %v594_v14 = vsub.s32 %v591_v10, %v2277_v11  ;;  %v1716_v10 = vld [vmem:[#allocation12 + $0xa0] ss:$16 sps:$4 sm:$0xff]   ;;  %p1910_p9 = pnand %p1909_p6, %p2360_p7  ;;  %s1914_s22 = scalar_lea.vmem %s1913_s17, 64 }
  0xc0   : > { %515 = vmatprep.subr.bf16.mxu0 %v1632_v30  ;;  %556 = vmatprep.subr.bf16.mxu1 %v1634_v31  ;;  %p1915_p4 = scmp.lt.s32.totalorder %s2294_s30, %s1913_s17  ;;  %p1916_p13 = scmp.lt.s32.totalorder %s1914_s22, %s1908_s10 }
  0xc1   : > { %p1911_p12 = pneg %p1910_p9 }
  0xc2   : > { %p1917_p0 = por %p1916_p13, %p1915_p4 }
  0xc3   : > { %516 = vmatpush1.bf16.msra.mxu0 %v1636_v32  ;;  %557 = vmatpush1.bf16.msra.mxu1 %v1637_v33 }
  0xc4   : > { %855 = vmatprep.subr.bf16.mxu0 %v1640_v36  ;;  %896 = vmatprep.subr.bf16.mxu1 %v1643_v37  ;;  %p1918_p2 = pnand %p1917_p0, %p1911_p12 }
  0xc6   : > { %534 = vmatmul.mubr.bf16.vlgmr.msra.gmra.mrb[0].mxu0 %v340_v35  ;;  %575 = vmatmul.mubr.bf16.vlgmr.msra.gmra.mrb[0].mxu1 %v340_v35 }
  0xc7   : > { %887 = vmatprep.mubr.bf16.mxu0 %v1992_v3  ;;  %928 = vmatprep.mubr.bf16.mxu1 %v1992_v3 }
  0xc8   : > { %856 = vmatpush1.bf16.msra.mxu0 %v1638_v38  ;;  %897 = vmatpush1.bf16.msra.mxu1 %v1641_v39 }
  0xc9   : > { %857 = vmatprep.subr.bf16.mxu0 %v1646_v40  ;;  %898 = vmatprep.subr.bf16.mxu1 %v1649_v41 }
  0xcc   : > { %858 = vmatpush1.bf16.msra.mxu0 %v1644_v42  ;;  %899 = vmatpush1.bf16.msra.mxu1 %v1647_v43  ;;  %v606_v43 = vld [vmem:[#allocation3] sm:$0x3] }
  0xcd   : > { %859 = vmatprep.subr.bf16.mxu0 %v1652_v44  ;;  %900 = vmatprep.subr.bf16.mxu1 %v1655_v45 }
  0xd0   : > { %860 = vmatpush1.bf16.msra.mxu0 %v1650_v46  ;;  %901 = vmatpush1.bf16.msra.mxu1 %v1653_v47 }
  0xd1   : > { %861 = vmatprep.subr.bf16.mxu0 %v1658_v48  ;;  %902 = vmatprep.subr.bf16.mxu1 %v1661_v49 }
  0xd4   : > { %862 = vmatpush1.bf16.msra.mxu0 %v1656_v50  ;;  %903 = vmatpush1.bf16.msra.mxu1 %v1659_v51 }
  0xd5   : > { %863 = vmatprep.subr.bf16.mxu0 %v1664_v52  ;;  %904 = vmatprep.subr.bf16.mxu1 %v1667_v53  ;;  %v1686_v53 = vld [vmem:[#allocation12] ss:$16 sps:$4 sm:$0xff]  }
  0xd8   : > { %864 = vmatpush1.bf16.msra.mxu0 %v1662_v54  ;;  %905 = vmatpush1.bf16.msra.mxu1 %v1665_v55  ;;  %v1689_v54 = vld [vmem:[#allocation12 + $0x8] ss:$16 sps:$4 sm:$0xff]  }
  0xd9   : > { %865 = vmatprep.subr.bf16.mxu0 %v1670_v56  ;;  %906 = vmatprep.subr.bf16.mxu1 %v1673_v57  ;;  %v1694_v56 = vld [vmem:[#allocation12 + $0x24] ss:$16 sps:$4 sm:$0xff]   ;;  %v1697_v57 = vld [vmem:[#allocation12 + $0x2c] ss:$16 sps:$4 sm:$0xff]  }
  0xdc   : > { %866 = vmatpush1.bf16.msra.mxu0 %v1668_v58  ;;  %907 = vmatpush1.bf16.msra.mxu1 %v1671_v59  ;;  %v1692_v58 = vld [vmem:[#allocation12 + $0x20] ss:$16 sps:$4 sm:$0xff]   ;;  %v1695_v59 = vld [vmem:[#allocation12 + $0x28] ss:$16 sps:$4 sm:$0xff]  }
  0xdd   : > { %867 = vmatprep.subr.bf16.mxu0 %v1676_v60  ;;  %908 = vmatprep.subr.bf16.mxu1 %v1679_v61  ;;  %v1700_v60 = vld [vmem:[#allocation12 + $0x44] ss:$16 sps:$4 sm:$0xff]   ;;  %v1703_v61 = vld [vmem:[#allocation12 + $0x4c] ss:$16 sps:$4 sm:$0xff]  }
  0xe0   : > { %868 = vmatpush1.bf16.msra.mxu0 %v1674_v62  ;;  %909 = vmatpush1.bf16.msra.mxu1 %v1677_v63  ;;  %v1698_v62 = vld [vmem:[#allocation12 + $0x40] ss:$16 sps:$4 sm:$0xff]   ;;  %v1701_v63 = vld [vmem:[#allocation12 + $0x48] ss:$16 sps:$4 sm:$0xff]  }
  0xe1   : > { %869 = vmatprep.subr.bf16.mxu0 %v1682_v0  ;;  %910 = vmatprep.subr.bf16.mxu1 %v1685_v1  ;;  %v1706_v0 = vld [vmem:[#allocation12 + $0x64] ss:$16 sps:$4 sm:$0xff]   ;;  %v1709_v1 = vld [vmem:[#allocation12 + $0x6c] ss:$16 sps:$4 sm:$0xff]  }
  0xe4   : > { %870 = vmatpush1.bf16.msra.mxu0 %v1680_v2  ;;  %911 = vmatpush1.bf16.msra.mxu1 %v1683_v4  ;;  %v1704_v2 = vld [vmem:[#allocation12 + $0x60] ss:$16 sps:$4 sm:$0xff]   ;;  %v1707_v4 = vld [vmem:[#allocation12 + $0x68] ss:$16 sps:$4 sm:$0xff]  }
  0xe5   : > { %1131 = vmatprep.subr.bf16.mxu0 %v1688_v5  ;;  %1172 = vmatprep.subr.bf16.mxu1 %v1691_v6  ;;  %v1712_v5 = vld [vmem:[#allocation12 + $0x84] ss:$16 sps:$4 sm:$0xff]   ;;  %v1715_v6 = vld [vmem:[#allocation12 + $0x8c] ss:$16 sps:$4 sm:$0xff]  }
 0x199   : > { %v535_v12 = vpop.f32.mrb[0].mxu0  ;;  %v576_v13 = vpop.f32.mrb[0].mxu1 }
 0x19a   : > { %v537_v15 = vpop.f32.mrb[1].mxu0  ;;  %v578_v16 = vpop.f32.mrb[1].mxu1 }
 0x19b   : > { %v587_v17 = vcombine.low %v535_v12, %v537_v15  ;;  %v588_v18 = vcombine.low %v576_v13, %v578_v16  ;;  %v539_v19 = vpop.f32.mrb[2].mxu0  ;;  %v580_v20 = vpop.f32.mrb[2].mxu1  ;;  %v1719_v12 = vld [vmem:[#allocation12 + $0xa8] ss:$16 sps:$4 sm:$0xff]   ;;  %v1724_v13 = vld [vmem:[#allocation12 + $0xc4] ss:$16 sps:$4 sm:$0xff]  }
 0x19c   : > { %v540_v21 = vpop.f32.mrb[3].mxu0  ;;  %v581_v22 = vpop.f32.mrb[3].mxu1  ;;  %v1722_v15 = vld [vmem:[#allocation12 + $0xc0] ss:$16 sps:$4 sm:$0xff]   ;;  %v1725_v16 = vld [vmem:[#allocation12 + $0xc8] ss:$16 sps:$4 sm:$0xff]  }
 0x19d   : > { %v595_v23 = vrot.slane %v587_v17, %v594_v14  ;;  %v602_v24 = vrot.slane %v588_v18, %v594_v14  ;;  %v1727_v14 = vld [vmem:[#allocation12 + $0xcc] ss:$16 sps:$4 sm:$0xff]   ;;  %v1730_v17 = vld [vmem:[#allocation12 + $0xe4] ss:$16 sps:$4 sm:$0xff]   ;;  %v1728_v19 = vld [vmem:[#allocation12 + $0xe0] ss:$16 sps:$4 sm:$0xff]  }
 0x19e   : > { %v1733_v18 = vld [vmem:[#allocation12 + $0xec] ss:$16 sps:$4 sm:$0xff]   ;;  %v1731_v20 = vld [vmem:[#allocation12 + $0xe8] ss:$16 sps:$4 sm:$0xff]  }
 0x19f   : > { %v603_v26 = vcombine.low %v595_v23, %v602_v24  ;;  %v937_v21 = vld [vmem:[#allocation4] sm:$0x3]  ;;  %v677_v23 = vsub.s32 0, %v2277_v11  ;;  %v673_v24 = vld [vmem:[#allocation14] sm:$0xf] }
 0x1a0   : > { %v970_v22 = vpack.c.bf16 %v937_v21, %v937_v21 }
 0x1a1   : > { %v605_v27 = vadd.f32 %v603_v26, %v306_v25  ;;  %v681_v25 = vsub.s32 1, %v2277_v11  ;;  %v678_v26 = vrot.slane %v673_v24, %v677_v23 }
 0x1a3   : > { %v607_v28 = vsub.f32 0.0, %v605_v27  ;;  %v614_v29 = vrot.slane %v605_v27, 2  ;;  %v625_v33 = vrot.slane %v605_v27, 6  ;;  %v622_v37 = vrot.slane %v605_v27, 4 }
 0x1a4   : > { %v682_v27 = vrot.slane %v673_v24, %v681_v25 }
 0x1a5   : > { %v608_v30 = vmul.f32 1.442695, %v607_v28  ;;  %v616_v31 = vsub.f32 0.0, %v614_v29  ;;  %v627_v34 = vsub.f32 0.0, %v625_v33  ;;  %v689_v28 = vsub.s32 3, %v2277_v11 }
 0x1a7   : > { %1734 = vpow2.f32 %v608_v30  ;;  %v617_v32 = vmul.f32 1.442695, %v616_v31  ;;  %v628_v35 = vmul.f32 1.442695, %v627_v34 }
 0x1a9   : > { %1736 = vpow2.f32 %v617_v32 }
 0x1aa   : > { %1738 = vpow2.f32 %v628_v35  ;;  %v690_v35 = vrot.slane %v673_v24, %v689_v28 }
 0x1b1   : > { %v1735_v36 = vpop.eup %1734 }
 0x1b2   : > { %v610_v38 = vadd.f32 1.0, %v1735_v36 }
 0x1b3   : > { %v1737_v39 = vpop.eup %1736 }
 0x1b4   : > { %1740 = vrcp.f32 %v610_v38  ;;  %v619_v40 = vadd.f32 1.0, %v1737_v39  ;;  %v1739_v41 = vpop.eup %1738 }
 0x1b5   : > { %1742 = vtanh.f32 %v622_v37  ;;  %v630_v46 = vadd.f32 1.0, %v1739_v41 }
 0x1b6   : > { %1744 = vrcp.f32 %v619_v40 }
 0x1b7   : > { %1746 = vrcp.f32 %v630_v46 }
 0x1be   : > { %v1741_v42 = vpop.eup %1740 }
 0x1bf   : > { %v1743_v44 = vpop.eup %1742 }
 0x1c0   : > { %v1745_v45 = vpop.eup %1744  ;;  %v634_v48 = vmul.f32 %v1743_v44, %v1741_v42 }
 0x1c1   : > { %v633_v47 = vmul.f32 %v1745_v45, %v606_v43  ;;  %v1747_v50 = vpop.eup %1746  ;;  %v685_v45 = vsub.s32 2, %v2277_v11 }
 0x1c3   : > { %v635_v49 = vadd.f32 %v634_v48, %v633_v47  ;;  %v686_v47 = vrot.slane %v673_v24, %v685_v45 }
 0x1c5   : > { %1748 = vtanh.f32 %v635_v49  ;;  %639 = vst [vmem:[#allocation3] sm:$0x3] %v635_v49 }
 0x1cf   : > { %v1749_v51 = vpop.eup %1748 }
 0x1d0   : > { %v637_v52 = vmul.f32 %v1749_v51, %v1747_v50 }
 0x1d2   : > { %638 = vst [vmem:[#allocation2] sm:$0x3] %v637_v52  ;;  %v672_v55 = vpack.c.bf16 %v637_v52, %v637_v52 }
 0x1d4   : > { %888 = vmatmul.mubr.bf16.vlgmr.msra.gmra.mrb[4].mxu0 %v672_v55  ;;  %929 = vmatmul.mubr.bf16.vlgmr.msra.gmra.mrb[4].mxu1 %v672_v55 }
 0x1d5   : > { %1132 = vmatpush1.bf16.msra.mxu0 %v1686_v53  ;;  %1173 = vmatpush1.bf16.msra.mxu1 %v1689_v54 }
 0x1d6   : > { %1133 = vmatprep.subr.bf16.mxu0 %v1694_v56  ;;  %1174 = vmatprep.subr.bf16.mxu1 %v1697_v57  ;;  %v1217_v56 = vld [vmem:[#allocation5] sm:$0x3] }
 0x1d7   : > { %1163 = vmatprep.mubr.bf16.mxu0 %v1992_v3  ;;  %1204 = vmatprep.mubr.bf16.mxu1 %v1992_v3  ;;  %v1713_v3 = vld [vmem:[#allocation12 + $0x88] ss:$16 sps:$4 sm:$0xff]  }
 0x1d9   : > { %1134 = vmatpush1.bf16.msra.mxu0 %v1692_v58  ;;  %1175 = vmatpush1.bf16.msra.mxu1 %v1695_v59 }
 0x1da   : > { %1135 = vmatprep.subr.bf16.mxu0 %v1700_v60  ;;  %1176 = vmatprep.subr.bf16.mxu1 %v1703_v61 }
 0x1dd   : > { %1136 = vmatpush1.bf16.msra.mxu0 %v1698_v62  ;;  %1177 = vmatpush1.bf16.msra.mxu1 %v1701_v63 }
 0x1de   : > { %1137 = vmatprep.subr.bf16.mxu0 %v1706_v0  ;;  %1178 = vmatprep.subr.bf16.mxu1 %v1709_v1 }
 0x1e1   : > { %1138 = vmatpush1.bf16.msra.mxu0 %v1704_v2  ;;  %1179 = vmatpush1.bf16.msra.mxu1 %v1707_v4 }
 0x1e2   : > { %1139 = vmatprep.subr.bf16.mxu0 %v1712_v5  ;;  %1180 = vmatprep.subr.bf16.mxu1 %v1715_v6 }
 0x1e5   : > { %1140 = vmatpush1.bf16.msra.mxu0 %v1710_v7  ;;  %1181 = vmatpush1.bf16.msra.mxu1 %v1713_v3 }
 0x1e6   : > { %1141 = vmatprep.subr.bf16.mxu0 %v1718_v8  ;;  %1182 = vmatprep.subr.bf16.mxu1 %v1721_v9 }
 0x1e9   : > { %1142 = vmatpush1.bf16.msra.mxu0 %v1716_v10  ;;  %1183 = vmatpush1.bf16.msra.mxu1 %v1719_v12 }
 0x1ea   : > { %1143 = vmatprep.subr.bf16.mxu0 %v1724_v13  ;;  %1184 = vmatprep.subr.bf16.mxu1 %v1727_v14 }
 0x1ed   : > { %1144 = vmatpush1.bf16.msra.mxu0 %v1722_v15  ;;  %1185 = vmatpush1.bf16.msra.mxu1 %v1725_v16 }
 0x1ee   : > { %1145 = vmatprep.subr.bf16.mxu0 %v1730_v17  ;;  %1186 = vmatprep.subr.bf16.mxu1 %v1733_v18 }
 0x1f1   : > { %1146 = vmatpush1.bf16.msra.mxu0 %v1728_v19  ;;  %1187 = vmatpush1.bf16.msra.mxu1 %v1731_v20 }
 0x1f4   : > { %1164 = vmatmul.mubr.bf16.vlgmr.msra.gmra.mrb[4].mxu0 %v970_v22  ;;  %1205 = vmatmul.mubr.bf16.vlgmr.msra.gmra.mrb[4].mxu1 %v970_v22 }
 0x2c7   : > { %v1165_v29 = vpop.f32.mrb[4].mxu0  ;;  %v1206_v30 = vpop.f32.mrb[4].mxu1 }
 0x2c8   : > { %v1486_v31 = vadd.f32 %v1165_v29, %v678_v26  ;;  %v1167_v32 = vpop.f32.mrb[5].mxu0  ;;  %v1208_v33 = vpop.f32.mrb[5].mxu1  ;;  %v1488_v49 = vadd.f32 %v1206_v30, %v686_v47 }
 0x2c9   : > { %v1487_v34 = vadd.f32 %v1167_v32, %v682_v27  ;;  %v1169_v36 = vpop.f32.mrb[6].mxu0  ;;  %v1210_v37 = vpop.f32.mrb[6].mxu1  ;;  %v1489_v44 = vadd.f32 %v1208_v33, %v690_v35 }
 0x2ca   : > { %v1218_v38 = vsub.f32 0.0, %v1486_v31  ;;  %v1170_v39 = vpop.f32.mrb[7].mxu0  ;;  %v1211_v40 = vpop.f32.mrb[7].mxu1 }
 0x2cb   : > { %v1224_v41 = vsub.f32 0.0, %v1487_v34  ;;  %v1231_v46 = vsub.f32 0.0, %v1489_v44 }
 0x2cc   : > { %v1219_v42 = vmul.f32 1.442695, %v1218_v38 }
 0x2cd   : > { %v1225_v43 = vmul.f32 1.442695, %v1224_v41  ;;  %v1232_v48 = vmul.f32 1.442695, %v1231_v46 }
 0x2ce   : > { %1750 = vpow2.f32 %v1219_v42 }
 0x2cf   : > { %1752 = vpow2.f32 %v1225_v43 }
 0x2d0   : > { %1754 = vpow2.f32 %v1232_v48 }
 0x2d1   : > { %1756 = vtanh.f32 %v1488_v49 }
 0x2d8   : > { %v1751_v50 = vpop.eup %1750 }
 0x2d9   : > { %v1753_v51 = vpop.eup %1752  ;;  %v1221_v52 = vadd.f32 1.0, %v1751_v50 }
 0x2da   : > { %v1227_v53 = vadd.f32 1.0, %v1753_v51  ;;  %v1755_v54 = vpop.eup %1754 }
 0x2db   : > { %1758 = vrcp.f32 %v1221_v52  ;;  %v1757_v55 = vpop.eup %1756  ;;  %v1234_v59 = vadd.f32 1.0, %v1755_v54 }
 0x2dc   : > { %1760 = vrcp.f32 %v1227_v53 }
 0x2dd   : > { %1762 = vrcp.f32 %v1234_v59 }
 0x2e5   : > { %v1759_v57 = vpop.eup %1758 }
 0x2e6   : > { %v1761_v11 = vpop.eup %1760  ;;  %v1238_v58 = vmul.f32 %v1759_v57, %v1757_v55 }
 0x2e7   : > { %v1237_v60 = vmul.f32 %v1761_v11, %v1217_v56  ;;  %v1763_v62 = vpop.eup %1762 }
 0x2e9   : > { %v1239_v61 = vadd.f32 %v1238_v58, %v1237_v60 }
 0x2eb   : > { %1243 = vst [vmem:[#allocation5] sm:$0x3] %v1239_v61  ;;  %1764 = vtanh.f32 %v1239_v61 }
 0x2f5   : > { %v1765_v63 = vpop.eup %1764 }
 0x2f6   : > { %v1241_v0 = vmul.f32 %v1765_v63, %v1763_v62 }
 0x2f8   : > { %1242 = vst [vmem:[#allocation4] sm:$0x3] %v1241_v0  ;;  %1244 = vst [vmem:[%s2269_s26] sm:$0x3] %v1241_v0 }
 0x2f9   : > { %1921 = shalt.err (!%p1918_p2)
}
 0x2fa   : > { %s1922_s29 = scalar_lea.hbm %s2292_s8, 32  ;;  %s1926_s7 = scalar_lea.hbm %s2341_s5, 128 }
 0x2fb   : > { %p1923_p8 = scmp.ne.s32.totalorder %s2292_s8, %s1922_s29  ;;  %p1927_p11 = scmp.lt.u32.totalorder %s2292_s8, %s2341_s5 }
 0x2fc   : > { %p1928_p1 = scmp.lt.u32.totalorder %s1926_s7, %s1922_s29  ;;  %p1930_p6 = scmp.lt.u32.totalorder %s1922_s29, %s2292_s8 }
 0x2fd   : > { %p1924_p3 = pnand %p1923_p8, %p2360_p7 }
 0x2fe   : > { %p1929_p5 = por %p1928_p1, %p1927_p11 }
 0x2ff   : > { %p1925_p10 = pneg %p1924_p3 }
 0x300   : > { %p1931_p9 = por %p1930_p6, %p1929_p5 }
 0x302   : > { %p1932_p12 = pnand %p1931_p9, %p1925_p10 }
 0x304   : > { %1935 = shalt.err (!%p1932_p12)
}
 0x305   : > { %1516 = dma.vmem_to_hbm [thread:$0]  (%p2360_p7), %s2294_s30, 32, %s2292_s8, %s1246_s14  }
 0x306 PF: > { %p1548_p4 = scmp.ge.s32.totalorder %s1982_s21, 2  ;;  %s1271_s26 = sand.u32 1, %s1970_s18  }
 0x307   : > { %p2361_p13 = scmp.ne.s32.totalorder %s2352_s12, 0  ;;  %s1272_s9 = scalar_lea.sflag [#allocation8], %s1271_s26 }
 0x309   : > { %p1536_p0 = pnand %p1548_p4, %p2361_p13 }
 0x30b   : > { %1965 = dma.done.wait (!%p1536_p0), %s1272_s9, 32  }
 0x30c   : > { %1967 = vsyncadd (!%p1536_p0), %s1272_s9, 4294967264  ;;  %p20_p2 = scmp.ge.s32.totalorder %s2174_s28, 6   ;;  %s2362_s18 = smov %s1974_s19 }
 0x30d   : > { %s2363_s19 = smov %s1978_s20  ;;  %s2364_s20 = smov %s2185_s27 }
 0x30e   : > { %s2365_s21 = smov %s2174_s28  ;;  %22 = sbr.rel (!%p20_p2) target bundleno = 7 (0x7), region = 105 }
 0x315   :  { %1277 = vsyncpa [#allocation7], 1 }
 0x316   :  { %1279 = vsyncpa [#allocation7 + $0x1], 1 }
 0x317   :  { %1280 = vsyncpa [#allocation10], 1 }
 0x318   :  { %1281 = vsyncpa [#allocation13], 1 }
 0x319   :  { %1282 = vsyncpa [#allocation8], 1 }
 0x31a   :  { %1284 = vsyncpa [#allocation8 + $0x1], 1 }

</bundles_post_ra>
